<compile_context>
chip_gen: v6e
topology: v6e:2x2x1
jax: 0.10.0
libtpu: 0.0.40
codegen_flags: <defaults>
</compile_context>

<pallas_src>
import math

import jax
import jax.numpy as jnp
from jax.experimental import pallas as pl
from jax.experimental.pallas import tpu as pltpu

H = 768          # hidden size fixed by the module (Linear in_features=768)
HEAD_PAD = 128   # lane-dense padding of the 3 head columns
LOG_EPS = math.log(1e-9)
NEG_INF = -1e30


# ------------------------------ small helpers --------------------------------
def _round_up(n, m):
    return ((n + m - 1) // m) * m


def _pick_tile(n_padded, unit, max_tile):
    """Largest multiple of `unit` that divides n_padded, capped at max_tile."""
    t = (min(max_tile, n_padded) // unit) * unit
    while t > unit:
        if n_padded % t == 0:
            return t
        t -= unit
    return unit


def _logaddexp(a, b):
    m = jnp.maximum(a, b)
    return m + jnp.log(1.0 + jnp.exp(-jnp.abs(a - b)))


# ------------------------ Kernel A: transform + heads -------------------------
def _head_kernel(x_ref, wt_ref, bt_ref, g_ref, beta_ref, wh_ref, bh_ref, out_ref):
    x = x_ref[...]                                                   # (TM, H) bf16
    h = jnp.dot(x, wt_ref[...], preferred_element_type=jnp.float32) + bt_ref[...]
    mu = jnp.mean(h, axis=-1, keepdims=True)
    var = jnp.mean(jnp.square(h - mu), axis=-1, keepdims=True)
    ln = (h - mu) * jax.lax.rsqrt(var + 1e-12) * g_ref[...] + beta_ref[...]
    # lane-dense (TM, 128) output; cols 0/1/2 = match/start/end, rest zero-pad
    out_ref[...] = jnp.dot(ln.astype(jnp.bfloat16), wh_ref[...],
                           preferred_element_type=jnp.float32) + bh_ref[...]


def run_heads(rows_f32, packed):
    """rows_f32: (n, 768) f32 -> (n, 128) f32; columns 0/1/2 = match/start/end."""
    n = rows_f32.shape[0]
    n_pad = _round_up(max(n, 128), 128)
    tile = _pick_tile(n_pad, 128, 512)          # <=512 rows keeps VMEM safe on v7x
    x = rows_f32.astype(jnp.bfloat16)
    if n_pad != n:
        x = jnp.pad(x, ((0, n_pad - n), (0, 0)))
    const = lambda i: (0, 0)
    out = pl.pallas_call(
        _head_kernel,
        out_shape=jax.ShapeDtypeStruct((n_pad, HEAD_PAD), jnp.float32),
        grid=(n_pad // tile,),
        in_specs=[
            pl.BlockSpec((tile, H), lambda i: (i, 0)),
            pl.BlockSpec((H, H), const),          # bf16 transform weight
            pl.BlockSpec((1, H), const),
            pl.BlockSpec((1, H), const),
            pl.BlockSpec((1, H), const),
            pl.BlockSpec((H, HEAD_PAD), const),   # bf16, zero-padded head weight
            pl.BlockSpec((1, HEAD_PAD), const),
        ],
        out_specs=pl.BlockSpec((tile, HEAD_PAD), lambda i: (i, 0)),
        compiler_params=pltpu.CompilerParams(dimension_semantics=("parallel",)),
    )(x, packed["w_t"], packed["b_t"], packed["ln_g"], packed["ln_b"],
      packed["w_heads"], packed["b_heads"])
    return out[:n]


def _pack_params(params):
    w_heads = jnp.zeros((H, HEAD_PAD), jnp.float32).at[:, :3].set(params["w_heads"])
    b_heads = jnp.zeros((1, HEAD_PAD), jnp.float32).at[:, :3].set(params["b_heads"])
    return {
        "w_t": params["w_t"].astype(jnp.bfloat16),
        "b_t": params["b_t"],
        "ln_g": params["ln_g"],
        "ln_b": params["ln_b"],
        "w_heads": w_heads.astype(jnp.bfloat16),
        "b_heads": b_heads,
    }


# ------------------------ Kernel B: training losses ---------------------------
def _train_loss_kernel(ml_ref, sl_ref, el_ref, cm_ref, slab_ref, elab_ref, out_ref):
    # match: -log(softmax(match_logits)[:, 0] + 1e-9), in the log domain
    ml = ml_ref[...]
    m = jnp.max(ml, axis=-1, keepdims=True)
    lse_match = m + jnp.log(jnp.sum(jnp.exp(ml - m), axis=-1, keepdims=True))
    log_p_match = ml[:, 0:1] - lse_match

    cm = cm_ref[...]

    def log_label_prob(logits, label):
        # log( sum_i softmax(masked_logits)_i * label_i ), label in {0,1}
        z = jnp.where(cm > 0.5, logits, NEG_INF)
        zm = jnp.max(z, axis=-1, keepdims=True)
        lse = zm + jnp.log(jnp.sum(jnp.exp(z - zm), axis=-1, keepdims=True))
        zl = jnp.where(label > 0.5, z, NEG_INF)
        zlm = jnp.max(zl, axis=-1, keepdims=True)
        lse_l = zlm + jnp.log(jnp.sum(jnp.exp(zl - zlm), axis=-1, keepdims=True))
        return lse_l - lse

    log_p_start = log_label_prob(sl_ref[...], slab_ref[...])
    log_p_end = log_label_prob(el_ref[...], elab_ref[...])

    out_ref[...] = -(_logaddexp(log_p_match, LOG_EPS)
                     + _logaddexp(log_p_start, LOG_EPS)
                     + _logaddexp(log_p_end, LOG_EPS))


def run_train_loss(match_logits, start_logits, end_logits, context_mask,
                   start_label, end_label):
    b, d = match_logits.shape
    s = start_logits.shape[1]
    b_pad = _round_up(max(b, 8), 8)
    tile = _pick_tile(b_pad, 8, 128)

    def padb(a):
        return jnp.pad(a, ((0, b_pad - b), (0, 0))) if b_pad != b else a

    row = lambda i: (i, 0)
    per_ex = pl.pallas_call(
        _train_loss_kernel,
        out_shape=jax.ShapeDtypeStruct((b_pad, 1), jnp.float32),
        grid=(b_pad // tile,),
        in_specs=[
            pl.BlockSpec((tile, d), row),
            pl.BlockSpec((tile, s), row),
            pl.BlockSpec((tile, s), row),
            pl.BlockSpec((tile, s), row),
            pl.BlockSpec((tile, s), row),
            pl.BlockSpec((tile, s), row),
        ],
        out_specs=pl.BlockSpec((tile, 1), row),
        compiler_params=pltpu.CompilerParams(dimension_semantics=("parallel",)),
    )(padb(match_logits), padb(start_logits), padb(end_logits),
      padb(context_mask), padb(start_label), padb(end_label))
    # mean(match_nll)+mean(start_nll)+mean(end_nll) == batch-mean of summed NLLs
    return jnp.mean(per_ex[:b, 0])


# ------------------------ Kernel C: eval probabilities ------------------------
def _match_prob_kernel(ml_ref, mp_ref):
    z = ml_ref[...]
    m = jnp.max(z, axis=-1, keepdims=True)
    e = jnp.exp(z - m)
    mp_ref[...] = e / jnp.sum(e, axis=-1, keepdims=True)


def _eval_span_kernel(sl_ref, el_ref, cm_ref, sp_ref, ep_ref):
    cm = cm_ref[...]

    def masked_softmax(z):
        z = jnp.where(cm > 0.5, z, NEG_INF)
        m = jnp.max(z, axis=-1, keepdims=True)
        e = jnp.exp(z - m)
        return e / jnp.sum(e, axis=-1, keepdims=True)

    sp_ref[...] = masked_softmax(sl_ref[...])
    ep_ref[...] = masked_softmax(el_ref[...])


def run_eval_probs(match_logits, start_all, end_all, context_mask3):
    b, d, s = start_all.shape
    row = lambda i: (i, 0)

    # --- match softmax over docs, tiled over batch ---
    b_pad = _round_up(max(b, 8), 8)
    tb = _pick_tile(b_pad, 8, 128)
    ml = jnp.pad(match_logits, ((0, b_pad - b), (0, 0))) if b_pad != b else match_logits
    match_prob = pl.pallas_call(
        _match_prob_kernel,
        out_shape=jax.ShapeDtypeStruct((b_pad, d), jnp.float32),
        grid=(b_pad // tb,),
        in_specs=[pl.BlockSpec((tb, d), row)],
        out_specs=pl.BlockSpec((tb, d), row),
        compiler_params=pltpu.CompilerParams(dimension_semantics=("parallel",)),
    )(ml)[:b]

    # --- span softmax: flatten (B, D) onto rows, S stays on the lane axis ---
    n2 = b * d
    n2_pad = _round_up(max(n2, 8), 8)
    tr = _pick_tile(n2_pad, 8, 256)

    def flat(a):
        a2 = a.reshape(n2, s)
        return jnp.pad(a2, ((0, n2_pad - n2), (0, 0))) if n2_pad != n2 else a2

    sp, ep = pl.pallas_call(
        _eval_span_kernel,
        out_shape=(jax.ShapeDtypeStruct((n2_pad, s), jnp.float32),
                   jax.ShapeDtypeStruct((n2_pad, s), jnp.float32)),
        grid=(n2_pad // tr,),
        in_specs=[pl.BlockSpec((tr, s), row),
                  pl.BlockSpec((tr, s), row),
                  pl.BlockSpec((tr, s), row)],
        out_specs=(pl.BlockSpec((tr, s), row),
                   pl.BlockSpec((tr, s), row)),
        compiler_params=pltpu.CompilerParams(dimension_semantics=("parallel",)),
    )(flat(start_all), flat(end_all), flat(context_mask3))

    return match_prob, sp[:n2].reshape(b, d, s), ep[:n2].reshape(b, d, s)


# ------------------------ encoder stand-in (glue) ------------------------------
def synthetic_encoder(params, input_ids, input_mask, input_seg):
    # TODO(synk): the original module runs a pretrained BertModel/RPEBertModel
    # loaded from disk; no checkpoint can be loaded here, so a deterministic
    # embedding-sum stand-in produces the (bsz, num_docs, seq_len, 768) enc_rep
    # that the (Pallas-implemented) heads consume.
    tok = params["tok_emb"][input_ids]                       # (B, D, S, H)
    seg = params["seg_emb"][input_seg]                       # (B, D, S, H)
    pos = params["pos_emb"][None, None, :, :]                # (1, 1, S, H)
    return (tok + seg + pos) * input_mask[..., None].astype(jnp.float32)


# ------------------------------ full forward -----------------------------------
def multi_task_reader_forward(params, input_ids, input_mask, input_seg,
                              context_mask, start_label=None, end_label=None):
    bsz, num_docs, seq_len = input_ids.shape
    packed = _pack_params(params)
    enc_rep = synthetic_encoder(params, input_ids, input_mask, input_seg)  # (B,D,S,H)

    if start_label is not None:
        # Training consumes only: start/end logits of doc 0 (all positions) and
        # match logits of every doc (CLS position).  Run the heads only there.
        doc0_rows = enc_rep[:, 0].reshape(bsz * seq_len, H)
        cls_rows = enc_rep[:, :, 0].reshape(bsz * num_docs, H)
        rows = jnp.concatenate([doc0_rows, cls_rows], axis=0)
        out = run_heads(rows, packed)                         # (n, 128)
        start_logits = out[:bsz * seq_len, 1].reshape(bsz, seq_len)
        end_logits = out[:bsz * seq_len, 2].reshape(bsz, seq_len)
        match_logits = out[bsz * seq_len:, 0].reshape(bsz, num_docs)
        return run_train_loss(match_logits, start_logits, end_logits,
                              context_mask.astype(jnp.float32),
                              start_label.astype(jnp.float32),
                              end_label.astype(jnp.float32))
    else:
        rows = enc_rep.reshape(-1, H)
        out = run_heads(rows, packed)                         # (B*D*S, 128)
        match_all = out[:, 0].reshape(bsz, num_docs, seq_len)
        start_all = out[:, 1].reshape(bsz, num_docs, seq_len)
        end_all = out[:, 2].reshape(bsz, num_docs, seq_len)
        match_logits = match_all[:, :, 0]                     # CLS position
        return run_eval_probs(match_logits, start_all, end_all,
                              context_mask.astype(jnp.float32))


# --------------------------- deterministic parameters ---------------------------
def init_params(key, vocab_size, max_seq_len):
    ks = jax.random.split(key, 5)
    scale = 0.02
    return {
        "tok_emb": scale * jax.random.normal(ks[0], (vocab_size, H), jnp.float32),
        "seg_emb": scale * jax.random.normal(ks[1], (2, H), jnp.float32),
        "pos_emb": scale * jax.random.normal(ks[2], (max_seq_len, H), jnp.float32),
        "w_t": scale * jax.random.normal(ks[3], (H, H), jnp.float32),   # (in, out)
        "b_t": jnp.zeros((1, H), jnp.float32),
        "ln_g": jnp.ones((1, H), jnp.float32),        # torch LayerNorm defaults
        "ln_b": jnp.zeros((1, H), jnp.float32),
        "w_heads": scale * jax.random.normal(ks[4], (H, 3), jnp.float32),
        "b_heads": jnp.zeros((1, 3), jnp.float32),
    }


if __name__ == "__main__":
    bsz, num_docs, seq_len, vocab = 2, 3, 16, 128
    key = jax.random.PRNGKey(0)
    k_ids, k_seg, k_par = jax.random.split(key, 3)

    params = init_params(k_par, vocab, seq_len)

    input_ids = jax.random.randint(k_ids, (bsz, num_docs, seq_len), 0, vocab)
    input_mask = jnp.ones((bsz, num_docs, seq_len), jnp.float32)
    input_seg = jax.random.randint(k_seg, (bsz, num_docs, seq_len), 0, 2)

    # training branch: context_mask / labels refer to the positive (doc 0) passage
    context_mask_train = jnp.zeros((bsz, seq_len), jnp.float32).at[:, 2:14].set(1.0)
    start_label = jnp.zeros((bsz, seq_len), jnp.float32).at[:, 4].set(1.0)
    end_label = jnp.zeros((bsz, seq_len), jnp.float32).at[:, 7].set(1.0)

    fwd = jax.jit(multi_task_reader_forward)
    loss = fwd(params, input_ids, input_mask, input_seg,
               context_mask_train, start_label, end_label)

    # eval branch: per-document context mask -> (match_prob, start_prob, end_prob)
    context_mask_eval = jnp.tile(context_mask_train[:, None, :], (1, num_docs, 1))
    match_prob, start_prob, end_prob = fwd(params, input_ids, input_mask, input_seg,
                                           context_mask_eval)

    jax.block_until_ready((loss, match_prob, start_prob, end_prob))
    print("KERNEL_OK")
</pallas_src>

<mosaic_0001>
module attributes {stable_mosaic.version = 11 : i64} {
  func.func @_head_kernel(%arg0: i32, %arg1: memref<128x768xbf16, #tpu.memory_space<vmem>>, %arg2: memref<768x768xbf16, #tpu.memory_space<vmem>>, %arg3: memref<1x768xf32, #tpu.memory_space<vmem>>, %arg4: memref<1x768xf32, #tpu.memory_space<vmem>>, %arg5: memref<1x768xf32, #tpu.memory_space<vmem>>, %arg6: memref<768x128xbf16, #tpu.memory_space<vmem>>, %arg7: memref<1x128xf32, #tpu.memory_space<vmem>>, %arg8: memref<128x128xf32, #tpu.memory_space<vmem>>) attributes {dimension_semantics = [#tpu.dimension_semantics<parallel>], iteration_bounds = array<i64: 1>, scalar_prefetch = 0 : i64, scratch_operands = 0 : i64, tpu.core_type = #tpu.core_type<tc>, window_params = [{transform_indices = @transform_0, window_bounds = array<i64: 128, 768>}, {pipeline_mode = #tpu.pipeline_mode<synchronous>, transform_indices = @transform_1, window_bounds = array<i64: 768, 768>}, {pipeline_mode = #tpu.pipeline_mode<synchronous>, transform_indices = @transform_2, window_bounds = array<i64: 1, 768>}, {pipeline_mode = #tpu.pipeline_mode<synchronous>, transform_indices = @transform_3, window_bounds = array<i64: 1, 768>}, {pipeline_mode = #tpu.pipeline_mode<synchronous>, transform_indices = @transform_4, window_bounds = array<i64: 1, 768>}, {pipeline_mode = #tpu.pipeline_mode<synchronous>, transform_indices = @transform_5, window_bounds = array<i64: 768, 128>}, {pipeline_mode = #tpu.pipeline_mode<synchronous>, transform_indices = @transform_6, window_bounds = array<i64: 1, 128>}, {transform_indices = @transform_7, window_bounds = array<i64: 128, 128>}]} {
    %c0 = arith.constant 0 : index
    %c0_0 = arith.constant 0 : index
    %0 = vector.load %arg1[%c0, %c0_0] : memref<128x768xbf16, #tpu.memory_space<vmem>>, vector<128x768xbf16>
    %c0_1 = arith.constant 0 : index
    %c0_2 = arith.constant 0 : index
    %1 = vector.load %arg2[%c0_1, %c0_2] : memref<768x768xbf16, #tpu.memory_space<vmem>>, vector<768x768xbf16>
    %cst = arith.constant dense<0.000000e+00> : vector<128x768xf32>
    %2 = tpu.matmul %0, %1, %cst {dimension_numbers = #tpu.dot_dimension_numbers<[1], [0], [0], [1], [0, 0, 1, 1], [], []>} : vector<128x768xbf16>, vector<768x768xbf16>, vector<128x768xf32> -> vector<128x768xf32>
    %c0_3 = arith.constant 0 : index
    %c0_4 = arith.constant 0 : index
    %3 = vector.load %arg3[%c0_3, %c0_4] : memref<1x768xf32, #tpu.memory_space<vmem>>, vector<1x768xf32>
    %4 = vector.broadcast %3 : vector<1x768xf32> to vector<128x768xf32>
    %5 = arith.addf %2, %4 : vector<128x768xf32>
    %cst_5 = arith.constant dense<0.000000e+00> : vector<128xf32>
    %6 = vector.multi_reduction <add>, %5, %cst_5 [1] : vector<128x768xf32> to vector<128xf32>
    %7 = vector.shape_cast %6 : vector<128xf32> to vector<128x1xf32>
    %cst_6 = arith.constant 7.680000e+02 : f32
    %8 = vector.broadcast %cst_6 : f32 to vector<128x1xf32>
    %9 = arith.divf %7, %8 : vector<128x1xf32>
    %10 = vector.broadcast %9 : vector<128x1xf32> to vector<128x768xf32>
    %11 = arith.subf %5, %10 : vector<128x768xf32>
    %12 = arith.mulf %11, %11 : vector<128x768xf32>
    %cst_7 = arith.constant dense<0.000000e+00> : vector<128xf32>
    %13 = vector.multi_reduction <add>, %12, %cst_7 [1] : vector<128x768xf32> to vector<128xf32>
    %14 = vector.shape_cast %13 : vector<128xf32> to vector<128x1xf32>
    %cst_8 = arith.constant 7.680000e+02 : f32
    %15 = vector.broadcast %cst_8 : f32 to vector<128x1xf32>
    %16 = arith.divf %14, %15 : vector<128x1xf32>
    %17 = vector.broadcast %9 : vector<128x1xf32> to vector<128x768xf32>
    %18 = arith.subf %5, %17 : vector<128x768xf32>
    %cst_9 = arith.constant 9.99999996E-13 : f32
    %19 = vector.broadcast %cst_9 : f32 to vector<128x1xf32>
    %20 = arith.addf %16, %19 : vector<128x1xf32>
    %21 = math.rsqrt %20 : vector<128x1xf32>
    %22 = vector.broadcast %21 : vector<128x1xf32> to vector<128x768xf32>
    %23 = arith.mulf %18, %22 : vector<128x768xf32>
    %c0_10 = arith.constant 0 : index
    %c0_11 = arith.constant 0 : index
    %24 = vector.load %arg4[%c0_10, %c0_11] : memref<1x768xf32, #tpu.memory_space<vmem>>, vector<1x768xf32>
    %25 = vector.broadcast %24 : vector<1x768xf32> to vector<128x768xf32>
    %26 = arith.mulf %23, %25 : vector<128x768xf32>
    %c0_12 = arith.constant 0 : index
    %c0_13 = arith.constant 0 : index
    %27 = vector.load %arg5[%c0_12, %c0_13] : memref<1x768xf32, #tpu.memory_space<vmem>>, vector<1x768xf32>
    %28 = vector.broadcast %27 : vector<1x768xf32> to vector<128x768xf32>
    %29 = arith.addf %26, %28 : vector<128x768xf32>
    %30 = arith.truncf %29 : vector<128x768xf32> to vector<128x768xbf16>
    %c0_14 = arith.constant 0 : index
    %c0_15 = arith.constant 0 : index
    %31 = vector.load %arg6[%c0_14, %c0_15] : memref<768x128xbf16, #tpu.memory_space<vmem>>, vector<768x128xbf16>
    %cst_16 = arith.constant dense<0.000000e+00> : vector<128x128xf32>
    %32 = tpu.matmul %30, %31, %cst_16 {dimension_numbers = #tpu.dot_dimension_numbers<[1], [0], [0], [1], [0, 0, 1, 1], [], []>} : vector<128x768xbf16>, vector<768x128xbf16>, vector<128x128xf32> -> vector<128x128xf32>
    %c0_17 = arith.constant 0 : index
    %c0_18 = arith.constant 0 : index
    %33 = vector.load %arg7[%c0_17, %c0_18] : memref<1x128xf32, #tpu.memory_space<vmem>>, vector<1x128xf32>
    %34 = vector.broadcast %33 : vector<1x128xf32> to vector<128x128xf32>
    %35 = arith.addf %32, %34 : vector<128x128xf32>
    %c0_19 = arith.constant 0 : index
    %c0_20 = arith.constant 0 : index
    %36 = vector.load %arg8[%c0_19, %c0_20] : memref<128x128xf32, #tpu.memory_space<vmem>>, vector<128x128xf32>
    tpu.vector_store %arg8[%c0_19, %c0_20], %35 {strides = array<i32>} : memref<128x128xf32, #tpu.memory_space<vmem>>, vector<128x128xf32>,
    return
  }
  func.func @transform_0(%arg0: i32) -> (i32, i32) {
    %c0_i32 = arith.constant 0 : i32
    %c0_i32_0 = arith.constant 0 : i32
    return %arg0, %c0_i32 : i32, i32
  }
  func.func @transform_1(%arg0: i32) -> (i32, i32) {
    %c0_i32 = arith.constant 0 : i32
    %c0_i32_0 = arith.constant 0 : i32
    %c0_i32_1 = arith.constant 0 : i32
    return %c0_i32, %c0_i32_0 : i32, i32
  }
  func.func @transform_2(%arg0: i32) -> (i32, i32) {
    %c0_i32 = arith.constant 0 : i32
    %c0_i32_0 = arith.constant 0 : i32
    %c0_i32_1 = arith.constant 0 : i32
    return %c0_i32, %c0_i32_0 : i32, i32
  }
  func.func @transform_3(%arg0: i32) -> (i32, i32) {
    %c0_i32 = arith.constant 0 : i32
    %c0_i32_0 = arith.constant 0 : i32
    %c0_i32_1 = arith.constant 0 : i32
    return %c0_i32, %c0_i32_0 : i32, i32
  }
  func.func @transform_4(%arg0: i32) -> (i32, i32) {
    %c0_i32 = arith.constant 0 : i32
    %c0_i32_0 = arith.constant 0 : i32
    %c0_i32_1 = arith.constant 0 : i32
    return %c0_i32, %c0_i32_0 : i32, i32
  }
  func.func @transform_5(%arg0: i32) -> (i32, i32) {
    %c0_i32 = arith.constant 0 : i32
    %c0_i32_0 = arith.constant 0 : i32
    %c0_i32_1 = arith.constant 0 : i32
    return %c0_i32, %c0_i32_0 : i32, i32
  }
  func.func @transform_6(%arg0: i32) -> (i32, i32) {
    %c0_i32 = arith.constant 0 : i32
    %c0_i32_0 = arith.constant 0 : i32
    %c0_i32_1 = arith.constant 0 : i32
    return %c0_i32, %c0_i32_0 : i32, i32
  }
  func.func @transform_7(%arg0: i32) -> (i32, i32) {
    %c0_i32 = arith.constant 0 : i32
    %c0_i32_0 = arith.constant 0 : i32
    return %arg0, %c0_i32 : i32, i32
  }
}

module attributes {stable_mosaic.version = 11 : i64} {
  func.func @_train_loss_kernel(%arg0: i32, %arg1: memref<8x3xf32, #tpu.memory_space<vmem>>, %arg2: memref<8x16xf32, #tpu.memory_space<vmem>>, %arg3: memref<8x16xf32, #tpu.memory_space<vmem>>, %arg4: memref<8x16xf32, #tpu.memory_space<vmem>>, %arg5: memref<8x16xf32, #tpu.memory_space<vmem>>, %arg6: memref<8x16xf32, #tpu.memory_space<vmem>>, %arg7: memref<8x1xf32, #tpu.memory_space<vmem>>) attributes {dimension_semantics = [#tpu.dimension_semantics<parallel>], iteration_bounds = array<i64: 1>, scalar_prefetch = 0 : i64, scratch_operands = 0 : i64, tpu.core_type = #tpu.core_type<tc>, window_params = [{transform_indices = @transform_0, window_bounds = array<i64: 8, 3>}, {transform_indices = @transform_1, window_bounds = array<i64: 8, 16>}, {transform_indices = @transform_2, window_bounds = array<i64: 8, 16>}, {transform_indices = @transform_3, window_bounds = array<i64: 8, 16>}, {transform_indices = @transform_4, window_bounds = array<i64: 8, 16>}, {transform_indices = @transform_5, window_bounds = array<i64: 8, 16>}, {transform_indices = @transform_6, window_bounds = array<i64: 8, 1>}]} {
    %c0 = arith.constant 0 : index
    %c0_0 = arith.constant 0 : index
    %0 = vector.load %arg1[%c0, %c0_0] : memref<8x3xf32, #tpu.memory_space<vmem>>, vector<8x3xf32>
    %cst = arith.constant dense<0xFF800000> : vector<8xf32>
    %1 = vector.multi_reduction <maximumf>, %0, %cst [1] : vector<8x3xf32> to vector<8xf32>
    %2 = vector.shape_cast %1 : vector<8xf32> to vector<8x1xf32>
    %3 = vector.broadcast %2 : vector<8x1xf32> to vector<8x3xf32>
    %4 = arith.subf %0, %3 : vector<8x3xf32>
    %5 = math.exp %4 : vector<8x3xf32>
    %cst_1 = arith.constant dense<0.000000e+00> : vector<8xf32>
    %6 = vector.multi_reduction <add>, %5, %cst_1 [1] : vector<8x3xf32> to vector<8xf32>
    %7 = vector.shape_cast %6 : vector<8xf32> to vector<8x1xf32>
    %8 = math.log %7 : vector<8x1xf32>
    %9 = arith.addf %2, %8 : vector<8x1xf32>
    %10 = vector.extract_strided_slice %0 {offsets = [0, 0], sizes = [8, 1], strides = [1, 1]} : vector<8x3xf32> to vector<8x1xf32>
    %11 = arith.subf %10, %9 : vector<8x1xf32>
    %c0_2 = arith.constant 0 : index
    %c0_3 = arith.constant 0 : index
    %12 = vector.load %arg4[%c0_2, %c0_3] : memref<8x16xf32, #tpu.memory_space<vmem>>, vector<8x16xf32>
    %c0_4 = arith.constant 0 : index
    %c0_5 = arith.constant 0 : index
    %13 = vector.load %arg2[%c0_4, %c0_5] : memref<8x16xf32, #tpu.memory_space<vmem>>, vector<8x16xf32>
    %c0_6 = arith.constant 0 : index
    %c0_7 = arith.constant 0 : index
    %14 = vector.load %arg5[%c0_6, %c0_7] : memref<8x16xf32, #tpu.memory_space<vmem>>, vector<8x16xf32>
    %cst_8 = arith.constant 5.000000e-01 : f32
    %15 = vector.broadcast %cst_8 : f32 to vector<8x16xf32>
    %16 = arith.cmpf ogt, %12, %15 : vector<8x16xf32>
    %cst_9 = arith.constant -1.000000e+30 : f32
    %17 = vector.broadcast %cst_9 : f32 to vector<8x16xf32>
    %18 = arith.select %16, %13, %17 : vector<8x16xi1>, vector<8x16xf32>
    %cst_10 = arith.constant dense<0xFF800000> : vector<8xf32>
    %19 = vector.multi_reduction <maximumf>, %18, %cst_10 [1] : vector<8x16xf32> to vector<8xf32>
    %20 = vector.shape_cast %19 : vector<8xf32> to vector<8x1xf32>
    %21 = vector.broadcast %20 : vector<8x1xf32> to vector<8x16xf32>
    %22 = arith.subf %18, %21 : vector<8x16xf32>
    %23 = math.exp %22 : vector<8x16xf32>
    %cst_11 = arith.constant dense<0.000000e+00> : vector<8xf32>
    %24 = vector.multi_reduction <add>, %23, %cst_11 [1] : vector<8x16xf32> to vector<8xf32>
    %25 = vector.shape_cast %24 : vector<8xf32> to vector<8x1xf32>
    %26 = math.log %25 : vector<8x1xf32>
    %27 = arith.addf %20, %26 : vector<8x1xf32>
    %cst_12 = arith.constant 5.000000e-01 : f32
    %28 = vector.broadcast %cst_12 : f32 to vector<8x16xf32>
    %29 = arith.cmpf ogt, %14, %28 : vector<8x16xf32>
    %cst_13 = arith.constant -1.000000e+30 : f32
    %30 = vector.broadcast %cst_13 : f32 to vector<8x16xf32>
    %31 = arith.select %29, %18, %30 : vector<8x16xi1>, vector<8x16xf32>
    %cst_14 = arith.constant dense<0xFF800000> : vector<8xf32>
    %32 = vector.multi_reduction <maximumf>, %31, %cst_14 [1] : vector<8x16xf32> to vector<8xf32>
    %33 = vector.shape_cast %32 : vector<8xf32> to vector<8x1xf32>
    %34 = vector.broadcast %33 : vector<8x1xf32> to vector<8x16xf32>
    %35 = arith.subf %31, %34 : vector<8x16xf32>
    %36 = math.exp %35 : vector<8x16xf32>
    %cst_15 = arith.constant dense<0.000000e+00> : vector<8xf32>
    %37 = vector.multi_reduction <add>, %36, %cst_15 [1] : vector<8x16xf32> to vector<8xf32>
    %38 = vector.shape_cast %37 : vector<8xf32> to vector<8x1xf32>
    %39 = math.log %38 : vector<8x1xf32>
    %40 = arith.addf %33, %39 : vector<8x1xf32>
    %41 = arith.subf %40, %27 : vector<8x1xf32>
    %c0_16 = arith.constant 0 : index
    %c0_17 = arith.constant 0 : index
    %42 = vector.load %arg3[%c0_16, %c0_17] : memref<8x16xf32, #tpu.memory_space<vmem>>, vector<8x16xf32>
    %c0_18 = arith.constant 0 : index
    %c0_19 = arith.constant 0 : index
    %43 = vector.load %arg6[%c0_18, %c0_19] : memref<8x16xf32, #tpu.memory_space<vmem>>, vector<8x16xf32>
    %cst_20 = arith.constant 5.000000e-01 : f32
    %44 = vector.broadcast %cst_20 : f32 to vector<8x16xf32>
    %45 = arith.cmpf ogt, %12, %44 : vector<8x16xf32>
    %cst_21 = arith.constant -1.000000e+30 : f32
    %46 = vector.broadcast %cst_21 : f32 to vector<8x16xf32>
    %47 = arith.select %45, %42, %46 : vector<8x16xi1>, vector<8x16xf32>
    %cst_22 = arith.constant dense<0xFF800000> : vector<8xf32>
    %48 = vector.multi_reduction <maximumf>, %47, %cst_22 [1] : vector<8x16xf32> to vector<8xf32>
    %49 = vector.shape_cast %48 : vector<8xf32> to vector<8x1xf32>
    %50 = vector.broadcast %49 : vector<8x1xf32> to vector<8x16xf32>
    %51 = arith.subf %47, %50 : vector<8x16xf32>
    %52 = math.exp %51 : vector<8x16xf32>
    %cst_23 = arith.constant dense<0.000000e+00> : vector<8xf32>
    %53 = vector.multi_reduction <add>, %52, %cst_23 [1] : vector<8x16xf32> to vector<8xf32>
    %54 = vector.shape_cast %53 : vector<8xf32> to vector<8x1xf32>
    %55 = math.log %54 : vector<8x1xf32>
    %56 = arith.addf %49, %55 : vector<8x1xf32>
    %cst_24 = arith.constant 5.000000e-01 : f32
    %57 = vector.broadcast %cst_24 : f32 to vector<8x16xf32>
    %58 = arith.cmpf ogt, %43, %57 : vector<8x16xf32>
    %cst_25 = arith.constant -1.000000e+30 : f32
    %59 = vector.broadcast %cst_25 : f32 to vector<8x16xf32>
    %60 = arith.select %58, %47, %59 : vector<8x16xi1>, vector<8x16xf32>
    %cst_26 = arith.constant dense<0xFF800000> : vector<8xf32>
    %61 = vector.multi_reduction <maximumf>, %60, %cst_26 [1] : vector<8x16xf32> to vector<8xf32>
    %62 = vector.shape_cast %61 : vector<8xf32> to vector<8x1xf32>
    %63 = vector.broadcast %62 : vector<8x1xf32> to vector<8x16xf32>
    %64 = arith.subf %60, %63 : vector<8x16xf32>
    %65 = math.exp %64 : vector<8x16xf32>
    %cst_27 = arith.constant dense<0.000000e+00> : vector<8xf32>
    %66 = vector.multi_reduction <add>, %65, %cst_27 [1] : vector<8x16xf32> to vector<8xf32>
    %67 = vector.shape_cast %66 : vector<8xf32> to vector<8x1xf32>
    %68 = math.log %67 : vector<8x1xf32>
    %69 = arith.addf %62, %68 : vector<8x1xf32>
    %70 = arith.subf %69, %56 : vector<8x1xf32>
    %cst_28 = arith.constant -20.7232666 : f32
    %71 = vector.broadcast %cst_28 : f32 to vector<8x1xf32>
    %72 = arith.maximumf %11, %71 : vector<8x1xf32>
    %cst_29 = arith.constant -20.7232666 : f32
    %73 = vector.broadcast %cst_29 : f32 to vector<8x1xf32>
    %74 = arith.subf %11, %73 : vector<8x1xf32>
    %75 = math.absf %74 : vector<8x1xf32>
    %cst_30 = arith.constant 0.000000e+00 : f32
    %76 = vector.broadcast %cst_30 : f32 to vector<8x1xf32>
    %77 = arith.subf %76, %75 : vector<8x1xf32>
    %78 = math.exp %77 : vector<8x1xf32>
    %cst_31 = arith.constant 1.000000e+00 : f32
    %79 = vector.broadcast %cst_31 : f32 to vector<8x1xf32>
    %80 = arith.addf %79, %78 : vector<8x1xf32>
    %81 = math.log %80 : vector<8x1xf32>
    %82 = arith.addf %72, %81 : vector<8x1xf32>
    %cst_32 = arith.constant -20.7232666 : f32
    %83 = vector.broadcast %cst_32 : f32 to vector<8x1xf32>
    %84 = arith.maximumf %41, %83 : vector<8x1xf32>
    %cst_33 = arith.constant -20.7232666 : f32
    %85 = vector.broadcast %cst_33 : f32 to vector<8x1xf32>
    %86 = arith.subf %41, %85 : vector<8x1xf32>
    %87 = math.absf %86 : vector<8x1xf32>
    %cst_34 = arith.constant 0.000000e+00 : f32
    %88 = vector.broadcast %cst_34 : f32 to vector<8x1xf32>
    %89 = arith.subf %88, %87 : vector<8x1xf32>
    %90 = math.exp %89 : vector<8x1xf32>
    %cst_35 = arith.constant 1.000000e+00 : f32
    %91 = vector.broadcast %cst_35 : f32 to vector<8x1xf32>
    %92 = arith.addf %91, %90 : vector<8x1xf32>
    %93 = math.log %92 : vector<8x1xf32>
    %94 = arith.addf %84, %93 : vector<8x1xf32>
    %95 = arith.addf %82, %94 : vector<8x1xf32>
    %cst_36 = arith.constant -20.7232666 : f32
    %96 = vector.broadcast %cst_36 : f32 to vector<8x1xf32>
    %97 = arith.maximumf %70, %96 : vector<8x1xf32>
    %cst_37 = arith.constant -20.7232666 : f32
    %98 = vector.broadcast %cst_37 : f32 to vector<8x1xf32>
    %99 = arith.subf %70, %98 : vector<8x1xf32>
    %100 = math.absf %99 : vector<8x1xf32>
    %cst_38 = arith.constant 0.000000e+00 : f32
    %101 = vector.broadcast %cst_38 : f32 to vector<8x1xf32>
    %102 = arith.subf %101, %100 : vector<8x1xf32>
    %103 = math.exp %102 : vector<8x1xf32>
    %cst_39 = arith.constant 1.000000e+00 : f32
    %104 = vector.broadcast %cst_39 : f32 to vector<8x1xf32>
    %105 = arith.addf %104, %103 : vector<8x1xf32>
    %106 = math.log %105 : vector<8x1xf32>
    %107 = arith.addf %97, %106 : vector<8x1xf32>
    %108 = arith.addf %95, %107 : vector<8x1xf32>
    %cst_40 = arith.constant 0.000000e+00 : f32
    %109 = vector.broadcast %cst_40 : f32 to vector<8x1xf32>
    %110 = arith.subf %109, %108 : vector<8x1xf32>
    %c0_41 = arith.constant 0 : index
    %c0_42 = arith.constant 0 : index
    %111 = vector.load %arg7[%c0_41, %c0_42] : memref<8x1xf32, #tpu.memory_space<vmem>>, vector<8x1xf32>
    tpu.vector_store %arg7[%c0_41, %c0_42], %110 {strides = array<i32>} : memref<8x1xf32, #tpu.memory_space<vmem>>, vector<8x1xf32>,
    return
  }
  func.func @transform_0(%arg0: i32) -> (i32, i32) {
    %c0_i32 = arith.constant 0 : i32
    %c0_i32_0 = arith.constant 0 : i32
    return %arg0, %c0_i32 : i32, i32
  }
  func.func @transform_1(%arg0: i32) -> (i32, i32) {
    %c0_i32 = arith.constant 0 : i32
    %c0_i32_0 = arith.constant 0 : i32
    return %arg0, %c0_i32 : i32, i32
  }
  func.func @transform_2(%arg0: i32) -> (i32, i32) {
    %c0_i32 = arith.constant 0 : i32
    %c0_i32_0 = arith.constant 0 : i32
    return %arg0, %c0_i32 : i32, i32
  }
  func.func @transform_3(%arg0: i32) -> (i32, i32) {
    %c0_i32 = arith.constant 0 : i32
    %c0_i32_0 = arith.constant 0 : i32
    return %arg0, %c0_i32 : i32, i32
  }
  func.func @transform_4(%arg0: i32) -> (i32, i32) {
    %c0_i32 = arith.constant 0 : i32
    %c0_i32_0 = arith.constant 0 : i32
    return %arg0, %c0_i32 : i32, i32
  }
  func.func @transform_5(%arg0: i32) -> (i32, i32) {
    %c0_i32 = arith.constant 0 : i32
    %c0_i32_0 = arith.constant 0 : i32
    return %arg0, %c0_i32 : i32, i32
  }
  func.func @transform_6(%arg0: i32) -> (i32, i32) {
    %c0_i32 = arith.constant 0 : i32
    %c0_i32_0 = arith.constant 0 : i32
    return %arg0, %c0_i32 : i32, i32
  }
}

</mosaic_0001>

<bundles_post_ra>
// kernel: squeeze.0
= control target key start
LH: loop header
LB: loop body
LE: loop exit
PB: predicated region body
PF: predicated region fallthrough
CT: control target
= control target key end

     0   :  { %s364_s0 = inlined_call_operand.vmem [shape: bf16[2,3,1,768], index: 0, kind: input, shape index: {}]   ;;  %s365_s1 = inlined_call_operand.vmem [shape: bf16[6,768], index: 1, kind: output, shape index: {}]  }
   0x1   :  { %v303_v0 = vld [vmem:[%s364_s0 + $0x10] sm:$0xff]   ;;  %v307_v1 = vld [vmem:[%s364_s0 + $0x8] sm:$0xff]   ;;  %v311_v2 = vld [vmem:[%s364_s0] sm:$0xff]  }
   0x2   :  { %v18_v3 = vunpack.c.h.bf16 %v303_v0  ;;  %v50_v4 = vunpack.c.l.bf16 %v303_v0  ;;  %v82_v5 = vunpack.c.h.bf16 %v307_v1  ;;  %v114_v6 = vunpack.c.l.bf16 %v307_v1 }
   0x3   :  { %v146_v7 = vunpack.c.h.bf16 %v311_v2  ;;  %v177_v8 = vunpack.c.l.bf16 %v311_v2 }
   0x4   :  { %21 = vst [vmem:[#allocation1 + $0x58] ss:$-48 sps:$4 sm:$0xff] %v18_v3   ;;  %53 = vst [vmem:[#allocation1 - $0x4] sm:$0xf0] %v50_v4 }
   0x5   :  { %69 = vst [vmem:[#allocation1 + $0x40] sm:$0xf] %v50_v4  ;;  %85 = vst [vmem:[#allocation1 + $0x38] ss:$-48 sps:$4 sm:$0xff] %v82_v5  }
   0x6   :  { %117 = vst [vmem:[#allocation1 + $0x20] ss:$48 sps:$4 sm:$0xff] %v114_v6   ;;  %149 = vst [vmem:[#allocation1 + $0x2c] sm:$0xf0] %v146_v7 }
   0x7   :  { %165 = vst [vmem:[#allocation1 + $0x10] sm:$0xf] %v146_v7  ;;  %180 = vst [vmem:[#allocation1 + $0x18] ss:$48 sps:$4 sm:$0xff] %v177_v8  }
   0xb   :  { %v229_v10 = vld [vmem:[#allocation1] sm:$0x7]   ;;  %v233_v11 = vld [vmem:[#allocation1 + $0x58] sm:$0x7]   ;;  %v237_v20 = vld [vmem:[#allocation1 + $0x28] sm:$0x7]  }
   0xc   :  { %v225_v9 = vld [vmem:[#allocation1 + $0x40] sm:$0x7]   ;;  %v217_v14 = vld [vmem:[#allocation1 + $0x38] sm:$0x7]   ;;  %231 = vst [vmem:[#allocation0 + $0x1b] sm:$0x7] %v229_v10  }
   0xd   :  { %v209_v12 = vld [vmem:[#allocation1 + $0x20] sm:$0x7]   ;;  %v213_v13 = vld [vmem:[#allocation1 + $0x50] sm:$0x7]   ;;  %227 = vst [vmem:[#allocation0 + $0x13] sm:$0x7] %v225_v9  }
   0xe   :  { %235 = vst [vmem:[#allocation0 + $0x23] sm:$0x7] %v233_v11   ;;  %v194_v15 = vld [vmem:[#allocation1 + $0x18] sm:$0x7]   ;;  %v197_v16 = vld [vmem:[#allocation1 + $0x48] sm:$0x7]  }
   0xf   :  { %v201_v17 = vld [vmem:[#allocation1 + $0x10] sm:$0x7]   ;;  %211 = vst [vmem:[#allocation0 + $0x20] sm:$0x7] %v209_v12   ;;  %215 = vst [vmem:[#allocation0 + $0x28] sm:$0x7] %v213_v13  }
  0x10   :  { %219 = vst [vmem:[#allocation0 + $0x3] sm:$0x7] %v217_v14   ;;  %195 = vst [vmem:[#allocation0] sm:$0x7] %v194_v15   ;;  %v205_v18 = vld [vmem:[#allocation1 + $0x30] sm:$0x7]  }
  0x11   :  { %199 = vst [vmem:[#allocation0 + $0x8] sm:$0x7] %v197_v16   ;;  %203 = vst [vmem:[#allocation0 + $0x10] sm:$0x7] %v201_v17   ;;  %v221_v19 = vld [vmem:[#allocation1 + $0x8] sm:$0x7]  }
  0x12   :  { %207 = vst [vmem:[#allocation0 + $0x18] sm:$0x7] %v205_v18   ;;  %223 = vst [vmem:[#allocation0 + $0xb] sm:$0x7] %v221_v19  }
  0x13   :  { %239 = vst [vmem:[#allocation0 + $0x2b] sm:$0x7] %v237_v20  }
  0x16   :  { %v274_v21 = vld [vmem:[#allocation0 + $0x20] sm:$0xff] }
  0x17   :  { %v245_v22 = vld [vmem:[#allocation0] sm:$0xff] }
  0x18   :  { %v258_v23 = vld [vmem:[#allocation0 + $0x10] sm:$0xff] }
  0x19   :  { %v251_v24 = vld [vmem:[#allocation0 + $0x8] sm:$0xff]  ;;  %v266_v25 = vld [vmem:[#allocation0 + $0x18] sm:$0xff] }
  0x1a   :  { %v282_v26 = vld [vmem:[#allocation0 + $0x28] sm:$0xff]  ;;  %v322_v27 = vpack.c.bf16 %v251_v24, %v245_v22  ;;  %v327_v28 = vpack.c.bf16 %v266_v25, %v258_v23 }
  0x1b   :  { %v332_v29 = vpack.c.bf16 %v282_v26, %v274_v21 }
  0x1c   :  { %323 = vst [vmem:[%s365_s1] sm:$0xff] %v322_v27   ;;  %334 = vst [vmem:[%s365_s1 + $0x8] sm:$0xff] %v327_v28  }
  0x1d   :  { %335 = vst [vmem:[%s365_s1 + $0x10] sm:$0xff] %v332_v29  }

// kernel: squeeze.8
= control target key start
LH: loop header
LB: loop body
LE: loop exit
PB: predicated region body
PF: predicated region fallthrough
CT: control target
= control target key end

     0   :  { %vm8_vm0 = vcmask 130048   ;;  %s42_s0 = inlined_call_operand.vmem [shape: f32[32], index: 0, kind: input, shape index: {}]   ;;  %s43_s1 = inlined_call_operand.vmem [shape: f32[2,16], index: 1, kind: output, shape index: {}]  }
   0x1   :  { %v5_v0 = vld [vmem:[%s42_s0] sm:$0x1]  ;;  %s25_s0 = smov 112  }
   0x2   :  { %6 = vst [vmem:[#allocation1] sm:$0x1] %v5_v0 }
   0x9   :  { %v10_v1 = vld [vmem:[#allocation1] sm:$0x1]  }
   0xa   :  { %v7_v2 = vld [vmem:[#allocation1] sm:$0x1]   ;;  %11 = vrot.lane.b32.xlu0 %v10_v1, %s25_s0 }
   0xb   :  { %9 = vst.msk [vmem:[#allocation0] sm:$0x1] %vm8_vm0, %v7_v2  }
  0x7c   :  { %v12_v3 = vpop.permute.xlu0 %11  }
  0x7d   :  { %15 = vst.msk [vmem:[#allocation0 + $0x1] sm:$0x1] %vm8_vm0, %v12_v3  }
  0x84   :  { %v20_v4 = vld [vmem:[#allocation0] sm:$0x3] }
  0x85   :  { %23 = vst [vmem:[%s43_s1] sm:$0x3] %v20_v4 }

// kernel: squeeze.10
= control target key start
LH: loop header
LB: loop body
LE: loop exit
PB: predicated region body
PF: predicated region fallthrough
CT: control target
= control target key end

     0   :  { %vm8_vm0 = vcmask 23552   ;;  %s42_s0 = inlined_call_operand.vmem [shape: f32[6], index: 0, kind: input, shape index: {}]   ;;  %s43_s1 = inlined_call_operand.vmem [shape: f32[2,3], index: 1, kind: output, shape index: {}]  }
   0x1   :  { %v5_v0 = vld [vmem:[%s42_s0] sm:$0x1]  ;;  %s25_s0 = smov 125  }
   0x2   :  { %6 = vst [vmem:[#allocation1] sm:$0x1] %v5_v0 }
   0x9   :  { %v10_v1 = vld [vmem:[#allocation1] sm:$0x1]  }
   0xa   :  { %v7_v2 = vld [vmem:[#allocation1] sm:$0x1]   ;;  %11 = vrot.lane.b32.xlu0 %v10_v1, %s25_s0 }
   0xb   :  { %9 = vst.msk [vmem:[#allocation0] sm:$0x1] %vm8_vm0, %v7_v2  }
  0x7c   :  { %v12_v3 = vpop.permute.xlu0 %11  }
  0x7d   :  { %15 = vst.msk [vmem:[#allocation0 + $0x1] sm:$0x1] %vm8_vm0, %v12_v3  }
  0x84   :  { %v20_v4 = vld [vmem:[#allocation0] sm:$0x3] }
  0x85   :  { %23 = vst [vmem:[%s43_s1] sm:$0x3] %v20_v4 }

// kernel: multi_task_reader_forward.3
= control target key start
LH: loop header
LB: loop body
LE: loop exit
PB: predicated region body
PF: predicated region fallthrough
CT: control target
= control target key end

     0   :  { %vm24_vm0 = vcmask 23552   ;;  %vm43_vm1 = vcmask 130048   ;;  %vm134_vm5 = vcmask 7168   ;;  %s246_s0 = inlined_call_operand.vmem [shape: f32[8,3], index: 0, kind: input, shape index: {}]   ;;  %s247_s1 = inlined_call_operand.vmem [shape: f32[8,16], index: 1, kind: input, shape index: {}]   ;;  %s248_s3 = inlined_call_operand.vmem [shape: f32[8,16], index: 3, kind: input, shape index: {}]   ;;  %s249_s4 = inlined_call_operand.vmem [shape: f32[8,16], index: 4, kind: input, shape index: {}]   ;;  %s250_s2 = inlined_call_operand.vmem [shape: f32[8,16], index: 2, kind: input, shape index: {}]   ;;  %s251_s5 = inlined_call_operand.vmem [shape: f32[8,16], index: 5, kind: input, shape index: {}]   ;;  %s252_s6 = inlined_call_operand.vmem [shape: f32[8,1], index: 6, kind: output, shape index: {}]  }
   0x1   :  { %v213_v0 = vld [vmem:[%s246_s0] sm:$0xff] }
   0x2   :  { %v38_v1 = vld [vmem:[%s248_s3] sm:$0xff]  ;;  %v25_v3 = vsel %vm24_vm0, %v213_v0, -inf }
   0x3   :  { %v39_v2 = vld [vmem:[%s247_s1] sm:$0xff]  ;;  %vm41_vm2 = vcmp.gt.f32.partialorder %v38_v1, 0.5  ;;  %26 = vmax.xlane.f32.xlu0 %v25_v3 }
   0x4   :  { %v40_v4 = vld [vmem:[%s249_s4] sm:$0xff]  ;;  %v42_v7 = vsel %vm41_vm2, %v39_v2, -1e+30 }
   0x5   :  { %v71_v5 = vld [vmem:[%s250_s2] sm:$0xff]  ;;  %vm56_vm3 = vcmp.gt.f32.partialorder %v40_v4, 0.5  ;;  %v44_v10 = vsel %vm43_vm1, %v42_v7, -inf }
   0x6   :  { %v72_v6 = vld [vmem:[%s251_s5] sm:$0xff]  ;;  %v73_v8 = vsel %vm41_vm2, %v71_v5, -1e+30  ;;  %v57_v9 = vsel %vm56_vm3, %v42_v7, -1e+30 }
   0x7   :  { %vm86_vm4 = vcmp.gt.f32.partialorder %v72_v6, 0.5  ;;  %v58_v11 = vsel %vm43_vm1, %v57_v9, -inf  ;;  %45 = vmax.xlane.f32.xlu0 %v44_v10  ;;  %v74_v13 = vsel %vm43_vm1, %v73_v8, -inf }
   0x8   :  { %v87_v12 = vsel %vm86_vm4, %v73_v8, -1e+30  ;;  %59 = vmax.xlane.f32.xlu1 %v58_v11 }
   0x9   :  { %v88_v14 = vsel %vm43_vm1, %v87_v12, -inf }
   0xb   :  { %89 = vmax.xlane.f32.xlu0 %v88_v14 }
   0xc   :  { %75 = vmax.xlane.f32.xlu1 %v74_v13 }
  0x8c   :  { %v27_v15 = vpop.xlane.xlu0 %26 }
  0x8d   :  { %v28_v16 = vsub.f32 %v213_v0, %v27_v15 }
  0x8f   :  { %v29_v17 = vmul.f32 1.442695, %v28_v16 }
  0x90   :  { %v46_v20 = vpop.xlane.xlu0 %45 }
  0x91   :  { %v60_v18 = vpop.xlane.xlu1 %59  ;;  %143 = vpow2.f32 %v29_v17  ;;  %v47_v21 = vsub.f32 %v42_v7, %v46_v20 }
  0x92   :  { %v61_v19 = vsub.f32 %v57_v9, %v60_v18 }
  0x93   :  { %v48_v23 = vmul.f32 1.442695, %v47_v21 }
  0x94   :  { %v62_v22 = vmul.f32 1.442695, %v61_v19  ;;  %v90_v26 = vpop.xlane.xlu0 %89 }
  0x95   :  { %v76_v24 = vpop.xlane.xlu1 %75  ;;  %v91_v27 = vsub.f32 %v87_v12, %v90_v26 }
  0x96   :  { %145 = vpow2.f32 %v62_v22  ;;  %v77_v25 = vsub.f32 %v73_v8, %v76_v24 }
  0x97   :  { %147 = vpow2.f32 %v48_v23  ;;  %v92_v29 = vmul.f32 1.442695, %v91_v27 }
  0x98   :  { %v78_v28 = vmul.f32 1.442695, %v77_v25 }
  0x9a   :  { %149 = vpow2.f32 %v78_v28 }
  0x9b   :  { %151 = vpow2.f32 %v92_v29 }
  0x9e   :  { %v144_v30 = vpop.eup %143 }
  0x9f   :  { %v31_v31 = vsel %vm24_vm0, %v144_v30, 0.0 }
  0xa0   :  { %32 = vadd.xlane.f32.xlu1 %v31_v31 }
  0xa3   :  { %v146_v32 = vpop.eup %145 }
  0xa4   :  { %v148_v33 = vpop.eup %147  ;;  %v64_v34 = vsel %vm43_vm1, %v146_v32, 0.0 }
  0xa5   :  { %v50_v35 = vsel %vm43_vm1, %v148_v33, 0.0  ;;  %65 = vadd.xlane.f32.xlu1 %v64_v34 }
  0xa6   :  { %51 = vadd.xlane.f32.xlu0 %v50_v35 }
  0xa7   :  { %v150_v36 = vpop.eup %149 }
  0xa8   :  { %v152_v37 = vpop.eup %151  ;;  %v80_v38 = vsel %vm43_vm1, %v150_v36, 0.0 }
  0xa9   :  { %v94_v39 = vsel %vm43_vm1, %v152_v37, 0.0 }
  0xaa   :  { %81 = vadd.xlane.f32.xlu0 %v80_v38  ;;  %95 = vadd.xlane.f32.xlu1 %v94_v39 }
 0x129   :  { %v33_v40 = vpop.xlane.xlu1 %32 }
 0x12a   :  { %153 = vlog2.f32 %v33_v40 }
 0x12e   :  { %v66_v41 = vpop.xlane.xlu1 %65 }
 0x12f   :  { %v52_v42 = vpop.xlane.xlu0 %51  ;;  %155 = vlog2.f32 %v66_v41 }
 0x130   :  { %157 = vlog2.f32 %v52_v42 }
 0x133   :  { %v96_v43 = vpop.xlane.xlu1 %95  ;;  %v82_v44 = vpop.xlane.xlu0 %81 }
 0x134   :  { %159 = vlog2.f32 %v96_v43 }
 0x135   :  { %161 = vlog2.f32 %v82_v44 }
 0x137   :  { %v154_v45 = vpop.eup %153 }
 0x138   :  { %v35_v46 = vmul.f32 0.6931472, %v154_v45 }
 0x13a   :  { %v36_v47 = vadd.f32 %v35_v46, %v27_v15 }
 0x13c   :  { %v156_v48 = vpop.eup %155  ;;  %v37_v50 = vsub.f32 %v213_v0, %v36_v47 }
 0x13d   :  { %v158_v49 = vpop.eup %157  ;;  %v68_v51 = vmul.f32 0.6931472, %v156_v48 }
 0x13e   :  { %v54_v52 = vmul.f32 0.6931472, %v158_v49  ;;  %v140_v53 = vadd.f32 20.723267, %v37_v50  ;;  %v101_v22 = vmax.f32 %v37_v50, -20.723267 }
 0x13f   :  { %v69_v54 = vadd.f32 %v68_v51, %v60_v18 }
 0x140   :  { %v55_v56 = vadd.f32 %v54_v52, %v46_v20  ;;  %v103_v58 = vand.u32 2147483647, %v140_v53 }
 0x141   :  { %v160_v55 = vpop.eup %159 }
 0x142   :  { %v162_v57 = vpop.eup %161  ;;  %v98_v59 = vmul.f32 0.6931472, %v160_v55  ;;  %v70_v60 = vsub.f32 %v69_v54, %v55_v56  ;;  %v104_v62 = vsub.f32 0.0, %v103_v58 }
 0x143   :  { %v84_v61 = vmul.f32 0.6931472, %v162_v57 }
 0x144   :  { %v99_v63 = vadd.f32 %v98_v59, %v90_v26  ;;  %v141_v1 = vadd.f32 20.723267, %v70_v60  ;;  %v105_v3 = vmul.f32 1.442695, %v104_v62  ;;  %v111_v20 = vmax.f32 %v70_v60, -20.723267 }
 0x145   :  { %v85_v2 = vadd.f32 %v84_v61, %v76_v24 }
 0x146   :  { %v113_v4 = vand.u32 2147483647, %v141_v1  ;;  %163 = vpow2.f32 %v105_v3 }
 0x147   :  { %v100_v5 = vsub.f32 %v99_v63, %v85_v2 }
 0x148   :  { %v114_v0 = vsub.f32 0.0, %v113_v4 }
 0x149   :  { %v142_v6 = vadd.f32 20.723267, %v100_v5  ;;  %v122_v26 = vmax.f32 %v100_v5, -20.723267 }
 0x14a   :  { %v115_v7 = vmul.f32 1.442695, %v114_v0 }
 0x14b   :  { %v124_v8 = vand.u32 2147483647, %v142_v6 }
 0x14c   :  { %165 = vpow2.f32 %v115_v7 }
 0x14d   :  { %v125_v9 = vsub.f32 0.0, %v124_v8 }
 0x14f   :  { %v126_v10 = vmul.f32 1.442695, %v125_v9 }
 0x151   :  { %167 = vpow2.f32 %v126_v10 }
 0x153   :  { %v164_v11 = vpop.eup %163 }
 0x154   :  { %v107_v12 = vadd.f32 1.0, %v164_v11 }
 0x156   :  { %169 = vlog2.f32 %v107_v12 }
 0x159   :  { %v166_v13 = vpop.eup %165 }
 0x15a   :  { %v117_v14 = vadd.f32 1.0, %v166_v13 }
 0x15c   :  { %171 = vlog2.f32 %v117_v14 }
 0x15e   :  { %v168_v15 = vpop.eup %167 }
 0x15f   :  { %v128_v16 = vadd.f32 1.0, %v168_v15 }
 0x161   :  { %173 = vlog2.f32 %v128_v16 }
 0x163   :  { %v170_v17 = vpop.eup %169 }
 0x164   :  { %v109_v19 = vmul.f32 0.6931472, %v170_v17 }
 0x166   :  { %v110_v25 = vadd.f32 %v109_v19, %v101_v22 }
 0x169   :  { %v172_v18 = vpop.eup %171 }
 0x16a   :  { %v119_v21 = vmul.f32 0.6931472, %v172_v18 }
 0x16c   :  { %v120_v23 = vadd.f32 %v119_v21, %v111_v20 }
 0x16e   :  { %v174_v24 = vpop.eup %173  ;;  %v121_v28 = vadd.f32 %v120_v23, %v110_v25 }
 0x16f   :  { %v130_v27 = vmul.f32 0.6931472, %v174_v24 }
 0x171   :  { %v131_v29 = vadd.f32 %v130_v27, %v122_v26 }
 0x173   :  { %v132_v30 = vadd.f32 %v131_v29, %v121_v28 }
 0x175   :  { %v133_v31 = vsub.f32 0.0, %v132_v30 }
 0x177   :  { %135 = vst.msk [vmem:[%s252_s6] sm:$0xff] %vm134_vm5, %v133_v31 }

// kernel: multi_task_reader_forward.2
= control target key start
LH: loop header
LB: loop body
LE: loop exit
PB: predicated region body
PF: predicated region fallthrough
CT: control target
= control target key end

     0   :  { %s9605_s1 = inlined_call_operand.vmem [shape: bf16[768,768], index: 1, kind: input, shape index: {}]   ;;  %s9606_s0 = inlined_call_operand.vmem [shape: bf16[128,768], index: 0, kind: input, shape index: {}]   ;;  %s9607_s2 = inlined_call_operand.vmem [shape: f32[1,768], index: 2, kind: input, shape index: {}]   ;;  %s9608_s5 = inlined_call_operand.vmem [shape: bf16[768,128], index: 5, kind: input, shape index: {}]   ;;  %s9609_s3 = inlined_call_operand.vmem [shape: f32[1,768], index: 3, kind: input, shape index: {}]   ;;  %s9610_s4 = inlined_call_operand.vmem [shape: f32[1,768], index: 4, kind: input, shape index: {}]   ;;  %s9611_s6 = inlined_call_operand.vmem [shape: f32[1,128], index: 6, kind: input, shape index: {}]   ;;  %s9612_s7 = inlined_call_operand.vmem [shape: f32[128,128], index: 7, kind: output, shape index: {}]  }
   0x1   :  { %v5252_v0 = vld [vmem:[%s9605_s1 + $0x154] ss:$24 sps:$4 sm:$0xff]   ;;  %v5254_v1 = vld [vmem:[%s9605_s1 + $0x150] ss:$24 sps:$4 sm:$0xff]   ;;  %v5258_v4 = vld [vmem:[%s9605_s1 + $0x124] ss:$24 sps:$4 sm:$0xff]  }
   0x2   :  { %2075 = vmatprep.subr.bf16.mxu0 %v5252_v0  ;;  %v5255_v2 = vld [vmem:[%s9605_s1 + $0x454] ss:$24 sps:$4 sm:$0xff]   ;;  %v5257_v3 = vld [vmem:[%s9605_s1 + $0x450] ss:$24 sps:$4 sm:$0xff]   ;;  %v5260_v5 = vld [vmem:[%s9605_s1 + $0x120] ss:$24 sps:$4 sm:$0xff]  }
   0x3   :  { %2076 = vmatpush1.bf16.msra.mxu0 %v5254_v1  ;;  %2188 = vmatprep.subr.bf16.mxu1 %v5255_v2  ;;  %v5261_v6 = vld [vmem:[%s9605_s1 + $0x424] ss:$24 sps:$4 sm:$0xff]   ;;  %v5263_v7 = vld [vmem:[%s9605_s1 + $0x420] ss:$24 sps:$4 sm:$0xff]   ;;  %v5264_v8 = vld [vmem:[%s9605_s1 + $0xf4] ss:$24 sps:$4 sm:$0xff]  }
   0x4   :  { %2189 = vmatpush1.bf16.msra.mxu1 %v5257_v3  ;;  %2077 = vmatprep.subr.bf16.mxu0 %v5258_v4  ;;  %v5266_v9 = vld [vmem:[%s9605_s1 + $0xf0] ss:$24 sps:$4 sm:$0xff]   ;;  %v5267_v10 = vld [vmem:[%s9605_s1 + $0x3f4] ss:$24 sps:$4 sm:$0xff]   ;;  %v5270_v11 = vld [vmem:[%s9605_s1 + $0xc4] ss:$24 sps:$4 sm:$0xff]  }
   0x5   :  { %2190 = vmatprep.subr.bf16.mxu1 %v5261_v6  ;;  %v5269_v12 = vld [vmem:[%s9605_s1 + $0x3f0] ss:$24 sps:$4 sm:$0xff]   ;;  %v5273_v13 = vld [vmem:[%s9605_s1 + $0x3c4] ss:$24 sps:$4 sm:$0xff]   ;;  %v5272_v14 = vld [vmem:[%s9605_s1 + $0xc0] ss:$24 sps:$4 sm:$0xff]  }
   0x6   :  { %v5276_v15 = vld [vmem:[%s9605_s1 + $0x94] ss:$24 sps:$4 sm:$0xff]   ;;  %v5275_v16 = vld [vmem:[%s9605_s1 + $0x3c0] ss:$24 sps:$4 sm:$0xff]   ;;  %v5278_v18 = vld [vmem:[%s9605_s1 + $0x90] ss:$24 sps:$4 sm:$0xff]  }
   0x7   :  { %2078 = vmatpush1.bf16.msra.mxu0 %v5260_v5  ;;  %v5279_v17 = vld [vmem:[%s9605_s1 + $0x394] ss:$24 sps:$4 sm:$0xff]   ;;  %v5282_v19 = vld [vmem:[%s9605_s1 + $0x64] ss:$24 sps:$4 sm:$0xff]   ;;  %v5281_v20 = vld [vmem:[%s9605_s1 + $0x390] ss:$24 sps:$4 sm:$0xff]  }
   0x8   :  { %2079 = vmatprep.subr.bf16.mxu0 %v5264_v8  ;;  %2191 = vmatpush1.bf16.msra.mxu1 %v5263_v7  ;;  %v5285_v21 = vld [vmem:[%s9605_s1 + $0x364] ss:$24 sps:$4 sm:$0xff]   ;;  %v5284_v22 = vld [vmem:[%s9605_s1 + $0x60] ss:$24 sps:$4 sm:$0xff]   ;;  %v5288_v23 = vld [vmem:[%s9605_s1 + $0x34] ss:$24 sps:$4 sm:$0xff]  }
   0x9   :  { %2192 = vmatprep.subr.bf16.mxu1 %v5267_v10  ;;  %v5287_v24 = vld [vmem:[%s9605_s1 + $0x360] ss:$24 sps:$4 sm:$0xff]   ;;  %v5291_v25 = vld [vmem:[%s9605_s1 + $0x334] ss:$24 sps:$4 sm:$0xff]   ;;  %v5290_v26 = vld [vmem:[%s9605_s1 + $0x30] ss:$24 sps:$4 sm:$0xff]  }
   0xa   :  { %v5294_v27 = vld [vmem:[%s9605_s1 + $0x4] ss:$24 sps:$4 sm:$0xff]   ;;  %v5293_v28 = vld [vmem:[%s9605_s1 + $0x330] ss:$24 sps:$4 sm:$0xff]   ;;  %v5296_v30 = vld [vmem:[%s9605_s1] ss:$24 sps:$4 sm:$0xff]  }
   0xb   :  { %2080 = vmatpush1.bf16.msra.mxu0 %v5266_v9  ;;  %v5297_v29 = vld [vmem:[%s9605_s1 + $0x304] ss:$24 sps:$4 sm:$0xff]   ;;  %v5300_v31 = vld [vmem:[%s9605_s1 + $0x2d4] ss:$24 sps:$4 sm:$0xff]   ;;  %v5299_v32 = vld [vmem:[%s9605_s1 + $0x300] ss:$24 sps:$4 sm:$0xff]  }
   0xc   :  { %2081 = vmatprep.subr.bf16.mxu0 %v5270_v11  ;;  %2193 = vmatpush1.bf16.msra.mxu1 %v5269_v12  ;;  %v5303_v33 = vld [vmem:[%s9605_s1 + $0x5d4] ss:$24 sps:$4 sm:$0xff]   ;;  %v5302_v34 = vld [vmem:[%s9605_s1 + $0x2d0] ss:$24 sps:$4 sm:$0xff]   ;;  %v5306_v35 = vld [vmem:[%s9605_s1 + $0x2a4] ss:$24 sps:$4 sm:$0xff]  }
   0xd   :  { %2194 = vmatprep.subr.bf16.mxu1 %v5273_v13  ;;  %v5305_v36 = vld [vmem:[%s9605_s1 + $0x5d0] ss:$24 sps:$4 sm:$0xff]   ;;  %v5309_v37 = vld [vmem:[%s9605_s1 + $0x5a4] ss:$24 sps:$4 sm:$0xff]   ;;  %v5308_v38 = vld [vmem:[%s9605_s1 + $0x2a0] ss:$24 sps:$4 sm:$0xff]  }
   0xe   :  { %v5312_v39 = vld [vmem:[%s9605_s1 + $0x274] ss:$24 sps:$4 sm:$0xff]   ;;  %v5311_v40 = vld [vmem:[%s9605_s1 + $0x5a0] ss:$24 sps:$4 sm:$0xff]   ;;  %v5314_v42 = vld [vmem:[%s9605_s1 + $0x270] ss:$24 sps:$4 sm:$0xff]  }
   0xf   :  { %2082 = vmatpush1.bf16.msra.mxu0 %v5272_v14  ;;  %v5315_v41 = vld [vmem:[%s9605_s1 + $0x574] ss:$24 sps:$4 sm:$0xff]   ;;  %v5318_v43 = vld [vmem:[%s9605_s1 + $0x244] ss:$24 sps:$4 sm:$0xff]   ;;  %v5317_v44 = vld [vmem:[%s9605_s1 + $0x570] ss:$24 sps:$4 sm:$0xff]  }
  0x10   :  { %2083 = vmatprep.subr.bf16.mxu0 %v5276_v15  ;;  %2195 = vmatpush1.bf16.msra.mxu1 %v5275_v16  ;;  %v5321_v45 = vld [vmem:[%s9605_s1 + $0x544] ss:$24 sps:$4 sm:$0xff]   ;;  %v5320_v46 = vld [vmem:[%s9605_s1 + $0x240] ss:$24 sps:$4 sm:$0xff]   ;;  %v5324_v48 = vld [vmem:[%s9605_s1 + $0x214] ss:$24 sps:$4 sm:$0xff]  }
  0x11   :  { %2196 = vmatprep.subr.bf16.mxu1 %v5279_v17  ;;  %v6068_v47 = vld [vmem:[%s9606_s0 + $0x4] ss:$24 sps:$4 sm:$0xff]   ;;  %v5323_v49 = vld [vmem:[%s9605_s1 + $0x540] ss:$24 sps:$4 sm:$0xff]   ;;  %v5327_v50 = vld [vmem:[%s9605_s1 + $0x514] ss:$24 sps:$4 sm:$0xff]  }
  0x12   :  { %2107 = vmatprep.mubr.bf16.mxu0 %v6068_v47  ;;  %v5354_v51 = vld [vmem:[%s9606_s0 + $0xc] ss:$24 sps:$4 sm:$0xff]   ;;  %v5326_v52 = vld [vmem:[%s9605_s1 + $0x210] ss:$24 sps:$4 sm:$0xff]   ;;  %v5332_v56 = vld [vmem:[%s9605_s1 + $0x1e0] ss:$24 sps:$4 sm:$0xff]  }
  0x13   :  { %2084 = vmatpush1.bf16.msra.mxu0 %v5278_v18  ;;  %v5330_v53 = vld [vmem:[%s9605_s1 + $0x1e4] ss:$24 sps:$4 sm:$0xff]   ;;  %2220 = vmatprep.mubr.bf16.mxu1 %v5354_v51  ;;  %v5329_v54 = vld [vmem:[%s9605_s1 + $0x510] ss:$24 sps:$4 sm:$0xff]   ;;  %v5336_v57 = vld [vmem:[%s9605_s1 + $0x1b4] ss:$24 sps:$4 sm:$0xff]  }
  0x14   :  { %2085 = vmatprep.subr.bf16.mxu0 %v5282_v19  ;;  %2197 = vmatpush1.bf16.msra.mxu1 %v5281_v20  ;;  %v5333_v55 = vld [vmem:[%s9605_s1 + $0x4e4] ss:$24 sps:$4 sm:$0xff]   ;;  %v5335_v58 = vld [vmem:[%s9605_s1 + $0x4e0] ss:$24 sps:$4 sm:$0xff]   ;;  %v5339_v59 = vld [vmem:[%s9605_s1 + $0x4b4] ss:$24 sps:$4 sm:$0xff]  }
  0x15   :  { %2198 = vmatprep.subr.bf16.mxu1 %v5285_v21  ;;  %v5338_v60 = vld [vmem:[%s9605_s1 + $0x1b0] ss:$24 sps:$4 sm:$0xff]   ;;  %v5342_v61 = vld [vmem:[%s9605_s1 + $0x184] ss:$24 sps:$4 sm:$0xff]   ;;  %v5344_v0 = vld [vmem:[%s9605_s1 + $0x180] ss:$24 sps:$4 sm:$0xff]  }
  0x16   :  { %v5341_v62 = vld [vmem:[%s9605_s1 + $0x4b0] ss:$24 sps:$4 sm:$0xff]   ;;  %v5345_v63 = vld [vmem:[%s9605_s1 + $0x484] ss:$24 sps:$4 sm:$0xff]   ;;  %v5349_v1 = vld [vmem:[%s9605_s1 + $0x480] ss:$24 sps:$4 sm:$0xff]  }
  0x17   :  { %2086 = vmatpush1.bf16.msra.mxu0 %v5284_v22  ;;  %v6128_v2 = vld [vmem:[%s9606_s0] ss:$24 sps:$4 sm:$0xff]   ;;  %v5353_v3 = vld [vmem:[%s9605_s1 + $0x754] ss:$24 sps:$4 sm:$0xff]   ;;  %v5351_v4 = vld [vmem:[%s9605_s1 + $0x750] ss:$24 sps:$4 sm:$0xff]  }
  0x18   :  { %2087 = vmatprep.subr.bf16.mxu0 %v5288_v23  ;;  %2199 = vmatpush1.bf16.msra.mxu1 %v5287_v24  ;;  %v5356_v5 = vld [vmem:[%s9606_s0 + $0x8] ss:$24 sps:$4 sm:$0xff]   ;;  %v5359_v6 = vld [vmem:[%s9605_s1 + $0x15c] ss:$24 sps:$4 sm:$0xff]   ;;  %v5357_v7 = vld [vmem:[%s9605_s1 + $0x158] ss:$24 sps:$4 sm:$0xff]  }
  0x19   :  { %2200 = vmatprep.subr.bf16.mxu1 %v5291_v25  ;;  %v6148_v8 = vld [vmem:[%s9606_s0 + $0x34] ss:$24 sps:$4 sm:$0xff]   ;;  %v5362_v9 = vld [vmem:[%s9605_s1 + $0x724] ss:$24 sps:$4 sm:$0xff]   ;;  %v5360_v12 = vld [vmem:[%s9605_s1 + $0x720] ss:$24 sps:$4 sm:$0xff]  }
  0x1a   :  { %v5372_v10 = vld [vmem:[%s9606_s0 + $0x3c] ss:$24 sps:$4 sm:$0xff]   ;;  %v5365_v11 = vld [vmem:[%s9605_s1 + $0x12c] ss:$24 sps:$4 sm:$0xff]   ;;  %v5363_v13 = vld [vmem:[%s9605_s1 + $0x128] ss:$24 sps:$4 sm:$0xff]  }
  0x1b   :  { %2088 = vmatpush1.bf16.msra.mxu0 %v5290_v26  ;;  %v6170_v14 = vld [vmem:[%s9606_s0 + $0x30] ss:$24 sps:$4 sm:$0xff]   ;;  %v5371_v15 = vld [vmem:[%s9605_s1 + $0x6f4] ss:$24 sps:$4 sm:$0xff]   ;;  %v6190_v20 = vld [vmem:[%s9606_s0 + $0x64] ss:$24 sps:$4 sm:$0xff]  }
  0x1c   :  { %2089 = vmatprep.subr.bf16.mxu0 %v5294_v27  ;;  %2201 = vmatpush1.bf16.msra.mxu1 %v5293_v28  ;;  %v5369_v16 = vld [vmem:[%s9605_s1 + $0x6f0] ss:$24 sps:$4 sm:$0xff]   ;;  %v5377_v18 = vld [vmem:[%s9605_s1 + $0xfc] ss:$24 sps:$4 sm:$0xff]   ;;  %v5390_v22 = vld [vmem:[%s9606_s0 + $0x6c] ss:$24 sps:$4 sm:$0xff]  }
  0x1d   :  { %2202 = vmatprep.subr.bf16.mxu1 %v5297_v29  ;;  %v5374_v17 = vld [vmem:[%s9606_s0 + $0x38] ss:$24 sps:$4 sm:$0xff]   ;;  %v5380_v21 = vld [vmem:[%s9605_s1 + $0x6c4] ss:$24 sps:$4 sm:$0xff]   ;;  %v5381_v25 = vld [vmem:[%s9605_s1 + $0xc8] ss:$24 sps:$4 sm:$0xff]  }
  0x1e   :  { %v5375_v19 = vld [vmem:[%s9605_s1 + $0xf8] ss:$24 sps:$4 sm:$0xff]   ;;  %v5383_v23 = vld [vmem:[%s9605_s1 + $0xcc] ss:$24 sps:$4 sm:$0xff]   ;;  %v5392_v29 = vld [vmem:[%s9606_s0 + $0x68] ss:$24 sps:$4 sm:$0xff]  }
  0x1f   :  { %2090 = vmatpush1.bf16.msra.mxu0 %v5296_v30  ;;  %v5378_v24 = vld [vmem:[%s9605_s1 + $0x6c0] ss:$24 sps:$4 sm:$0xff]   ;;  %v5389_v27 = vld [vmem:[%s9605_s1 + $0x694] ss:$24 sps:$4 sm:$0xff]   ;;  %v5387_v28 = vld [vmem:[%s9605_s1 + $0x690] ss:$24 sps:$4 sm:$0xff]  }
  0x20   :  { %2091 = vmatprep.subr.bf16.mxu0 %v5300_v31  ;;  %2203 = vmatpush1.bf16.msra.mxu1 %v5299_v32  ;;  %v6212_v26 = vld [vmem:[%s9606_s0 + $0x60] ss:$24 sps:$4 sm:$0xff]   ;;  %v5395_v30 = vld [vmem:[%s9605_s1 + $0x9c] ss:$24 sps:$4 sm:$0xff]  }
  0x21   :  { %2204 = vmatprep.subr.bf16.mxu1 %v5303_v33  ;;  %v5393_v31 = vld [vmem:[%s9605_s1 + $0x98] ss:$24 sps:$4 sm:$0xff]   ;;  %v6232_v32 = vld [vmem:[%s9606_s0 + $0x94] ss:$24 sps:$4 sm:$0xff]   ;;  %v5398_v33 = vld [vmem:[%s9605_s1 + $0x664] ss:$24 sps:$4 sm:$0xff]  }
  0x22   :  { %v6296_v51 = vld [vmem:[%s9606_s0 + $0xc0] ss:$24 sps:$4 sm:$0xff]  }
  0x23   :  { %2092 = vmatpush2.bf16.msra.mxu0 %v5302_v34  ;;  %v5408_v34 = vld [vmem:[%s9606_s0 + $0x9c] ss:$24 sps:$4 sm:$0xff]  }
  0x24   :  { %2093 = vmatprep.subr.bf16.mxu0 %v5306_v35  ;;  %2205 = vmatpush2.bf16.msra.mxu1 %v5305_v36  ;;  %v5401_v35 = vld [vmem:[%s9605_s1 + $0x6c] ss:$24 sps:$4 sm:$0xff]   ;;  %v5396_v36 = vld [vmem:[%s9605_s1 + $0x660] ss:$24 sps:$4 sm:$0xff]  }
  0x25   :  { %2206 = vmatprep.subr.bf16.mxu1 %v5309_v37  ;;  %v5399_v37 = vld [vmem:[%s9605_s1 + $0x68] ss:$24 sps:$4 sm:$0xff]  }
  0x27   :  { %2094 = vmatpush2.bf16.msra.mxu0 %v5308_v38  ;;  %v6254_v38 = vld [vmem:[%s9606_s0 + $0x90] ss:$24 sps:$4 sm:$0xff]  }
  0x28   :  { %2095 = vmatprep.subr.bf16.mxu0 %v5312_v39  ;;  %2207 = vmatpush2.bf16.msra.mxu1 %v5311_v40  ;;  %v5407_v39 = vld [vmem:[%s9605_s1 + $0x634] ss:$24 sps:$4 sm:$0xff]   ;;  %v5405_v40 = vld [vmem:[%s9605_s1 + $0x630] ss:$24 sps:$4 sm:$0xff]  }
  0x29   :  { %2208 = vmatprep.subr.bf16.mxu1 %v5315_v41  ;;  %v5410_v41 = vld [vmem:[%s9606_s0 + $0x98] ss:$24 sps:$4 sm:$0xff]  }
  0x2b   :  { %2096 = vmatpush2.bf16.msra.mxu0 %v5314_v42  ;;  %v5413_v42 = vld [vmem:[%s9605_s1 + $0x3c] ss:$24 sps:$4 sm:$0xff]  }
  0x2c   :  { %2097 = vmatprep.subr.bf16.mxu0 %v5318_v43  ;;  %2209 = vmatpush2.bf16.msra.mxu1 %v5317_v44  ;;  %v5411_v43 = vld [vmem:[%s9605_s1 + $0x38] ss:$24 sps:$4 sm:$0xff]   ;;  %v6274_v44 = vld [vmem:[%s9606_s0 + $0xc4] ss:$24 sps:$4 sm:$0xff]  }
  0x2d   :  { %2210 = vmatprep.subr.bf16.mxu1 %v5321_v45  ;;  %v5416_v45 = vld [vmem:[%s9605_s1 + $0x604] ss:$24 sps:$4 sm:$0xff]  }
  0x2f   :  { %2098 = vmatpush2.bf16.msra.mxu0 %v5320_v46  ;;  %v5426_v46 = vld [vmem:[%s9606_s0 + $0xcc] ss:$24 sps:$4 sm:$0xff]  }
  0x30   :  { %2099 = vmatprep.subr.bf16.mxu0 %v5324_v48  ;;  %2211 = vmatpush2.bf16.msra.mxu1 %v5323_v49  ;;  %v5419_v48 = vld [vmem:[%s9605_s1 + $0xc] ss:$24 sps:$4 sm:$0xff]   ;;  %v5414_v49 = vld [vmem:[%s9605_s1 + $0x600] ss:$24 sps:$4 sm:$0xff]  }
  0x31   :  { %2212 = vmatprep.subr.bf16.mxu1 %v5327_v50  ;;  %v5417_v50 = vld [vmem:[%s9605_s1 + $0x8] ss:$24 sps:$4 sm:$0xff]  }
  0x33   :  { %2100 = vmatpush2.bf16.msra.mxu0 %v5326_v52  ;;  %v5425_v52 = vld [vmem:[%s9605_s1 + $0x8d4] ss:$24 sps:$4 sm:$0xff]  }
  0x34   :  { %2101 = vmatprep.subr.bf16.mxu0 %v5330_v53  ;;  %2213 = vmatpush2.bf16.msra.mxu1 %v5329_v54  ;;  %v5423_v53 = vld [vmem:[%s9605_s1 + $0x8d0] ss:$24 sps:$4 sm:$0xff]  }
  0x35   :  { %2214 = vmatprep.subr.bf16.mxu1 %v5333_v55  ;;  %v5428_v54 = vld [vmem:[%s9606_s0 + $0xc8] ss:$24 sps:$4 sm:$0xff]   ;;  %v5431_v55 = vld [vmem:[%s9605_s1 + $0x2dc] ss:$24 sps:$4 sm:$0xff]  }
  0x37   :  { %2102 = vmatpush2.bf16.msra.mxu0 %v5332_v56  ;;  %v5429_v56 = vld [vmem:[%s9605_s1 + $0x2d8] ss:$24 sps:$4 sm:$0xff]  }
  0x38   :  { %2103 = vmatprep.subr.bf16.mxu0 %v5336_v57  ;;  %2215 = vmatpush2.bf16.msra.mxu1 %v5335_v58  ;;  %v6316_v57 = vld [vmem:[%s9606_s0 + $0xf4] ss:$24 sps:$4 sm:$0xff]   ;;  %v5434_v58 = vld [vmem:[%s9605_s1 + $0x8a4] ss:$24 sps:$4 sm:$0xff]  }
  0x39   :  { %2216 = vmatprep.subr.bf16.mxu1 %v5339_v59  ;;  %v5444_v59 = vld [vmem:[%s9606_s0 + $0xfc] ss:$24 sps:$4 sm:$0xff]  }
  0x3b   :  { %2104 = vmatpush2.bf16.msra.mxu0 %v5338_v60  ;;  %v5437_v60 = vld [vmem:[%s9605_s1 + $0x2ac] ss:$24 sps:$4 sm:$0xff]  }
  0x3c   :  { %2105 = vmatprep.subr.bf16.mxu0 %v5342_v61  ;;  %2217 = vmatpush2.bf16.msra.mxu1 %v5341_v62  ;;  %v5432_v61 = vld [vmem:[%s9605_s1 + $0x8a0] ss:$24 sps:$4 sm:$0xff]  }
  0x3d   :  { %2218 = vmatprep.subr.bf16.mxu1 %v5345_v63  ;;  %v5435_v62 = vld [vmem:[%s9605_s1 + $0x2a8] ss:$24 sps:$4 sm:$0xff]  }
  0x3e   :  { %v6338_v63 = vld [vmem:[%s9606_s0 + $0xf0] ss:$24 sps:$4 sm:$0xff]  }
  0x3f   :  { %2106 = vmatpush2.bf16.msra.mxu0 %v5344_v0  ;;  %v5443_v0 = vld [vmem:[%s9605_s1 + $0x874] ss:$24 sps:$4 sm:$0xff]  }
  0x40   :  { %2301 = vmatprep.subr.bf16.mxu0 %v5353_v3  ;;  %2219 = vmatpush2.bf16.msra.mxu1 %v5349_v1  ;;  %v5441_v1 = vld [vmem:[%s9605_s1 + $0x870] ss:$24 sps:$4 sm:$0xff]  }
  0x41   :  { %2414 = vmatprep.subr.bf16.mxu1 %v5359_v6  ;;  %v5446_v3 = vld [vmem:[%s9606_s0 + $0xf8] ss:$24 sps:$4 sm:$0xff]   ;;  %v6358_v6 = vld [vmem:[%s9606_s0 + $0x124] ss:$24 sps:$4 sm:$0xff]  }
  0x42   :  { %2108 = vmatmul.mubr.bf16.vlgmr.msra.gmra.mxu0 %v6128_v2 }
  0x43   :  { %2302 = vmatpush1.bf16.msra.mxu0 %v5351_v4  ;;  %2117 = vmatprep.mubr.bf16.mxu0 %v6148_v8  ;;  %v5449_v4 = vld [vmem:[%s9605_s1 + $0x27c] ss:$24 sps:$4 sm:$0xff]  }
  0x44   :  { %2221 = vmatmul.mubr.bf16.vlgmr.msra.gmra.mxu1 %v5356_v5  ;;  %2303 = vmatprep.subr.bf16.mxu0 %v5362_v9  ;;  %v5447_v5 = vld [vmem:[%s9605_s1 + $0x278] ss:$24 sps:$4 sm:$0xff]   ;;  %v5462_v9 = vld [vmem:[%s9606_s0 + $0x12c] ss:$24 sps:$4 sm:$0xff]  }
  0x45   :  { %2415 = vmatpush1.bf16.msra.mxu1 %v5357_v7  ;;  %2230 = vmatprep.mubr.bf16.mxu1 %v5372_v10  ;;  %v5452_v7 = vld [vmem:[%s9605_s1 + $0x844] ss:$24 sps:$4 sm:$0xff]  }
  0x46   :  { %2416 = vmatprep.subr.bf16.mxu1 %v5365_v11  ;;  %v5455_v10 = vld [vmem:[%s9605_s1 + $0x24c] ss:$24 sps:$4 sm:$0xff]   ;;  %v5450_v11 = vld [vmem:[%s9605_s1 + $0x840] ss:$24 sps:$4 sm:$0xff]  }
  0x47   :  { %2304 = vmatpush1.bf16.msra.mxu0 %v5360_v12  ;;  %v5453_v12 = vld [vmem:[%s9605_s1 + $0x248] ss:$24 sps:$4 sm:$0xff]  }
  0x48   :  { %2305 = vmatprep.subr.bf16.mxu0 %v5371_v15  ;;  %v5461_v15 = vld [vmem:[%s9605_s1 + $0x814] ss:$24 sps:$4 sm:$0xff]  }
  0x49   :  { %2417 = vmatpush1.bf16.msra.mxu1 %v5363_v13  ;;  %v6380_v13 = vld [vmem:[%s9606_s0 + $0x120] ss:$24 sps:$4 sm:$0xff]  }
  0x4a   :  { %2118 = vmatmul.mubr.bf16.gmra.mxu0 %v6170_v14  ;;  %2418 = vmatprep.subr.bf16.mxu1 %v5377_v18  ;;  %v5467_v18 = vld [vmem:[%s9605_s1 + $0x21c] ss:$24 sps:$4 sm:$0xff]  }
  0x4b   :  { %2306 = vmatpush1.bf16.msra.mxu0 %v5369_v16  ;;  %2127 = vmatprep.mubr.bf16.mxu0 %v6190_v20  ;;  %v5459_v16 = vld [vmem:[%s9605_s1 + $0x810] ss:$24 sps:$4 sm:$0xff]  }
  0x4c   :  { %2231 = vmatmul.mubr.bf16.gmra.mxu1 %v5374_v17  ;;  %2307 = vmatprep.subr.bf16.mxu0 %v5380_v21  ;;  %v5464_v17 = vld [vmem:[%s9606_s0 + $0x128] ss:$24 sps:$4 sm:$0xff]   ;;  %v6400_v21 = vld [vmem:[%s9606_s0 + $0x154] ss:$24 sps:$4 sm:$0xff]  }
  0x4d   :  { %2419 = vmatpush1.bf16.msra.mxu1 %v5375_v19  ;;  %2240 = vmatprep.mubr.bf16.mxu1 %v5390_v22  ;;  %v5465_v19 = vld [vmem:[%s9605_s1 + $0x218] ss:$24 sps:$4 sm:$0xff]   ;;  %v5470_v22 = vld [vmem:[%s9605_s1 + $0x7e4] ss:$24 sps:$4 sm:$0xff]  }
  0x4e   :  { %2420 = vmatprep.subr.bf16.mxu1 %v5383_v23  ;;  %v6408_v23 = vld [vmem:[%s9606_s0 + $0x15c] ss:$24 sps:$4 sm:$0xff]  }
  0x4f   :  { %2308 = vmatpush1.bf16.msra.mxu0 %v5378_v24  ;;  %v5473_v24 = vld [vmem:[%s9605_s1 + $0x1ec] ss:$24 sps:$4 sm:$0xff]  }
  0x50   :  { %2309 = vmatprep.subr.bf16.mxu0 %v5389_v27  ;;  %v5471_v27 = vld [vmem:[%s9605_s1 + $0x1e8] ss:$24 sps:$4 sm:$0xff]  }
  0x51   :  { %2421 = vmatpush1.bf16.msra.mxu1 %v5381_v25  ;;  %v5468_v25 = vld [vmem:[%s9605_s1 + $0x7e0] ss:$24 sps:$4 sm:$0xff]  }
  0x52   :  { %2128 = vmatmul.mubr.bf16.gmra.mxu0 %v6212_v26  ;;  %2422 = vmatprep.subr.bf16.mxu1 %v5395_v30  ;;  %v5477_v30 = vld [vmem:[%s9605_s1 + $0x7b0] ss:$24 sps:$4 sm:$0xff]  }
  0x53   :  { %2310 = vmatpush1.bf16.msra.mxu0 %v5387_v28  ;;  %2137 = vmatprep.mubr.bf16.mxu0 %v6232_v32  ;;  %v5479_v28 = vld [vmem:[%s9605_s1 + $0x7b4] ss:$24 sps:$4 sm:$0xff]  }
  0x54   :  { %2241 = vmatmul.mubr.bf16.gmra.mxu1 %v5392_v29  ;;  %2311 = vmatprep.subr.bf16.mxu0 %v5398_v33  ;;  %v6427_v29 = vld [vmem:[%s9606_s0 + $0x150] ss:$24 sps:$4 sm:$0xff]  }
  0x55   :  { %2423 = vmatpush1.bf16.msra.mxu1 %v5393_v31  ;;  %2250 = vmatprep.mubr.bf16.mxu1 %v5408_v34  ;;  %v5485_v31 = vld [vmem:[%s9605_s1 + $0x1bc] ss:$24 sps:$4 sm:$0xff]   ;;  %v6439_v33 = vld [vmem:[%s9606_s0 + $0x158] ss:$24 sps:$4 sm:$0xff]  }
  0x56   :  { %2424 = vmatprep.subr.bf16.mxu1 %v5401_v35  ;;  %v6444_v34 = vld [vmem:[%s9606_s0 + $0x14] ss:$24 sps:$4 sm:$0xff]   ;;  %v5488_v35 = vld [vmem:[%s9605_s1 + $0x784] ss:$24 sps:$4 sm:$0xff]  }
  0x57   :  { %2312 = vmatpush1.bf16.msra.mxu0 %v5396_v36  ;;  %v5483_v36 = vld [vmem:[%s9605_s1 + $0x1b8] ss:$24 sps:$4 sm:$0xff]  }
  0x58   :  { %2313 = vmatprep.subr.bf16.mxu0 %v5407_v39  ;;  %v5486_v39 = vld [vmem:[%s9605_s1 + $0x780] ss:$24 sps:$4 sm:$0xff]  }
  0x59   :  { %2425 = vmatpush1.bf16.msra.mxu1 %v5399_v37  ;;  %v5491_v37 = vld [vmem:[%s9605_s1 + $0x18c] ss:$24 sps:$4 sm:$0xff]  }
  0x5a   :  { %2138 = vmatmul.mubr.bf16.gmra.mxu0 %v6254_v38  ;;  %2426 = vmatprep.subr.bf16.mxu1 %v5413_v42  ;;  %v6471_v42 = vld [vmem:[%s9606_s0 + $0x10] ss:$24 sps:$4 sm:$0xff]  }
  0x5b   :  { %2314 = vmatpush1.bf16.msra.mxu0 %v5405_v40  ;;  %2147 = vmatprep.mubr.bf16.mxu0 %v6274_v44  ;;  %v5497_v40 = vld [vmem:[%s9605_s1 + $0x45c] ss:$24 sps:$4 sm:$0xff]  }
  0x5c   :  { %2251 = vmatmul.mubr.bf16.gmra.mxu1 %v5410_v41  ;;  %2315 = vmatprep.subr.bf16.mxu0 %v5416_v45  ;;  %v5489_v41 = vld [vmem:[%s9605_s1 + $0x188] ss:$24 sps:$4 sm:$0xff]   ;;  %v5495_v45 = vld [vmem:[%s9605_s1 + $0x458] ss:$24 sps:$4 sm:$0xff]  }
  0x5d   :  { %2427 = vmatpush1.bf16.msra.mxu1 %v5411_v43  ;;  %2260 = vmatprep.mubr.bf16.mxu1 %v5426_v46  ;;  %v5500_v43 = vld [vmem:[%s9605_s1 + $0x75c] ss:$24 sps:$4 sm:$0xff]  }
  0x5e   :  { %2428 = vmatprep.subr.bf16.mxu1 %v5419_v48  ;;  %v6482_v46 = vld [vmem:[%s9606_s0 + $0x44] ss:$24 sps:$4 sm:$0xff]   ;;  %v5498_v48 = vld [vmem:[%s9605_s1 + $0x758] ss:$24 sps:$4 sm:$0xff]  }
  0x5f   :  { %2316 = vmatpush1.bf16.msra.mxu0 %v5414_v49  ;;  %v5506_v49 = vld [vmem:[%s9605_s1 + $0x72c] ss:$24 sps:$4 sm:$0xff]  }
  0x60   :  { %2317 = vmatprep.subr.bf16.mxu0 %v5425_v52  ;;  %v5512_v52 = vld [vmem:[%s9605_s1 + $0x3fc] ss:$24 sps:$4 sm:$0xff]  }
  0x61   :  { %2429 = vmatpush1.bf16.msra.mxu1 %v5417_v50  ;;  %v5501_v50 = vld [vmem:[%s9605_s1 + $0x428] ss:$24 sps:$4 sm:$0xff]  }
  0x62   :  { %2148 = vmatmul.mubr.bf16.gmra.mxu0 %v6296_v51  ;;  %2430 = vmatprep.subr.bf16.mxu1 %v5431_v55  ;;  %v5510_v55 = vld [vmem:[%s9605_s1 + $0x3f8] ss:$24 sps:$4 sm:$0xff]  }
  0x63   :  { %2318 = vmatpush2.bf16.msra.mxu0 %v5423_v53  ;;  %2157 = vmatprep.mubr.bf16.mxu0 %v6316_v57  ;;  %v5504_v53 = vld [vmem:[%s9605_s1 + $0x728] ss:$24 sps:$4 sm:$0xff]  }
  0x64   :  { %2261 = vmatmul.mubr.bf16.gmra.mxu1 %v5428_v54  ;;  %2319 = vmatprep.subr.bf16.mxu0 %v5434_v58  ;;  %v6509_v54 = vld [vmem:[%s9606_s0 + $0x40] ss:$24 sps:$4 sm:$0xff]  }
  0x65   :  { %2431 = vmatpush2.bf16.msra.mxu1 %v5429_v56  ;;  %2270 = vmatprep.mubr.bf16.mxu1 %v5444_v59  ;;  %v6520_v56 = vld [vmem:[%s9606_s0 + $0x74] ss:$24 sps:$4 sm:$0xff]   ;;  %v5513_v58 = vld [vmem:[%s9605_s1 + $0x6f8] ss:$24 sps:$4 sm:$0xff]  }
  0x66   :  { %2432 = vmatprep.subr.bf16.mxu1 %v5437_v60  ;;  %v5521_v59 = vld [vmem:[%s9605_s1 + $0x6cc] ss:$24 sps:$4 sm:$0xff]   ;;  %v5516_v60 = vld [vmem:[%s9605_s1 + $0x3c8] ss:$24 sps:$4 sm:$0xff]  }
  0x67   :  { %2320 = vmatpush2.bf16.msra.mxu0 %v5432_v61  ;;  %v5527_v61 = vld [vmem:[%s9605_s1 + $0x39c] ss:$24 sps:$4 sm:$0xff]  }
  0x68   :  { %2321 = vmatprep.subr.bf16.mxu0 %v5443_v0  ;;  %v6547_v0 = vld [vmem:[%s9606_s0 + $0x70] ss:$24 sps:$4 sm:$0xff]  }
  0x69   :  { %2433 = vmatpush2.bf16.msra.mxu1 %v5435_v62  ;;  %v5519_v62 = vld [vmem:[%s9605_s1 + $0x6c8] ss:$24 sps:$4 sm:$0xff]  }
  0x6a   :  { %2158 = vmatmul.mubr.bf16.gmra.mxu0 %v6338_v63  ;;  %2434 = vmatprep.subr.bf16.mxu1 %v5449_v4  ;;  %v5528_v4 = vld [vmem:[%s9605_s1 + $0x698] ss:$24 sps:$4 sm:$0xff]  }
  0x6b   :  { %2322 = vmatpush2.bf16.msra.mxu0 %v5441_v1  ;;  %2167 = vmatprep.mubr.bf16.mxu0 %v6358_v6  ;;  %v5525_v1 = vld [vmem:[%s9605_s1 + $0x398] ss:$24 sps:$4 sm:$0xff]  }
  0x6c   :  { %2271 = vmatmul.mubr.bf16.gmra.mxu1 %v5446_v3  ;;  %2323 = vmatprep.subr.bf16.mxu0 %v5452_v7  ;;  %v6558_v3 = vld [vmem:[%s9606_s0 + $0xa4] ss:$24 sps:$4 sm:$0xff]   ;;  %v5531_v7 = vld [vmem:[%s9605_s1 + $0x368] ss:$24 sps:$4 sm:$0xff]  }
  0x6d   :  { %2435 = vmatpush2.bf16.msra.mxu1 %v5447_v5  ;;  %2280 = vmatprep.mubr.bf16.mxu1 %v5462_v9  ;;  %v5536_v5 = vld [vmem:[%s9605_s1 + $0x66c] ss:$24 sps:$4 sm:$0xff]   ;;  %v5542_v9 = vld [vmem:[%s9605_s1 + $0x33c] ss:$24 sps:$4 sm:$0xff]  }
  0x6e   :  { %2436 = vmatprep.subr.bf16.mxu1 %v5455_v10  ;;  %v5534_v10 = vld [vmem:[%s9605_s1 + $0x668] ss:$24 sps:$4 sm:$0xff]  }
  0x6f   :  { %2324 = vmatpush2.bf16.msra.mxu0 %v5450_v11  ;;  %v6585_v11 = vld [vmem:[%s9606_s0 + $0xa0] ss:$24 sps:$4 sm:$0xff]  }
  0x70   :  { %2325 = vmatprep.subr.bf16.mxu0 %v5461_v15  ;;  %v6596_v15 = vld [vmem:[%s9606_s0 + $0xd4] ss:$24 sps:$4 sm:$0xff]  }
  0x71   :  { %2437 = vmatpush2.bf16.msra.mxu1 %v5453_v12  ;;  %v5540_v12 = vld [vmem:[%s9605_s1 + $0x338] ss:$24 sps:$4 sm:$0xff]  }
  0x72   :  { %2168 = vmatmul.mubr.bf16.gmra.mxu0 %v6380_v13  ;;  %2438 = vmatprep.subr.bf16.mxu1 %v5467_v18  ;;  %v5546_v18 = vld [vmem:[%s9605_s1 + $0x308] ss:$24 sps:$4 sm:$0xff]  }
  0x73   :  { %2326 = vmatpush2.bf16.msra.mxu0 %v5459_v16  ;;  %2177 = vmatprep.mubr.bf16.mxu0 %v6400_v21  ;;  %v5543_v16 = vld [vmem:[%s9605_s1 + $0x638] ss:$24 sps:$4 sm:$0xff]  }
  0x74   :  { %2281 = vmatmul.mubr.bf16.gmra.mxu1 %v5464_v17  ;;  %2327 = vmatprep.subr.bf16.mxu0 %v5470_v22  ;;  %v5551_v17 = vld [vmem:[%s9605_s1 + $0x60c] ss:$24 sps:$4 sm:$0xff]   ;;  %v5549_v22 = vld [vmem:[%s9605_s1 + $0x608] ss:$24 sps:$4 sm:$0xff]  }
  0x75   :  { %2439 = vmatpush2.bf16.msra.mxu1 %v5465_v19  ;;  %2290 = vmatprep.mubr.bf16.mxu1 %v6408_v23  ;;  %v5557_v19 = vld [vmem:[%s9605_s1 + $0x5dc] ss:$24 sps:$4 sm:$0xff]  }
  0x76   :  { %2440 = vmatprep.subr.bf16.mxu1 %v5473_v24  ;;  %v6623_v24 = vld [vmem:[%s9606_s0 + $0xd0] ss:$24 sps:$4 sm:$0xff]  }
  0x77   :  { %2328 = vmatpush2.bf16.msra.mxu0 %v5468_v25  ;;  %v5555_v25 = vld [vmem:[%s9605_s1 + $0x5d8] ss:$24 sps:$4 sm:$0xff]  }
  0x78   :  { %2329 = vmatprep.subr.bf16.mxu0 %v5479_v28  ;;  %v5558_v28 = vld [vmem:[%s9605_s1 + $0x8d8] ss:$24 sps:$4 sm:$0xff]  }
  0x79   :  { %2441 = vmatpush2.bf16.msra.mxu1 %v5471_v27  ;;  %v6634_v27 = vld [vmem:[%s9606_s0 + $0x104] ss:$24 sps:$4 sm:$0xff]  }
  0x7a   :  { %2178 = vmatmul.mubr.bf16.gmra.mxu0 %v6427_v29  ;;  %2442 = vmatprep.subr.bf16.mxu1 %v5485_v31  ;;  %v5561_v31 = vld [vmem:[%s9605_s1 + $0x5a8] ss:$24 sps:$4 sm:$0xff]  }
  0x7b   :  { %2330 = vmatpush2.bf16.msra.mxu0 %v5477_v30  ;;  %2333 = vmatprep.mubr.bf16.mxu0 %v6444_v34  ;;  %v5566_v30 = vld [vmem:[%s9605_s1 + $0x8ac] ss:$24 sps:$4 sm:$0xff]  }
  0x7c   :  { %2291 = vmatmul.mubr.bf16.gmra.mxu1 %v6439_v33  ;;  %2331 = vmatprep.subr.bf16.mxu0 %v5488_v35  ;;  %v5572_v35 = vld [vmem:[%s9605_s1 + $0x57c] ss:$24 sps:$4 sm:$0xff]  }
  0x7d   :  { %2443 = vmatpush2.bf16.msra.mxu1 %v5483_v36  ;;  %2446 = vmatprep.mubr.bf16.mxu1 %v6068_v47  ;;  %v5503_v47 = vld [vmem:[%s9605_s1 + $0x42c] ss:$24 sps:$4 sm:$0xff]   ;;  %v5564_v36 = vld [vmem:[%s9605_s1 + $0x8a8] ss:$24 sps:$4 sm:$0xff]  }
  0x7e   :  { %2444 = vmatprep.subr.bf16.mxu1 %v5491_v37  ;;  %v6661_v37 = vld [vmem:[%s9606_s0 + $0x100] ss:$24 sps:$4 sm:$0xff]  }
  0x7f   :  { %2332 = vmatpush2.bf16.msra.mxu0 %v5486_v39  ;;  %v5570_v39 = vld [vmem:[%s9605_s1 + $0x578] ss:$24 sps:$4 sm:$0xff]  }
  0x80   :  { %2527 = vmatprep.subr.bf16.mxu0 %v5497_v40  ;;  %v6672_v40 = vld [vmem:[%s9606_s0 + $0x134] ss:$24 sps:$4 sm:$0xff]  }
  0x81   :  { %2445 = vmatpush2.bf16.msra.mxu1 %v5489_v41  ;;  %v5573_v41 = vld [vmem:[%s9605_s1 + $0x878] ss:$24 sps:$4 sm:$0xff]  }
  0x82   :  { %2334 = vmatmul.mubr.bf16.vlgmr.msra.gmra.mxu0 %v6471_v42  ;;  %2640 = vmatprep.subr.bf16.mxu1 %v5500_v43  ;;  %v5581_v43 = vld [vmem:[%s9605_s1 + $0x84c] ss:$24 sps:$4 sm:$0xff]  }
  0x83   :  { %2528 = vmatpush1.bf16.msra.mxu0 %v5495_v45  ;;  %2343 = vmatprep.mubr.bf16.mxu0 %v6482_v46  ;;  %v5576_v45 = vld [vmem:[%s9605_s1 + $0x548] ss:$24 sps:$4 sm:$0xff]  }
  0x84   :  { %2447 = vmatmul.mubr.bf16.vlgmr.msra.gmra.mxu1 %v6128_v2  ;;  %2529 = vmatprep.subr.bf16.mxu0 %v5503_v47  ;;  %v5515_v2 = vld [vmem:[%s9605_s1 + $0x6fc] ss:$24 sps:$4 sm:$0xff]  }
  0x85   :  { %2641 = vmatpush1.bf16.msra.mxu1 %v5498_v48  ;;  %2456 = vmatprep.mubr.bf16.mxu1 %v6148_v8  ;;  %v5518_v8 = vld [vmem:[%s9605_s1 + $0x3cc] ss:$24 sps:$4 sm:$0xff]   ;;  %v5587_v47 = vld [vmem:[%s9605_s1 + $0x51c] ss:$24 sps:$4 sm:$0xff]   ;;  %v5579_v48 = vld [vmem:[%s9605_s1 + $0x848] ss:$24 sps:$4 sm:$0xff]  }
  0x86   :  { %2642 = vmatprep.subr.bf16.mxu1 %v5506_v49  ;;  %v6699_v49 = vld [vmem:[%s9606_s0 + $0x130] ss:$24 sps:$4 sm:$0xff]  }
  0x87   :  { %2530 = vmatpush1.bf16.msra.mxu0 %v5501_v50  ;;  %v5585_v50 = vld [vmem:[%s9605_s1 + $0x518] ss:$24 sps:$4 sm:$0xff]  }
  0x88   :  { %2531 = vmatprep.subr.bf16.mxu0 %v5512_v52  ;;  %v6710_v52 = vld [vmem:[%s9606_s0 + $0x164] ss:$24 sps:$4 sm:$0xff]  }
  0x89   :  { %2643 = vmatpush1.bf16.msra.mxu1 %v5504_v53  ;;  %v5588_v53 = vld [vmem:[%s9605_s1 + $0x818] ss:$24 sps:$4 sm:$0xff]  }
  0x8a   :  { %2344 = vmatmul.mubr.bf16.gmra.mxu0 %v6509_v54  ;;  %2644 = vmatprep.subr.bf16.mxu1 %v5515_v2  ;;  %v5596_v2 = vld [vmem:[%s9605_s1 + $0x7ec] ss:$24 sps:$4 sm:$0xff]  }
  0x8b   :  { %2532 = vmatpush1.bf16.msra.mxu0 %v5510_v55  ;;  %2353 = vmatprep.mubr.bf16.mxu0 %v6520_v56  ;;  %v5591_v55 = vld [vmem:[%s9605_s1 + $0x4e8] ss:$24 sps:$4 sm:$0xff]  }
  0x8c   :  { %2457 = vmatmul.mubr.bf16.gmra.mxu1 %v6170_v14  ;;  %2533 = vmatprep.subr.bf16.mxu0 %v5518_v8  ;;  %v5530_v14 = vld [vmem:[%s9605_s1 + $0x69c] ss:$24 sps:$4 sm:$0xff]  }
  0x8d   :  { %2645 = vmatpush1.bf16.msra.mxu1 %v5513_v58  ;;  %2466 = vmatprep.mubr.bf16.mxu1 %v6190_v20  ;;  %v5533_v20 = vld [vmem:[%s9605_s1 + $0x36c] ss:$24 sps:$4 sm:$0xff]   ;;  %v5602_v8 = vld [vmem:[%s9605_s1 + $0x4bc] ss:$24 sps:$4 sm:$0xff]   ;;  %v5594_v58 = vld [vmem:[%s9605_s1 + $0x7e8] ss:$24 sps:$4 sm:$0xff]  }
  0x8e   :  { %2646 = vmatprep.subr.bf16.mxu1 %v5521_v59  ;;  %v6737_v59 = vld [vmem:[%s9606_s0 + $0x160] ss:$24 sps:$4 sm:$0xff]  }
  0x8f   :  { %2534 = vmatpush1.bf16.msra.mxu0 %v5516_v60  ;;  %v5600_v60 = vld [vmem:[%s9605_s1 + $0x4b8] ss:$24 sps:$4 sm:$0xff]  }
  0x90   :  { %2535 = vmatprep.subr.bf16.mxu0 %v5527_v61  ;;  %v5603_v61 = vld [vmem:[%s9605_s1 + $0x7b8] ss:$24 sps:$4 sm:$0xff]  }
  0x91   :  { %2647 = vmatpush1.bf16.msra.mxu1 %v5519_v62  ;;  %v5611_v62 = vld [vmem:[%s9605_s1 + $0x78c] ss:$24 sps:$4 sm:$0xff]  }
  0x92   :  { %2354 = vmatmul.mubr.bf16.gmra.mxu0 %v6547_v0  ;;  %2648 = vmatprep.subr.bf16.mxu1 %v5530_v14  ;;  %v5606_v14 = vld [vmem:[%s9605_s1 + $0x488] ss:$24 sps:$4 sm:$0xff]  }
  0x93   :  { %2536 = vmatpush1.bf16.msra.mxu0 %v5525_v1  ;;  %2363 = vmatprep.mubr.bf16.mxu0 %v6558_v3  ;;  %v6761_v1 = vld [vmem:[%s9606_s0 + $0xc] ss:$24 sps:$4 sm:$0xff]  }
  0x94   :  { %2467 = vmatmul.mubr.bf16.gmra.mxu1 %v6212_v26  ;;  %2537 = vmatprep.subr.bf16.mxu0 %v5533_v20  ;;  %v5545_v26 = vld [vmem:[%s9605_s1 + $0x63c] ss:$24 sps:$4 sm:$0xff]  }
  0x95   :  { %2649 = vmatpush1.bf16.msra.mxu1 %v5528_v4  ;;  %2476 = vmatprep.mubr.bf16.mxu1 %v6232_v32  ;;  %v5548_v32 = vld [vmem:[%s9605_s1 + $0x30c] ss:$24 sps:$4 sm:$0xff]   ;;  %v5609_v4 = vld [vmem:[%s9605_s1 + $0x788] ss:$24 sps:$4 sm:$0xff]  }
  0x96   :  { %2650 = vmatprep.subr.bf16.mxu1 %v5536_v5  ;;  %v5614_v20 = vld [vmem:[%s9605_s1 + $0x164] ss:$24 sps:$4 sm:$0xff]  }
  0x97   :  { %2538 = vmatpush1.bf16.msra.mxu0 %v5531_v7  ;;  %v5617_v5 = vld [vmem:[%s9605_s1 + $0x464] ss:$24 sps:$4 sm:$0xff]   ;;  %v5620_v7 = vld [vmem:[%s9605_s1 + $0x134] ss:$24 sps:$4 sm:$0xff]  }
  0x98   :  { %2539 = vmatprep.subr.bf16.mxu0 %v5542_v9  ;;  %v6787_v9 = vld [vmem:[%s9606_s0 + $0x8] ss:$24 sps:$4 sm:$0xff]  }
  0x99   :  { %2651 = vmatpush1.bf16.msra.mxu1 %v5534_v10  ;;  %v5623_v10 = vld [vmem:[%s9605_s1 + $0x434] ss:$24 sps:$4 sm:$0xff]  }
  0x9a   :  { %2364 = vmatmul.mubr.bf16.gmra.mxu0 %v6585_v11  ;;  %2652 = vmatprep.subr.bf16.mxu1 %v5545_v26  ;;  %v5618_v26 = vld [vmem:[%s9605_s1 + $0x130] ss:$24 sps:$4 sm:$0xff]  }
  0x9b   :  { %2540 = vmatpush1.bf16.msra.mxu0 %v5540_v12  ;;  %2373 = vmatprep.mubr.bf16.mxu0 %v6596_v15  ;;  %v6799_v12 = vld [vmem:[%s9606_s0 + $0x3c] ss:$24 sps:$4 sm:$0xff]  }
  0x9c   :  { %2477 = vmatmul.mubr.bf16.gmra.mxu1 %v6254_v38  ;;  %2541 = vmatprep.subr.bf16.mxu0 %v5548_v32  ;;  %v5560_v38 = vld [vmem:[%s9605_s1 + $0x8dc] ss:$24 sps:$4 sm:$0xff]  }
  0x9d   :  { %2653 = vmatpush1.bf16.msra.mxu1 %v5543_v16  ;;  %2486 = vmatprep.mubr.bf16.mxu1 %v6274_v44  ;;  %v5563_v44 = vld [vmem:[%s9605_s1 + $0x5ac] ss:$24 sps:$4 sm:$0xff]   ;;  %v5621_v16 = vld [vmem:[%s9605_s1 + $0x430] ss:$24 sps:$4 sm:$0xff]  }
  0x9e   :  { %2654 = vmatprep.subr.bf16.mxu1 %v5551_v17  ;;  %v5626_v32 = vld [vmem:[%s9605_s1 + $0x104] ss:$24 sps:$4 sm:$0xff]  }
  0x9f   :  { %2542 = vmatpush1.bf16.msra.mxu0 %v5546_v18  ;;  %v5629_v17 = vld [vmem:[%s9605_s1 + $0x404] ss:$24 sps:$4 sm:$0xff]   ;;  %v5632_v18 = vld [vmem:[%s9605_s1 + $0xd4] ss:$24 sps:$4 sm:$0xff]  }
  0xa0   :  { %2543 = vmatprep.subr.bf16.mxu0 %v5557_v19  ;;  %v6825_v19 = vld [vmem:[%s9606_s0 + $0x38] ss:$24 sps:$4 sm:$0xff]  }
  0xa1   :  { %2655 = vmatpush1.bf16.msra.mxu1 %v5549_v22  ;;  %v5635_v22 = vld [vmem:[%s9605_s1 + $0x3d4] ss:$24 sps:$4 sm:$0xff]  }
  0xa2   :  { %2374 = vmatmul.mubr.bf16.gmra.mxu0 %v6623_v24  ;;  %2656 = vmatprep.subr.bf16.mxu1 %v5560_v38  ;;  %v5630_v38 = vld [vmem:[%s9605_s1 + $0xd0] ss:$24 sps:$4 sm:$0xff]  }
  0xa3   :  { %2544 = vmatpush2.bf16.msra.mxu0 %v5555_v25  ;;  %2383 = vmatprep.mubr.bf16.mxu0 %v6634_v27  ;;  %v6837_v25 = vld [vmem:[%s9606_s0 + $0x6c] ss:$24 sps:$4 sm:$0xff]  }
  0xa4   :  { %2487 = vmatmul.mubr.bf16.gmra.mxu1 %v6296_v51  ;;  %2545 = vmatprep.subr.bf16.mxu0 %v5563_v44  ;;  %v5575_v51 = vld [vmem:[%s9605_s1 + $0x87c] ss:$24 sps:$4 sm:$0xff]  }
  0xa5   :  { %2657 = vmatpush2.bf16.msra.mxu1 %v5558_v28  ;;  %2496 = vmatprep.mubr.bf16.mxu1 %v6316_v57  ;;  %v5578_v57 = vld [vmem:[%s9605_s1 + $0x54c] ss:$24 sps:$4 sm:$0xff]   ;;  %v5633_v28 = vld [vmem:[%s9605_s1 + $0x3d0] ss:$24 sps:$4 sm:$0xff]  }
  0xa6   :  { %2658 = vmatprep.subr.bf16.mxu1 %v5566_v30  ;;  %v5638_v44 = vld [vmem:[%s9605_s1 + $0xa4] ss:$24 sps:$4 sm:$0xff]  }
  0xa7   :  { %2546 = vmatpush2.bf16.msra.mxu0 %v5561_v31  ;;  %v5641_v30 = vld [vmem:[%s9605_s1 + $0x3a4] ss:$24 sps:$4 sm:$0xff]   ;;  %v5644_v31 = vld [vmem:[%s9605_s1 + $0x74] ss:$24 sps:$4 sm:$0xff]  }
  0xa8   :  { %2547 = vmatprep.subr.bf16.mxu0 %v5572_v35  ;;  %v6863_v35 = vld [vmem:[%s9606_s0 + $0x68] ss:$24 sps:$4 sm:$0xff]  }
  0xa9   :  { %2659 = vmatpush2.bf16.msra.mxu1 %v5564_v36  ;;  %v5647_v36 = vld [vmem:[%s9605_s1 + $0x374] ss:$24 sps:$4 sm:$0xff]  }
  0xaa   :  { %2384 = vmatmul.mubr.bf16.gmra.mxu0 %v6661_v37  ;;  %2660 = vmatprep.subr.bf16.mxu1 %v5575_v51  ;;  %v5642_v51 = vld [vmem:[%s9605_s1 + $0x70] ss:$24 sps:$4 sm:$0xff]  }
  0xab   :  { %2548 = vmatpush2.bf16.msra.mxu0 %v5570_v39  ;;  %2393 = vmatprep.mubr.bf16.mxu0 %v6672_v40  ;;  %v6875_v39 = vld [vmem:[%s9606_s0 + $0x9c] ss:$24 sps:$4 sm:$0xff]  }
  0xac   :  { %2497 = vmatmul.mubr.bf16.gmra.mxu1 %v6338_v63  ;;  %2549 = vmatprep.subr.bf16.mxu0 %v5578_v57  ;;  %v5590_v63 = vld [vmem:[%s9605_s1 + $0x81c] ss:$24 sps:$4 sm:$0xff]  }
  0xad   :  { %2661 = vmatpush2.bf16.msra.mxu1 %v5573_v41  ;;  %2506 = vmatprep.mubr.bf16.mxu1 %v6358_v6  ;;  %v5593_v6 = vld [vmem:[%s9605_s1 + $0x4ec] ss:$24 sps:$4 sm:$0xff]   ;;  %v5645_v41 = vld [vmem:[%s9605_s1 + $0x370] ss:$24 sps:$4 sm:$0xff]  }
  0xae   :  { %2662 = vmatprep.subr.bf16.mxu1 %v5581_v43  ;;  %v5650_v57 = vld [vmem:[%s9605_s1 + $0x44] ss:$24 sps:$4 sm:$0xff]  }
  0xaf   :  { %2550 = vmatpush2.bf16.msra.mxu0 %v5576_v45  ;;  %v5653_v43 = vld [vmem:[%s9605_s1 + $0x344] ss:$24 sps:$4 sm:$0xff]   ;;  %v5656_v45 = vld [vmem:[%s9605_s1 + $0x14] ss:$24 sps:$4 sm:$0xff]  }
  0xb0   :  { %2551 = vmatprep.subr.bf16.mxu0 %v5587_v47  ;;  %v6901_v47 = vld [vmem:[%s9606_s0 + $0x98] ss:$24 sps:$4 sm:$0xff]  }
  0xb1   :  { %2663 = vmatpush2.bf16.msra.mxu1 %v5579_v48  ;;  %v5659_v48 = vld [vmem:[%s9605_s1 + $0x314] ss:$24 sps:$4 sm:$0xff]  }
  0xb2   :  { %2394 = vmatmul.mubr.bf16.gmra.mxu0 %v6699_v49  ;;  %2664 = vmatprep.subr.bf16.mxu1 %v5590_v63  ;;  %v5654_v63 = vld [vmem:[%s9605_s1 + $0x10] ss:$24 sps:$4 sm:$0xff]  }
  0xb3   :  { %2552 = vmatpush2.bf16.msra.mxu0 %v5585_v50  ;;  %2403 = vmatprep.mubr.bf16.mxu0 %v6710_v52  ;;  %v6913_v50 = vld [vmem:[%s9606_s0 + $0xcc] ss:$24 sps:$4 sm:$0xff]  }
  0xb4   :  { %2507 = vmatmul.mubr.bf16.gmra.mxu1 %v6380_v13  ;;  %2553 = vmatprep.subr.bf16.mxu0 %v5593_v6  ;;  %v5605_v13 = vld [vmem:[%s9605_s1 + $0x7bc] ss:$24 sps:$4 sm:$0xff]  }
  0xb5   :  { %2665 = vmatpush2.bf16.msra.mxu1 %v5588_v53  ;;  %2516 = vmatprep.mubr.bf16.mxu1 %v6400_v21  ;;  %v5608_v21 = vld [vmem:[%s9605_s1 + $0x48c] ss:$24 sps:$4 sm:$0xff]   ;;  %v5657_v53 = vld [vmem:[%s9605_s1 + $0x310] ss:$24 sps:$4 sm:$0xff]  }
  0xb6   :  { %2666 = vmatprep.subr.bf16.mxu1 %v5596_v2  ;;  %v5662_v6 = vld [vmem:[%s9605_s1 + $0x2e4] ss:$24 sps:$4 sm:$0xff]  }
  0xb7   :  { %2554 = vmatpush2.bf16.msra.mxu0 %v5591_v55  ;;  %v5665_v2 = vld [vmem:[%s9605_s1 + $0x5e4] ss:$24 sps:$4 sm:$0xff]   ;;  %v5668_v55 = vld [vmem:[%s9605_s1 + $0x2b4] ss:$24 sps:$4 sm:$0xff]  }
  0xb8   :  { %2555 = vmatprep.subr.bf16.mxu0 %v5602_v8  ;;  %v6939_v8 = vld [vmem:[%s9606_s0 + $0xc8] ss:$24 sps:$4 sm:$0xff]  }
  0xb9   :  { %2667 = vmatpush2.bf16.msra.mxu1 %v5594_v58  ;;  %v5671_v58 = vld [vmem:[%s9605_s1 + $0x5b4] ss:$24 sps:$4 sm:$0xff]  }
  0xba   :  { %2404 = vmatmul.mubr.bf16.gmra.mxu0 %v6737_v59  ;;  %2668 = vmatprep.subr.bf16.mxu1 %v5605_v13  ;;  %v5666_v13 = vld [vmem:[%s9605_s1 + $0x2b0] ss:$24 sps:$4 sm:$0xff]  }
  0xbb   :  { %2556 = vmatpush2.bf16.msra.mxu0 %v5600_v60  ;;  %2559 = vmatprep.mubr.bf16.mxu0 %v6761_v1  ;;  %v6951_v60 = vld [vmem:[%s9606_s0 + $0xfc] ss:$24 sps:$4 sm:$0xff]  }
  0xbc   :  { %2517 = vmatmul.mubr.bf16.gmra.mxu1 %v6427_v29  ;;  %2557 = vmatprep.subr.bf16.mxu0 %v5608_v21  ;;  %v5612_v29 = vld [vmem:[%s9605_s1 + $0x160] ss:$24 sps:$4 sm:$0xff]   ;;  %v5674_v21 = vld [vmem:[%s9605_s1 + $0x284] ss:$24 sps:$4 sm:$0xff]  }
  0xbd   :  { %2669 = vmatpush2.bf16.msra.mxu1 %v5603_v61  ;;  %2672 = vmatprep.mubr.bf16.mxu1 %v6444_v34  ;;  %v5615_v34 = vld [vmem:[%s9605_s1 + $0x460] ss:$24 sps:$4 sm:$0xff]   ;;  %v5669_v61 = vld [vmem:[%s9605_s1 + $0x5b0] ss:$24 sps:$4 sm:$0xff]  }
  0xbe   :  { %2670 = vmatprep.subr.bf16.mxu1 %v5611_v62  ;;  %v5677_v62 = vld [vmem:[%s9605_s1 + $0x584] ss:$24 sps:$4 sm:$0xff]  }
  0xbf   :  { %2558 = vmatpush2.bf16.msra.mxu0 %v5606_v14  ;;  %v5680_v14 = vld [vmem:[%s9605_s1 + $0x254] ss:$24 sps:$4 sm:$0xff]  }
  0xc0   :  { %2753 = vmatprep.subr.bf16.mxu0 %v5614_v20  ;;  %v6977_v20 = vld [vmem:[%s9606_s0 + $0xf8] ss:$24 sps:$4 sm:$0xff]  }
  0xc1   :  { %2671 = vmatpush2.bf16.msra.mxu1 %v5609_v4  ;;  %v5683_v4 = vld [vmem:[%s9605_s1 + $0x554] ss:$24 sps:$4 sm:$0xff]  }
  0xc2   :  { %2560 = vmatmul.mubr.bf16.vlgmr.msra.gmra.mxu0 %v6787_v9  ;;  %2866 = vmatprep.subr.bf16.mxu1 %v5617_v5  ;;  %v5678_v5 = vld [vmem:[%s9605_s1 + $0x250] ss:$24 sps:$4 sm:$0xff]  }
  0xc3   :  { %2754 = vmatpush1.bf16.msra.mxu0 %v5612_v29  ;;  %2569 = vmatprep.mubr.bf16.mxu0 %v6799_v12  ;;  %v6989_v29 = vld [vmem:[%s9606_s0 + $0x12c] ss:$24 sps:$4 sm:$0xff]  }
  0xc4   :  { %2673 = vmatmul.mubr.bf16.vlgmr.msra.gmra.mxu1 %v6471_v42  ;;  %2755 = vmatprep.subr.bf16.mxu0 %v5620_v7  ;;  %v5624_v42 = vld [vmem:[%s9605_s1 + $0x100] ss:$24 sps:$4 sm:$0xff]   ;;  %v5686_v7 = vld [vmem:[%s9605_s1 + $0x224] ss:$24 sps:$4 sm:$0xff]  }
  0xc5   :  { %2867 = vmatpush1.bf16.msra.mxu1 %v5615_v34  ;;  %2682 = vmatprep.mubr.bf16.mxu1 %v6482_v46  ;;  %v5627_v46 = vld [vmem:[%s9605_s1 + $0x400] ss:$24 sps:$4 sm:$0xff]   ;;  %v5681_v34 = vld [vmem:[%s9605_s1 + $0x550] ss:$24 sps:$4 sm:$0xff]  }
  0xc6   :  { %2868 = vmatprep.subr.bf16.mxu1 %v5623_v10  ;;  %v5689_v10 = vld [vmem:[%s9605_s1 + $0x524] ss:$24 sps:$4 sm:$0xff]  }
  0xc7   :  { %2756 = vmatpush1.bf16.msra.mxu0 %v5618_v26  ;;  %v5692_v26 = vld [vmem:[%s9605_s1 + $0x1f4] ss:$24 sps:$4 sm:$0xff]  }
  0xc8   :  { %2757 = vmatprep.subr.bf16.mxu0 %v5626_v32  ;;  %v7015_v32 = vld [vmem:[%s9606_s0 + $0x128] ss:$24 sps:$4 sm:$0xff]  }
  0xc9   :  { %2869 = vmatpush1.bf16.msra.mxu1 %v5621_v16  ;;  %v5695_v16 = vld [vmem:[%s9605_s1 + $0x4f4] ss:$24 sps:$4 sm:$0xff]  }
  0xca   :  { %2570 = vmatmul.mubr.bf16.gmra.mxu0 %v6825_v19  ;;  %2870 = vmatprep.subr.bf16.mxu1 %v5629_v17  ;;  %v5690_v17 = vld [vmem:[%s9605_s1 + $0x1f0] ss:$24 sps:$4 sm:$0xff]  }
  0xcb   :  { %2758 = vmatpush1.bf16.msra.mxu0 %v5624_v42  ;;  %2579 = vmatprep.mubr.bf16.mxu0 %v6837_v25  ;;  %v365_v42 = vlaneseq }
  0xcc   :  { %2683 = vmatmul.mubr.bf16.gmra.mxu1 %v6509_v54  ;;  %2759 = vmatprep.subr.bf16.mxu0 %v5632_v18  ;;  %v5636_v54 = vld [vmem:[%s9605_s1 + $0xa0] ss:$24 sps:$4 sm:$0xff]   ;;  %v5698_v18 = vld [vmem:[%s9605_s1 + $0x1c4] ss:$24 sps:$4 sm:$0xff]  }
  0xcd   :  { %2871 = vmatpush1.bf16.msra.mxu1 %v5627_v46  ;;  %2692 = vmatprep.mubr.bf16.mxu1 %v6520_v56  ;;  %v5639_v56 = vld [vmem:[%s9605_s1 + $0x3a0] ss:$24 sps:$4 sm:$0xff]   ;;  %v5693_v46 = vld [vmem:[%s9605_s1 + $0x4f0] ss:$24 sps:$4 sm:$0xff]  }
  0xce   :  { %2872 = vmatprep.subr.bf16.mxu1 %v5635_v22  ;;  %v7039_v22 = vshrl.u32 %v365_v42, 7 }
  0xcf   :  { %2760 = vmatpush1.bf16.msra.mxu0 %v5630_v38  ;;  %v5704_v38 = vld [vmem:[%s9605_s1 + $0x194] ss:$24 sps:$4 sm:$0xff]  }
  0xd0   :  { %2761 = vmatprep.subr.bf16.mxu0 %v5638_v44  ;;  %v5707_v44 = vld [vmem:[%s9605_s1 + $0x494] ss:$24 sps:$4 sm:$0xff]  }
  0xd1   :  { %2873 = vmatpush1.bf16.msra.mxu1 %v5633_v28  ;;  %v5702_v28 = vld [vmem:[%s9605_s1 + $0x190] ss:$24 sps:$4 sm:$0xff]  }
  0xd2   :  { %2580 = vmatmul.mubr.bf16.gmra.mxu0 %v6863_v35  ;;  %2874 = vmatprep.subr.bf16.mxu1 %v5641_v30  ;;  %v5850_v30 = vld [vmem:[%s9606_s0 + $0x4] ss:$24 sps:$4 sm:$0xff]  }
  0xd3   :  { %2762 = vmatpush1.bf16.msra.mxu0 %v5636_v54  ;;  %2589 = vmatprep.mubr.bf16.mxu0 %v6875_v39  ;;  %v7058_v54 = vsub.s32 0, %v7039_v22 }
  0xd4   :  { %2693 = vmatmul.mubr.bf16.gmra.mxu1 %v6547_v0  ;;  %2763 = vmatprep.subr.bf16.mxu0 %v5644_v31  ;;  %v5648_v0 = vld [vmem:[%s9605_s1 + $0x40] ss:$24 sps:$4 sm:$0xff]   ;;  %v5710_v31 = vld [vmem:[%s9605_s1 + $0x764] ss:$24 sps:$4 sm:$0xff]  }
  0xd5   :  { %2875 = vmatpush1.bf16.msra.mxu1 %v5639_v56  ;;  %2702 = vmatprep.mubr.bf16.mxu1 %v6558_v3  ;;  %v5651_v3 = vld [vmem:[%s9605_s1 + $0x340] ss:$24 sps:$4 sm:$0xff]   ;;  %9746 = vst [vmem:[#allocation2_spill] sm:$0xff] %v7058_v54  ;;  %v5705_v56 = vld [vmem:[%s9605_s1 + $0x490] ss:$24 sps:$4 sm:$0xff]  }
  0xd6   :  { %2876 = vmatprep.subr.bf16.mxu1 %v5647_v36  ;;  %v7074_v36 = vsub.s32 1, %v7039_v22 }
  0xd7   :  { %2764 = vmatpush1.bf16.msra.mxu0 %v5642_v51  ;;  %v5708_v51 = vld [vmem:[%s9605_s1 + $0x760] ss:$24 sps:$4 sm:$0xff]  }
  0xd8   :  { %2765 = vmatprep.subr.bf16.mxu0 %v5650_v57  ;;  %9747 = vst [vmem:[#allocation3_spill] sm:$0xff] %v7074_v36  ;;  %v5713_v57 = vld [vmem:[%s9605_s1 + $0x734] ss:$24 sps:$4 sm:$0xff]  }
  0xd9   :  { %2877 = vmatpush1.bf16.msra.mxu1 %v5645_v41 }
  0xda   :  { %2590 = vmatmul.mubr.bf16.gmra.mxu0 %v6901_v47  ;;  %2878 = vmatprep.subr.bf16.mxu1 %v5653_v43  ;;  %v5851_v43 = vld [vmem:[%s9606_s0] ss:$24 sps:$4 sm:$0xff]  }
  0xdb   :  { %2766 = vmatpush1.bf16.msra.mxu0 %v5648_v0  ;;  %2599 = vmatprep.mubr.bf16.mxu0 %v6913_v50 }
  0xdc   :  { %2703 = vmatmul.mubr.bf16.gmra.mxu1 %v6585_v11  ;;  %2767 = vmatprep.subr.bf16.mxu0 %v5656_v45  ;;  %v5660_v11 = vld [vmem:[%s9605_s1 + $0x2e0] ss:$24 sps:$4 sm:$0xff]   ;;  %v5711_v45 = vld [vmem:[%s9605_s1 + $0x730] ss:$24 sps:$4 sm:$0xff]  }
  0xdd   :  { %2879 = vmatpush1.bf16.msra.mxu1 %v5651_v3  ;;  %2712 = vmatprep.mubr.bf16.mxu1 %v6596_v15  ;;  %v5663_v15 = vld [vmem:[%s9605_s1 + $0x5e0] ss:$24 sps:$4 sm:$0xff]   ;;  %v5852_v3 = vld [vmem:[%s9606_s0 + $0x34] ss:$24 sps:$4 sm:$0xff]  }
  0xde   :  { %2880 = vmatprep.subr.bf16.mxu1 %v5659_v48 }
  0xdf   :  { %2768 = vmatpush1.bf16.msra.mxu0 %v5654_v63 }
  0xe0   :  { %2769 = vmatprep.subr.bf16.mxu0 %v5662_v6  ;;  %v5716_v6 = vld [vmem:[%s9605_s1 + $0x704] ss:$24 sps:$4 sm:$0xff]  }
  0xe1   :  { %2881 = vmatpush1.bf16.msra.mxu1 %v5657_v53 }
  0xe2   :  { %2600 = vmatmul.mubr.bf16.gmra.mxu0 %v6939_v8  ;;  %2882 = vmatprep.subr.bf16.mxu1 %v5665_v2 }
  0xe3   :  { %2770 = vmatpush2.bf16.msra.mxu0 %v5660_v11  ;;  %2609 = vmatprep.mubr.bf16.mxu0 %v6951_v60 }
  0xe4   :  { %2713 = vmatmul.mubr.bf16.gmra.mxu1 %v6623_v24  ;;  %2771 = vmatprep.subr.bf16.mxu0 %v5668_v55  ;;  %v5672_v24 = vld [vmem:[%s9605_s1 + $0x280] ss:$24 sps:$4 sm:$0xff]  }
  0xe5   :  { %2883 = vmatpush2.bf16.msra.mxu1 %v5663_v15  ;;  %2722 = vmatprep.mubr.bf16.mxu1 %v6634_v27  ;;  %v5675_v27 = vld [vmem:[%s9605_s1 + $0x580] ss:$24 sps:$4 sm:$0xff]  }
  0xe6   :  { %2884 = vmatprep.subr.bf16.mxu1 %v5671_v58 }
  0xe7   :  { %2772 = vmatpush2.bf16.msra.mxu0 %v5666_v13 }
  0xe8   :  { %2773 = vmatprep.subr.bf16.mxu0 %v5674_v21 }
  0xe9   :  { %2885 = vmatpush2.bf16.msra.mxu1 %v5669_v61  ;;  %v5719_v61 = vld [vmem:[%s9605_s1 + $0x6d4] ss:$24 sps:$4 sm:$0xff]  }
  0xea   :  { %2610 = vmatmul.mubr.bf16.gmra.mxu0 %v6977_v20  ;;  %2886 = vmatprep.subr.bf16.mxu1 %v5677_v62 }
  0xeb   :  { %2774 = vmatpush2.bf16.msra.mxu0 %v5672_v24  ;;  %2619 = vmatprep.mubr.bf16.mxu0 %v6989_v29 }
  0xec   :  { %2723 = vmatmul.mubr.bf16.gmra.mxu1 %v6661_v37  ;;  %2775 = vmatprep.subr.bf16.mxu0 %v5680_v14  ;;  %v5684_v37 = vld [vmem:[%s9605_s1 + $0x220] ss:$24 sps:$4 sm:$0xff]  }
  0xed   :  { %2887 = vmatpush2.bf16.msra.mxu1 %v5675_v27  ;;  %2732 = vmatprep.mubr.bf16.mxu1 %v6672_v40  ;;  %v5687_v40 = vld [vmem:[%s9605_s1 + $0x520] ss:$24 sps:$4 sm:$0xff]   ;;  %v5853_v27 = vld [vmem:[%s9606_s0 + $0x30] ss:$24 sps:$4 sm:$0xff]  }
  0xee   :  { %2888 = vmatprep.subr.bf16.mxu1 %v5683_v4 }
  0xef   :  { %2776 = vmatpush2.bf16.msra.mxu0 %v5678_v5 }
  0xf0   :  { %2777 = vmatprep.subr.bf16.mxu0 %v5686_v7  ;;  %v5717_v7 = vld [vmem:[%s9605_s1 + $0x6d0] ss:$24 sps:$4 sm:$0xff]  }
  0xf1   :  { %2889 = vmatpush2.bf16.msra.mxu1 %v5681_v34  ;;  %v5854_v34 = vld [vmem:[%s9606_s0 + $0x64] ss:$24 sps:$4 sm:$0xff]  }
  0xf2   :  { %2620 = vmatmul.mubr.bf16.gmra.mxu0 %v7015_v32  ;;  %2890 = vmatprep.subr.bf16.mxu1 %v5689_v10 }
  0xf3   :  { %2778 = vmatpush2.bf16.msra.mxu0 %v5684_v37  ;;  %2629 = vmatprep.mubr.bf16.mxu0 %v6408_v23  ;;  %v5701_v23 = vld [vmem:[%s9605_s1 + $0x4c4] ss:$24 sps:$4 sm:$0xff]  }
  0xf4   :  { %2733 = vmatmul.mubr.bf16.gmra.mxu1 %v6699_v49  ;;  %2779 = vmatprep.subr.bf16.mxu0 %v5692_v26  ;;  %v5696_v49 = vld [vmem:[%s9605_s1 + $0x1c0] ss:$24 sps:$4 sm:$0xff]   ;;  %v5722_v26 = vld [vmem:[%s9605_s1 + $0x6a4] ss:$24 sps:$4 sm:$0xff]  }
  0xf5   :  { %2891 = vmatpush2.bf16.msra.mxu1 %v5687_v40  ;;  %2742 = vmatprep.mubr.bf16.mxu1 %v6710_v52  ;;  %v5699_v52 = vld [vmem:[%s9605_s1 + $0x4c0] ss:$24 sps:$4 sm:$0xff]  }
  0xf6   :  { %2892 = vmatprep.subr.bf16.mxu1 %v5695_v16 }
  0xf7   :  { %2780 = vmatpush2.bf16.msra.mxu0 %v5690_v17 }
  0xf8   :  { %2781 = vmatprep.subr.bf16.mxu0 %v5698_v18 }
  0xf9   :  { %2893 = vmatpush2.bf16.msra.mxu1 %v5693_v46 }
  0xfa   :  { %2630 = vmatmul.mubr.bf16.gmra.mxu0 %v6439_v33  ;;  %2894 = vmatprep.subr.bf16.mxu1 %v5701_v23  ;;  %v7064_v33 = vld [vmem:[%s9607_s2] sm:$0x3f] }
  0xfb   :  { %2782 = vmatpush2.bf16.msra.mxu0 %v5696_v49  ;;  %2785 = vmatprep.mubr.bf16.mxu0 %v5850_v30  ;;  %v5855_v30 = vld [vmem:[%s9606_s0 + $0x60] ss:$24 sps:$4 sm:$0xff]  }
  0xfc   :  { %2743 = vmatmul.mubr.bf16.gmra.mxu1 %v6737_v59  ;;  %2783 = vmatprep.subr.bf16.mxu0 %v5704_v38  ;;  %v7078_v59 = vrot.slane %v7064_v33, %v7058_v54  ;;  %v5725_v38 = vld [vmem:[%s9605_s1 + $0x674] ss:$24 sps:$4 sm:$0xff]  }
  0xfd   :  { %2895 = vmatpush2.bf16.msra.mxu1 %v5699_v52  ;;  %2898 = vmatprep.mubr.bf16.mxu1 %v6761_v1  ;;  %v7088_v1 = vrot.slane %v7064_v33, %v7074_v36 }
  0xfe   :  { %2896 = vmatprep.subr.bf16.mxu1 %v5707_v44 }
  0xff   :  { %2784 = vmatpush2.bf16.msra.mxu0 %v5702_v28  ;;  %9748 = vst [vmem:[#allocation4_spill] sm:$0xff] %v7088_v1 }
 0x100   :  { %2979 = vmatprep.subr.bf16.mxu0 %v5710_v31 }
 0x101   :  { %2897 = vmatpush2.bf16.msra.mxu1 %v5705_v56 }
 0x102   :  { %v2109_v41 = vpop.f32.mrf.mxu0  ;;  %2786 = vmatmul.mubr.bf16.vlgmr.msra.gmra.mxu0 %v5851_v43 }
 0x103   :  { %v2110_v0 = vadd.f32 %v2109_v41, %v7078_v59  ;;  %2980 = vmatpush1.bf16.msra.mxu0 %v5708_v51  ;;  %2795 = vmatprep.mubr.bf16.mxu0 %v5852_v3  ;;  %v5723_v51 = vld [vmem:[%s9605_s1 + $0x670] ss:$24 sps:$4 sm:$0xff]  }
 0x104   :  { %v2111_v48 = vpop.f32.mrf.mxu0  ;;  %v2222_v63 = vpop.f32.mrf.mxu1  ;;  %2899 = vmatmul.mubr.bf16.vlgmr.msra.gmra.mxu1 %v6787_v9  ;;  %2981 = vmatprep.subr.bf16.mxu0 %v5713_v57  ;;  %v5714_v9 = vld [vmem:[%s9605_s1 + $0x700] ss:$24 sps:$4 sm:$0xff]   ;;  %v5856_v57 = vld [vmem:[%s9606_s0 + $0x94] ss:$24 sps:$4 sm:$0xff]  }
 0x105   :  { %v2112_v53 = vadd.f32 %v2111_v48, %v7088_v1  ;;  %v7105_v2 = vadd.f32 %v2222_v63, %v2110_v0  ;;  %2908 = vmatprep.mubr.bf16.mxu1 %v6799_v12  ;;  %v5728_v0 = vld [vmem:[%s9605_s1 + $0x644] ss:$24 sps:$4 sm:$0xff]  }
 0x106   :  { %v2113_v11 = vpop.f32.mrf.mxu0  ;;  %v2224_v55 = vpop.f32.mrf.mxu1 }
 0x107   :  { %v2114_v15 = vadd.f32 %v2113_v11, %v7078_v59  ;;  %v7109_v58 = vadd.f32 %v2224_v55, %v2112_v53  ;;  %2982 = vmatpush1.bf16.msra.mxu0 %v5711_v45 }
 0x108   :  { %v2115_v13 = vpop.f32.mrf.mxu0  ;;  %v2226_v21 = vpop.f32.mrf.mxu1  ;;  %2983 = vmatprep.subr.bf16.mxu0 %v5716_v6 }
 0x109   :  { %v2116_v12 = vadd.f32 %v2115_v13, %v7088_v1  ;;  %v7118_v62 = vadd.f32 %v2226_v21, %v2114_v15  ;;  %v5731_v15 = vld [vmem:[%s9605_s1 + $0x614] ss:$24 sps:$4 sm:$0xff]  }
 0x10a   :  { %v2119_v24 = vpop.f32.mrf.mxu0  ;;  %v2228_v14 = vpop.f32.mrf.mxu1  ;;  %2796 = vmatmul.mubr.bf16.gmra.mxu0 %v5853_v27  ;;  %v5858_v27 = vld [vmem:[%s9606_s0 + $0xc4] ss:$24 sps:$4 sm:$0xff]  }
 0x10b   :  { %v2120_v4 = vadd.f32 %v2119_v24, %v7078_v59  ;;  %v7124_v5 = vadd.f32 %v2228_v14, %v2116_v12  ;;  %2984 = vmatpush1.bf16.msra.mxu0 %v5714_v9  ;;  %2805 = vmatprep.mubr.bf16.mxu0 %v5854_v34  ;;  %v5729_v14 = vld [vmem:[%s9605_s1 + $0x610] ss:$24 sps:$4 sm:$0xff]   ;;  %v5734_v34 = vld [vmem:[%s9605_s1 + $0x8e4] ss:$24 sps:$4 sm:$0xff]  }
 0x10c   :  { %v2121_v10 = vpop.f32.mrf.mxu0  ;;  %v2232_v37 = vpop.f32.mrf.mxu1  ;;  %2909 = vmatmul.mubr.bf16.gmra.mxu1 %v6825_v19  ;;  %2985 = vmatprep.subr.bf16.mxu0 %v5719_v61  ;;  %v5720_v19 = vld [vmem:[%s9605_s1 + $0x6a0] ss:$24 sps:$4 sm:$0xff]   ;;  %v5857_v61 = vld [vmem:[%s9606_s0 + $0x90] ss:$24 sps:$4 sm:$0xff]  }
 0x10d   :  { %v2122_v40 = vadd.f32 %v2121_v10, %v7088_v1  ;;  %v7137_v16 = vadd.f32 %v2232_v37, %v2120_v4  ;;  %2918 = vmatprep.mubr.bf16.mxu1 %v6837_v25 }
 0x10e   :  { %v2123_v17 = vpop.f32.mrf.mxu0  ;;  %v2234_v42 = vpop.f32.mrf.mxu1 }
 0x10f   :  { %v2124_v18 = vadd.f32 %v2123_v17, %v7078_v59  ;;  %v7141_v46 = vadd.f32 %v2234_v42, %v2122_v40  ;;  %2986 = vmatpush1.bf16.msra.mxu0 %v5717_v7 }
 0x110   :  { %v2125_v23 = vpop.f32.mrf.mxu0  ;;  %v2236_v49 = vpop.f32.mrf.mxu1  ;;  %2987 = vmatprep.subr.bf16.mxu0 %v5722_v26 }
 0x111   :  { %v2126_v25 = vadd.f32 %v2125_v23, %v7088_v1  ;;  %v7150_v52 = vadd.f32 %v2236_v49, %v2124_v18  ;;  %v5737_v23 = vld [vmem:[%s9605_s1 + $0x8b4] ss:$24 sps:$4 sm:$0xff]  }
 0x112   :  { %v2129_v44 = vpop.f32.mrf.mxu0  ;;  %v2238_v28 = vpop.f32.mrf.mxu1  ;;  %2806 = vmatmul.mubr.bf16.gmra.mxu0 %v5855_v30 }
 0x113   :  { %v2130_v31 = vadd.f32 %v2129_v44, %v7078_v59  ;;  %v7156_v56 = vadd.f32 %v2238_v28, %v2126_v25  ;;  %2988 = vmatpush1.bf16.msra.mxu0 %v5720_v19  ;;  %2815 = vmatprep.mubr.bf16.mxu0 %v5856_v57  ;;  %v5859_v44 = vld [vmem:[%s9606_s0 + $0xc0] ss:$24 sps:$4 sm:$0xff]  }
 0x114   :  { %v2131_v41 = vpop.f32.mrf.mxu0  ;;  %v2242_v43 = vpop.f32.mrf.mxu1  ;;  %2919 = vmatmul.mubr.bf16.gmra.mxu1 %v6863_v35  ;;  %2989 = vmatprep.subr.bf16.mxu0 %v5725_v38  ;;  %v5726_v35 = vld [vmem:[%s9605_s1 + $0x640] ss:$24 sps:$4 sm:$0xff]  }
 0x115   :  { %v2132_v45 = vadd.f32 %v2131_v41, %v7088_v1  ;;  %v7169_v3 = vadd.f32 %v2242_v43, %v2130_v31  ;;  %2928 = vmatprep.mubr.bf16.mxu1 %v6875_v39  ;;  %v5735_v31 = vld [vmem:[%s9605_s1 + $0x8b0] ss:$24 sps:$4 sm:$0xff]   ;;  %v5740_v43 = vld [vmem:[%s9605_s1 + $0x884] ss:$24 sps:$4 sm:$0xff]  }
 0x116   :  { %v2133_v48 = vpop.f32.mrf.mxu0  ;;  %v2244_v63 = vpop.f32.mrf.mxu1 }
 0x117   :  { %v2134_v6 = vadd.f32 %v2133_v48, %v7078_v59  ;;  %v7173_v53 = vadd.f32 %v2244_v63, %v2132_v45  ;;  %2990 = vmatpush1.bf16.msra.mxu0 %v5723_v51  ;;  %v5860_v51 = vld [vmem:[%s9606_s0 + $0xf4] ss:$24 sps:$4 sm:$0xff]  }
 0x118   :  { %v2135_v11 = vpop.f32.mrf.mxu0  ;;  %v2246_v55 = vpop.f32.mrf.mxu1  ;;  %2991 = vmatprep.subr.bf16.mxu0 %v5728_v0 }
 0x119   :  { %v2136_v39 = vadd.f32 %v2135_v11, %v7088_v1  ;;  %v7182_v9 = vadd.f32 %v2246_v55, %v2134_v6 }
 0x11a   :  { %v2139_v13 = vpop.f32.mrf.mxu0  ;;  %v2248_v21 = vpop.f32.mrf.mxu1  ;;  %2816 = vmatmul.mubr.bf16.gmra.mxu0 %v5857_v61 }
 0x11b   :  { %v2140_v12 = vadd.f32 %v2139_v13, %v7078_v59  ;;  %v7188_v24 = vadd.f32 %v2248_v21, %v2136_v39  ;;  %2992 = vmatpush1.bf16.msra.mxu0 %v5726_v35  ;;  %2825 = vmatprep.mubr.bf16.mxu0 %v5858_v27  ;;  %v5861_v21 = vld [vmem:[%s9606_s0 + $0xf0] ss:$24 sps:$4 sm:$0xff]  }
 0x11c   :  { %v2141_v4 = vpop.f32.mrf.mxu0  ;;  %v2252_v7 = vpop.f32.mrf.mxu1  ;;  %2929 = vmatmul.mubr.bf16.gmra.mxu1 %v6901_v47  ;;  %2993 = vmatprep.subr.bf16.mxu0 %v5731_v15  ;;  %v5732_v47 = vld [vmem:[%s9605_s1 + $0x8e0] ss:$24 sps:$4 sm:$0xff]   ;;  %v5743_v15 = vld [vmem:[%s9605_s1 + $0x854] ss:$24 sps:$4 sm:$0xff]  }
 0x11d   :  { %v2142_v10 = vadd.f32 %v2141_v4, %v7088_v1  ;;  %v7201_v37 = vadd.f32 %v2252_v7, %v2140_v12  ;;  %2938 = vmatprep.mubr.bf16.mxu1 %v6913_v50  ;;  %v5741_v12 = vld [vmem:[%s9605_s1 + $0x850] ss:$24 sps:$4 sm:$0xff]   ;;  %v5746_v7 = vld [vmem:[%s9605_s1 + $0x824] ss:$24 sps:$4 sm:$0xff]  }
 0x11e   :  { %v2143_v26 = vpop.f32.mrf.mxu0  ;;  %v2254_v40 = vpop.f32.mrf.mxu1 }
 0x11f   :  { %v2144_v17 = vadd.f32 %v2143_v26, %v7078_v59  ;;  %v7205_v42 = vadd.f32 %v2254_v40, %v2142_v10  ;;  %2994 = vmatpush1.bf16.msra.mxu0 %v5729_v14  ;;  %v5862_v14 = vld [vmem:[%s9606_s0 + $0x124] ss:$24 sps:$4 sm:$0xff]  }
 0x120   :  { %v2145_v18 = vpop.f32.mrf.mxu0  ;;  %v2256_v19 = vpop.f32.mrf.mxu1  ;;  %2995 = vmatprep.subr.bf16.mxu0 %v5734_v34 }
 0x121   :  { %v2146_v50 = vadd.f32 %v2145_v18, %v7088_v1  ;;  %v7214_v49 = vadd.f32 %v2256_v19, %v2144_v17 }
 0x122   :  { %v2149_v38 = vpop.f32.mrf.mxu0  ;;  %v2258_v25 = vpop.f32.mrf.mxu1  ;;  %2826 = vmatmul.mubr.bf16.gmra.mxu0 %v5859_v44 }
 0x123   :  { %v2150_v28 = vadd.f32 %v2149_v38, %v7078_v59  ;;  %v7220_v30 = vadd.f32 %v2258_v25, %v2146_v50  ;;  %2996 = vmatpush2.bf16.msra.mxu0 %v5732_v47  ;;  %2835 = vmatprep.mubr.bf16.mxu0 %v5860_v51  ;;  %v5863_v25 = vld [vmem:[%s9606_s0 + $0x120] ss:$24 sps:$4 sm:$0xff]  }
 0x124   :  { %v2151_v57 = vpop.f32.mrf.mxu0  ;;  %v2262_v41 = vpop.f32.mrf.mxu1  ;;  %2939 = vmatmul.mubr.bf16.gmra.mxu1 %v6939_v8  ;;  %2997 = vmatprep.subr.bf16.mxu0 %v5737_v23  ;;  %v5738_v8 = vld [vmem:[%s9605_s1 + $0x880] ss:$24 sps:$4 sm:$0xff]   ;;  %v5749_v23 = vld [vmem:[%s9605_s1 + $0x7f4] ss:$24 sps:$4 sm:$0xff]  }
 0x125   :  { %v2152_v0 = vadd.f32 %v2151_v57, %v7088_v1  ;;  %v7233_v45 = vadd.f32 %v2262_v41, %v2150_v28  ;;  %2948 = vmatprep.mubr.bf16.mxu1 %v6951_v60  ;;  %v5747_v28 = vld [vmem:[%s9605_s1 + $0x7f0] ss:$24 sps:$4 sm:$0xff]   ;;  %v5752_v41 = vld [vmem:[%s9605_s1 + $0x7c4] ss:$24 sps:$4 sm:$0xff]  }
 0x126   :  { %v2153_v48 = vpop.f32.mrf.mxu0  ;;  %v2264_v63 = vpop.f32.mrf.mxu1 }
 0x127   :  { %v2154_v6 = vadd.f32 %v2153_v48, %v7078_v59  ;;  %v7237_v35 = vadd.f32 %v2264_v63, %v2152_v0  ;;  %2998 = vmatpush2.bf16.msra.mxu0 %v5735_v31  ;;  %v5864_v31 = vld [vmem:[%s9606_s0 + $0x154] ss:$24 sps:$4 sm:$0xff]  }
 0x128   :  { %v7242_v11 = vpop.f32.mrf.mxu0  ;;  %v2266_v55 = vpop.f32.mrf.mxu1  ;;  %2999 = vmatprep.subr.bf16.mxu0 %v5740_v43  ;;  %v5865_v48 = vld [vmem:[%s9606_s0 + $0x15c] ss:$24 sps:$4 sm:$0xff]  }
 0x129   :  { %9749 = vst [vmem:[#allocation5_spill] sm:$0xff] %v7242_v11  ;;  %v7247_v60 = vadd.f32 %v2266_v55, %v2154_v6 }
 0x12a   :  { %v2159_v39 = vpop.f32.mrf.mxu0  ;;  %v7249_v13 = vpop.f32.mrf.mxu1  ;;  %2836 = vmatmul.mubr.bf16.gmra.mxu0 %v5861_v21  ;;  %v5755_v21 = vld [vmem:[%s9605_s1 + $0x794] ss:$24 sps:$4 sm:$0xff]  }
 0x12b   :  { %9750 = vst [vmem:[#allocation6_spill] sm:$0xff] %v7249_v13  ;;  %v2160_v61 = vadd.f32 %v2159_v39, %v7078_v59  ;;  %3000 = vmatpush2.bf16.msra.mxu0 %v5738_v8  ;;  %2845 = vmatprep.mubr.bf16.mxu0 %v5862_v14 }
 0x12c   :  { %v2161_v27 = vpop.f32.mrf.mxu0  ;;  %v2272_v4 = vpop.f32.mrf.mxu1  ;;  %2949 = vmatmul.mubr.bf16.gmra.mxu1 %v6977_v20  ;;  %3001 = vmatprep.subr.bf16.mxu0 %v5743_v15  ;;  %v5744_v20 = vld [vmem:[%s9605_s1 + $0x820] ss:$24 sps:$4 sm:$0xff]  }
 0x12d   :  { %v2162_v34 = vadd.f32 %v2161_v27, %v7088_v1  ;;  %v7266_v10 = vadd.f32 %v2272_v4, %v2160_v61  ;;  %2958 = vmatprep.mubr.bf16.mxu1 %v6989_v29  ;;  %v5866_v27 = vld [vmem:[%s9606_s0 + $0x150] ss:$24 sps:$4 sm:$0xff]  }
 0x12e   :  { %v2163_v26 = vpop.f32.mrf.mxu0  ;;  %v2274_v40 = vpop.f32.mrf.mxu1 }
 0x12f   :  { %v2164_v17 = vadd.f32 %v2163_v26, %v7078_v59  ;;  %v7270_v47 = vadd.f32 %v2274_v40, %v2162_v34  ;;  %3002 = vmatpush2.bf16.msra.mxu0 %v5741_v12  ;;  %v5867_v34 = vld [vmem:[%s9606_s0 + $0x14] ss:$24 sps:$4 sm:$0xff]  }
 0x130   :  { %v7275_v18 = vpop.f32.mrf.mxu0  ;;  %v2276_v19 = vpop.f32.mrf.mxu1  ;;  %3003 = vmatprep.subr.bf16.mxu0 %v5746_v7  ;;  %v5753_v7 = vld [vmem:[%s9605_s1 + $0x790] ss:$24 sps:$4 sm:$0xff]  }
 0x131   :  { %9751 = vst [vmem:[#allocation7_spill] sm:$0xff] %v7275_v18  ;;  %v7280_v29 = vadd.f32 %v2276_v19, %v2164_v17  ;;  %v5868_v17 = vld [vmem:[%s9606_s0 + $0x158] ss:$24 sps:$4 sm:$0xff]  }
 0x132   :  { %v2169_v50 = vpop.f32.mrf.mxu0  ;;  %v7282_v38 = vpop.f32.mrf.mxu1  ;;  %2846 = vmatmul.mubr.bf16.gmra.mxu0 %v5863_v25 }
 0x133   :  { %9752 = vst [vmem:[#allocation8_spill] sm:$0xff] %v7282_v38  ;;  %v2170_v44 = vadd.f32 %v2169_v50, %v7078_v59  ;;  %3004 = vmatpush2.bf16.msra.mxu0 %v5744_v20  ;;  %2855 = vmatprep.mubr.bf16.mxu0 %v5864_v31 }
 0x134   :  { %v2171_v51 = vpop.f32.mrf.mxu0  ;;  %v2282_v57 = vpop.f32.mrf.mxu1  ;;  %2959 = vmatmul.mubr.bf16.gmra.mxu1 %v7015_v32  ;;  %3005 = vmatprep.subr.bf16.mxu0 %v5749_v23  ;;  %v5750_v32 = vld [vmem:[%s9605_s1 + $0x7c0] ss:$24 sps:$4 sm:$0xff]  }
 0x135   :  { %v2172_v43 = vadd.f32 %v2171_v51, %v7088_v1  ;;  %v7299_v0 = vadd.f32 %v2282_v57, %v2170_v44  ;;  %2968 = vmatprep.mubr.bf16.mxu1 %v5865_v48 }
 0x136   :  { %v2173_v63 = vpop.f32.mrf.mxu0  ;;  %v2284_v6 = vpop.f32.mrf.mxu1 }
 0x137   :  { %v2174_v8 = vadd.f32 %v2173_v63, %v7078_v59  ;;  %v7305_v55 = vadd.f32 %v2284_v6, %v2172_v43  ;;  %3006 = vmatpush2.bf16.msra.mxu0 %v5747_v28  ;;  %v5869_v43 = vld [vmem:[%s9606_s0 + $0x10] ss:$24 sps:$4 sm:$0xff]  }
 0x138   :  { %v7310_v15 = vpop.f32.mrf.mxu0  ;;  %v2286_v39 = vpop.f32.mrf.mxu1  ;;  %3007 = vmatprep.subr.bf16.mxu0 %v5752_v41 }
 0x139   :  { %9753 = vst [vmem:[#allocation9_spill] sm:$0xff] %v7310_v15  ;;  %v7315_v61 = vadd.f32 %v2286_v39, %v2174_v8 }
 0x13a   :  { %v2179_v12 = vpop.f32.mrf.mxu0  ;;  %v7317_v14 = vpop.f32.mrf.mxu1  ;;  %2856 = vmatmul.mubr.bf16.gmra.mxu0 %v5866_v27 }
 0x13b   :  { %9754 = vst [vmem:[#allocation10_spill] sm:$0xff] %v7317_v14  ;;  %v2180_v4 = vadd.f32 %v2179_v12, %v7078_v59  ;;  %3008 = vmatpush2.bf16.msra.mxu0 %v5750_v32  ;;  %3011 = vmatprep.mubr.bf16.mxu0 %v5867_v34 }
 0x13c   :  { %v2181_v26 = vpop.f32.mrf.mxu0  ;;  %v2292_v40 = vpop.f32.mrf.mxu1  ;;  %2969 = vmatmul.mubr.bf16.gmra.mxu1 %v5868_v17  ;;  %3009 = vmatprep.subr.bf16.mxu0 %v5755_v21 }
 0x13d   :  { %v2182_v20 = vadd.f32 %v2181_v26, %v7088_v1  ;;  %v7333_v19 = vadd.f32 %v2292_v40, %v2180_v4 }
 0x13e   :  { %v2183_v23 = vpop.f32.mrf.mxu0  ;;  %v2294_v50 = vpop.f32.mrf.mxu1 }
 0x13f   :  { %v2184_v25 = vadd.f32 %v2183_v23, %v7078_v59  ;;  %v7336_v44 = vadd.f32 %v2294_v50, %v2182_v20  ;;  %3010 = vmatpush2.bf16.msra.mxu0 %v5753_v7  ;;  %v5870_v59 = vld [vmem:[%s9606_s0 + $0x44] ss:$24 sps:$4 sm:$0xff]  }
 0x140   :  { %v7338_v28 = vpop.f32.mrf.mxu0  ;;  %v2296_v31 = vpop.f32.mrf.mxu1 }
 0x141   :  { %9755 = vst [vmem:[#allocation11_spill] sm:$0xff] %v7338_v28  ;;  %v7340_v51 = vadd.f32 %v2296_v31, %v2184_v25 }
 0x142   :  { %v7342_v57 = vpop.f32.mrf.mxu1  ;;  %v2335_v41 = vpop.f32.mrf.mxu0  ;;  %3012 = vmatmul.mubr.bf16.vlgmr.msra.gmra.mxu0 %v5869_v43 }
 0x143   :  { %9756 = vst [vmem:[#allocation12_spill] sm:$0xff] %v7342_v57  ;;  %v7348_v48 = vadd.f32 %v2335_v41, %v7105_v2  ;;  %3021 = vmatprep.mubr.bf16.mxu0 %v5870_v59 }
 0x144   :  { %v2337_v63 = vpop.f32.mrf.mxu0  ;;  %v7353_v6 = vpop.f32.mrf.mxu1 }
 0x145   :  { %v7356_v8 = vadd.f32 %v2337_v63, %v7109_v58  ;;  %v5871_v58 = vld [vmem:[%s9606_s0 + $0x40] ss:$24 sps:$4 sm:$0xff]  }
 0x146   :  { %v2339_v32 = vpop.f32.mrf.mxu0  ;;  %v7358_v39 = vpop.f32.mrf.mxu1 }
 0x147   :  { %9757 = vst [vmem:[#allocation13_spill] sm:$0xff] %v7356_v8  ;;  %v7361_v21 = vadd.f32 %v2339_v32, %v7118_v62  ;;  %v5872_v62 = vld [vmem:[%s9606_s0 + $0x74] ss:$24 sps:$4 sm:$0xff]  }
 0x148   :  { %v2341_v12 = vpop.f32.mrf.mxu0  ;;  %v7363_v2 = vpop.f32.mrf.mxu1 }
 0x149   :  { %v7366_v27 = vadd.f32 %v2341_v12, %v7124_v5 }
 0x14a   :  { %v2345_v4 = vpop.f32.mrf.mxu0  ;;  %v7368_v7 = vpop.f32.mrf.mxu1  ;;  %3022 = vmatmul.mubr.bf16.gmra.mxu0 %v5871_v58 }
 0x14b   :  { %9758 = vst [vmem:[#allocation14_spill] sm:$0xff] %v7366_v27  ;;  %v7374_v34 = vadd.f32 %v2345_v4, %v7137_v16  ;;  %3031 = vmatprep.mubr.bf16.mxu0 %v5872_v62 }
 0x14c   :  { %v2347_v26 = vpop.f32.mrf.mxu0  ;;  %v7379_v40 = vpop.f32.mrf.mxu1 }
 0x14d   :  { %v7382_v5 = vadd.f32 %v2347_v26, %v7141_v46  ;;  %v5873_v46 = vld [vmem:[%s9606_s0 + $0x70] ss:$24 sps:$4 sm:$0xff]  }
 0x14e   :  { %v2349_v17 = vpop.f32.mrf.mxu0  ;;  %v7384_v20 = vpop.f32.mrf.mxu1 }
 0x14f   :  { %v7387_v23 = vadd.f32 %v2349_v17, %v7150_v52  ;;  %v5874_v52 = vld [vmem:[%s9606_s0 + $0xa4] ss:$24 sps:$4 sm:$0xff]  }
 0x150   :  { %v2351_v50 = vpop.f32.mrf.mxu0  ;;  %v7389_v16 = vpop.f32.mrf.mxu1 }
 0x151   :  { %v7392_v25 = vadd.f32 %v2351_v50, %v7156_v56 }
 0x152   :  { %v2355_v31 = vpop.f32.mrf.mxu0  ;;  %v7394_v41 = vpop.f32.mrf.mxu1  ;;  %3032 = vmatmul.mubr.bf16.gmra.mxu0 %v5873_v46 }
 0x153   :  { %v7400_v43 = vadd.f32 %v2355_v31, %v7169_v3  ;;  %3041 = vmatprep.mubr.bf16.mxu0 %v5874_v52 }
 0x154   :  { %v2357_v59 = vpop.f32.mrf.mxu0  ;;  %v7405_v63 = vpop.f32.mrf.mxu1 }
 0x155   :  { %9759 = vst [vmem:[#allocation15_spill] sm:$0xff] %v7400_v43  ;;  %v7408_v56 = vadd.f32 %v2357_v59, %v7173_v53  ;;  %v5875_v53 = vld [vmem:[%s9606_s0 + $0xa0] ss:$24 sps:$4 sm:$0xff]  }
 0x156   :  { %v2359_v32 = vpop.f32.mrf.mxu0  ;;  %v7410_v12 = vpop.f32.mrf.mxu1 }
 0x157   :  { %9760 = vst [vmem:[#allocation16_spill] sm:$0xff] %v7408_v56  ;;  %v7413_v4 = vadd.f32 %v2359_v32, %v7182_v9  ;;  %v5876_v9 = vld [vmem:[%s9606_s0 + $0xd4] ss:$24 sps:$4 sm:$0xff]  }
 0x158   :  { %v2361_v58 = vpop.f32.mrf.mxu0  ;;  %v7415_v3 = vpop.f32.mrf.mxu1 }
 0x159   :  { %9761 = vst [vmem:[#allocation17_spill] sm:$0xff] %v7413_v4  ;;  %v7418_v62 = vadd.f32 %v2361_v58, %v7188_v24 }
 0x15a   :  { %v2365_v26 = vpop.f32.mrf.mxu0  ;;  %v7420_v17 = vpop.f32.mrf.mxu1  ;;  %3042 = vmatmul.mubr.bf16.gmra.mxu0 %v5875_v53 }
 0x15b   :  { %9762 = vst [vmem:[#allocation18_spill] sm:$0xff] %v7418_v62  ;;  %v7426_v50 = vadd.f32 %v2365_v26, %v7201_v37  ;;  %3051 = vmatprep.mubr.bf16.mxu0 %v5876_v9 }
 0x15c   :  { %v2367_v31 = vpop.f32.mrf.mxu0  ;;  %v7431_v46 = vpop.f32.mrf.mxu1 }
 0x15d   :  { %9763 = vst [vmem:[#allocation19_spill] sm:$0xff] %v7426_v50  ;;  %v7434_v24 = vadd.f32 %v2367_v31, %v7205_v42  ;;  %v5877_v42 = vld [vmem:[%s9606_s0 + $0xd0] ss:$24 sps:$4 sm:$0xff]  }
 0x15e   :  { %v2369_v52 = vpop.f32.mrf.mxu0  ;;  %v7436_v59 = vpop.f32.mrf.mxu1 }
 0x15f   :  { %9764 = vst [vmem:[#allocation20_spill] sm:$0xff] %v7434_v24  ;;  %v7439_v32 = vadd.f32 %v2369_v52, %v7214_v49  ;;  %v5878_v49 = vld [vmem:[%s9606_s0 + $0x104] ss:$24 sps:$4 sm:$0xff]  }
 0x160   :  { %v2371_v58 = vpop.f32.mrf.mxu0  ;;  %v7441_v37 = vpop.f32.mrf.mxu1 }
 0x161   :  { %9765 = vst [vmem:[#allocation21_spill] sm:$0xff] %v7439_v32  ;;  %v7444_v26 = vadd.f32 %v2371_v58, %v7220_v30 }
 0x162   :  { %v2375_v53 = vpop.f32.mrf.mxu0  ;;  %v7446_v9 = vpop.f32.mrf.mxu1  ;;  %3052 = vmatmul.mubr.bf16.gmra.mxu0 %v5877_v42 }
 0x163   :  { %9766 = vst [vmem:[#allocation22_spill] sm:$0xff] %v7444_v26  ;;  %9767 = vst [vmem:[#allocation23_spill] sm:$0xff] %v7446_v9  ;;  %v7452_v31 = vadd.f32 %v2375_v53, %v7233_v45  ;;  %3061 = vmatprep.mubr.bf16.mxu0 %v5878_v49  ;;  %v5879_v49 = vld [vmem:[%s9606_s0 + $0x100] ss:$24 sps:$4 sm:$0xff]  }
 0x164   :  { %v2377_v52 = vpop.f32.mrf.mxu0  ;;  %v7457_v36 = vpop.f32.mrf.mxu1 }
 0x165   :  { %9768 = vst [vmem:[#allocation24_spill] sm:$0xff] %v7452_v31  ;;  %v7460_v30 = vadd.f32 %v2377_v52, %v7237_v35 }
 0x166   :  { %v2379_v58 = vpop.f32.mrf.mxu0  ;;  %v7462_v54 = vpop.f32.mrf.mxu1 }
 0x167   :  { %9769 = vst [vmem:[#allocation25_spill] sm:$0xff] %v7460_v30  ;;  %v7465_v57 = vadd.f32 %v2379_v58, %v7247_v60  ;;  %v5880_v60 = vld [vmem:[%s9606_s0 + $0x134] ss:$24 sps:$4 sm:$0xff]  }
 0x168   :  { %v7467_v42 = vpop.f32.mrf.mxu0  ;;  %v7469_v45 = vpop.f32.mrf.mxu1 }
 0x169   :  { %9770 = vst [vmem:[#allocation26_spill] sm:$0xff] %v7465_v57  ;;  %9771 = vst [vmem:[#allocation27_spill] sm:$0xff] %v7467_v42 }
 0x16a   :  { %v2385_v53 = vpop.f32.mrf.mxu0  ;;  %v7471_v28 = vpop.f32.mrf.mxu1  ;;  %3062 = vmatmul.mubr.bf16.gmra.mxu0 %v5879_v49 }
 0x16b   :  { %9772 = vst [vmem:[#allocation28_spill] sm:$0xff] %v7471_v28  ;;  %v7477_v35 = vadd.f32 %v2385_v53, %v7266_v10  ;;  %3071 = vmatprep.mubr.bf16.mxu0 %v5880_v60  ;;  %v5881_v60 = vld [vmem:[%s9606_s0 + $0x130] ss:$24 sps:$4 sm:$0xff]  }
 0x16c   :  { %v2387_v52 = vpop.f32.mrf.mxu0  ;;  %v7482_v58 = vpop.f32.mrf.mxu1 }
 0x16d   :  { %9773 = vst [vmem:[#allocation29_spill] sm:$0xff] %v7477_v35  ;;  %v7485_v14 = vadd.f32 %v2387_v52, %v7270_v47 }
 0x16e   :  { %v2389_v38 = vpop.f32.mrf.mxu0  ;;  %v7487_v57 = vpop.f32.mrf.mxu1 }
 0x16f   :  { %9774 = vst [vmem:[#allocation30_spill] sm:$0xff] %v7485_v14  ;;  %v7490_v30 = vadd.f32 %v2389_v38, %v7280_v29  ;;  %v5882_v29 = vld [vmem:[%s9606_s0 + $0x164] ss:$24 sps:$4 sm:$0xff]   ;;  %v7515_v14 = vsub.s32 2, %v7039_v22 }
 0x170   :  { %v7492_v49 = vpop.f32.mrf.mxu0  ;;  %v7494_v10 = vpop.f32.mrf.mxu1 }
 0x171   :  { %9775 = vst [vmem:[#allocation31_spill] sm:$0xff] %v7490_v30  ;;  %9776 = vst [vmem:[#allocation32_spill] sm:$0xff] %v7492_v49 }
 0x172   :  { %v2395_v53 = vpop.f32.mrf.mxu0  ;;  %v7496_v35 = vpop.f32.mrf.mxu1  ;;  %3072 = vmatmul.mubr.bf16.gmra.mxu0 %v5881_v60  ;;  %9780 = vst [vmem:[#allocation36_spill] sm:$0xff] %v7515_v14 }
 0x173   :  { %9777 = vst [vmem:[#allocation33_spill] sm:$0xff] %v7496_v35  ;;  %v7502_v47 = vadd.f32 %v2395_v53, %v7299_v0  ;;  %3081 = vmatprep.mubr.bf16.mxu0 %v5882_v29 }
 0x174   :  { %v2397_v38 = vpop.f32.mrf.mxu0  ;;  %v7507_v52 = vpop.f32.mrf.mxu1 }
 0x175   :  { %9778 = vst [vmem:[#allocation34_spill] sm:$0xff] %v7502_v47  ;;  %v7510_v30 = vadd.f32 %v2397_v38, %v7305_v55  ;;  %v5883_v55 = vld [vmem:[%s9606_s0 + $0x160] ss:$24 sps:$4 sm:$0xff]   ;;  %v7531_v38 = vrot.slane %v7064_v33, %v7515_v14 }
 0x176   :  { %v2399_v35 = vpop.f32.mrf.mxu0  ;;  %v7512_v49 = vpop.f32.mrf.mxu1 }
 0x177   :  { %9779 = vst [vmem:[#allocation35_spill] sm:$0xff] %v7510_v30  ;;  %v7518_v0 = vadd.f32 %v2399_v35, %v7315_v61  ;;  %v7534_v30 = vsub.s32 3, %v7039_v22  ;;  %v2469_v18 = vadd.f32 %v7405_v63, %v7531_v38  ;;  %v2473_v63 = vadd.f32 %v7415_v3, %v7531_v38 }
 0x178   :  { %v7520_v53 = vpop.f32.mrf.mxu0  ;;  %v7522_v60 = vpop.f32.mrf.mxu1  ;;  %v2479_v11 = vadd.f32 %v7431_v46, %v7531_v38  ;;  %v2483_v46 = vadd.f32 %v7441_v37, %v7531_v38  ;;  %v2489_v4 = vadd.f32 %v7457_v36, %v7531_v38  ;;  %v2493_v36 = vadd.f32 %v7469_v45, %v7531_v38 }
 0x179   :  { %9781 = vst [vmem:[#allocation37_spill] sm:$0xff] %v7518_v0  ;;  %9782 = vst [vmem:[#allocation38_spill] sm:$0xff] %v7520_v53  ;;  %v7550_v14 = vrot.slane %v7064_v33, %v7534_v30 }
 0x17a   :  { %v2405_v29 = vpop.f32.mrf.mxu0  ;;  %v7524_v47 = vpop.f32.mrf.mxu1  ;;  %3082 = vmatmul.mubr.bf16.gmra.mxu0 %v5883_v55  ;;  %9784 = vst [vmem:[#allocation40_spill] sm:$0xff] %v7534_v30  ;;  %v2449_v55 = vadd.f32 %v7353_v6, %v7531_v38  ;;  %v2453_v30 = vadd.f32 %v7363_v2, %v7531_v38 }
 0x17b   :  { %9783 = vst [vmem:[#allocation39_spill] sm:$0xff] %v7524_v47  ;;  %v7537_v61 = vadd.f32 %v2405_v29, %v7333_v19  ;;  %v2461_v2 = vadd.f32 %v7384_v20, %v7550_v14  ;;  %v2481_v3 = vadd.f32 %v7436_v59, %v7550_v14  ;;  %v2491_v37 = vadd.f32 %v7462_v54, %v7550_v14 }
 0x17c   :  { %v2407_v35 = vpop.f32.mrf.mxu0  ;;  %v7539_v0 = vpop.f32.mrf.mxu1  ;;  %v2501_v45 = vadd.f32 %v7487_v57, %v7550_v14 }
 0x17d   :  { %9785 = vst [vmem:[#allocation41_spill] sm:$0xff] %v7537_v61  ;;  %v7542_v47 = vadd.f32 %v2407_v35, %v7336_v44  ;;  %v2451_v35 = vadd.f32 %v7358_v39, %v7550_v14 }
 0x17e   :  { %v2409_v53 = vpop.f32.mrf.mxu0  ;;  %v7544_v31 = vpop.f32.mrf.mxu1 }
 0x17f   :  { %9786 = vst [vmem:[#allocation42_spill] sm:$0xff] %v7542_v47  ;;  %v7553_v15 = vadd.f32 %v2409_v53, %v7340_v51 }
 0x180   :  { %v7555_v19 = vpop.f32.mrf.mxu0  ;;  %v7557_v29 = vpop.f32.mrf.mxu1 }
 0x181   :  { %9787 = vst [vmem:[#allocation43_spill] sm:$0xff] %v7553_v15  ;;  %9788 = vst [vmem:[#allocation44_spill] sm:$0xff] %v7555_v19 }
 0x182   :  { %v7559_v61 = vpop.f32.mrf.mxu1  ;;  %v2561_v44 = vpop.f32.mrf.mxu0 }
 0x183   :  { %9789 = vst [vmem:[#allocation45_spill] sm:$0xff] %v7559_v61  ;;  %v7563_v47 = vadd.f32 %v2561_v44, %v2449_v55  ;;  %v2459_v61 = vadd.f32 %v7379_v40, %v7531_v38  ;;  %v2463_v40 = vadd.f32 %v7389_v16, %v7531_v38  ;;  %v2471_v16 = vadd.f32 %v7410_v12, %v7550_v14 }
 0x184   :  { %v2563_v6 = vpop.f32.mrf.mxu0  ;;  %v7565_v28 = vpop.f32.mrf.mxu1 }
 0x185   :  { %v7569_v51 = vadd.f32 %v2563_v6, %v2451_v35 }
 0x186   :  { %v2565_v53 = vpop.f32.mrf.mxu0  ;;  %v7571_v15 = vpop.f32.mrf.mxu1 }
 0x187   :  { %v7575_v19 = vadd.f32 %v2565_v53, %v2453_v30 }
 0x188   :  { %v7577_v42 = vpop.f32.mrf.mxu0  ;;  %v7579_v39 = vpop.f32.mrf.mxu1 }
 0x18a   :  { %v2571_v55 = vpop.f32.mrf.mxu0  ;;  %v7581_v44 = vpop.f32.mrf.mxu1 }
 0x18b   :  { %v7585_v35 = vadd.f32 %v2571_v55, %v2459_v61 }
 0x18c   :  { %v2573_v6 = vpop.f32.mrf.mxu0  ;;  %v7587_v26 = vpop.f32.mrf.mxu1 }
 0x18d   :  { %v7591_v30 = vadd.f32 %v2573_v6, %v2461_v2 }
 0x18e   :  { %v2575_v53 = vpop.f32.mrf.mxu0  ;;  %v7593_v32 = vpop.f32.mrf.mxu1 }
 0x18f   :  { %v7597_v9 = vadd.f32 %v2575_v53, %v2463_v40 }
 0x190   :  { %v7599_v24 = vpop.f32.mrf.mxu0  ;;  %v7601_v20 = vpop.f32.mrf.mxu1 }
 0x192   :  { %v2581_v61 = vpop.f32.mrf.mxu0  ;;  %v7603_v55 = vpop.f32.mrf.mxu1 }
 0x193   :  { %v7607_v2 = vadd.f32 %v2581_v61, %v2469_v18 }
 0x194   :  { %v2583_v6 = vpop.f32.mrf.mxu0  ;;  %v7609_v50 = vpop.f32.mrf.mxu1 }
 0x195   :  { %v7613_v40 = vadd.f32 %v2583_v6, %v2471_v16 }
 0x196   :  { %v2585_v53 = vpop.f32.mrf.mxu0  ;;  %v7615_v13 = vpop.f32.mrf.mxu1 }
 0x197   :  { %9790 = vst [vmem:[#allocation46_spill] sm:$0xff] %v7613_v40  ;;  %9791 = vst [vmem:[#allocation47_spill] sm:$0xff] %v7615_v13  ;;  %v7619_v1 = vadd.f32 %v2585_v53, %v2473_v63 }
 0x198   :  { %v7621_v62 = vpop.f32.mrf.mxu0  ;;  %v7623_v18 = vpop.f32.mrf.mxu1 }
 0x199   :  { %9792 = vst [vmem:[#allocation48_spill] sm:$0xff] %v7623_v18 }
 0x19a   :  { %v2591_v12 = vpop.f32.mrf.mxu0  ;;  %v7625_v61 = vpop.f32.mrf.mxu1 }
 0x19b   :  { %9793 = vst [vmem:[#allocation49_spill] sm:$0xff] %v7625_v61  ;;  %v7629_v16 = vadd.f32 %v2591_v12, %v2479_v11 }
 0x19c   :  { %v2593_v6 = vpop.f32.mrf.mxu0  ;;  %v7631_v40 = vpop.f32.mrf.mxu1 }
 0x19d   :  { %9794 = vst [vmem:[#allocation50_spill] sm:$0xff] %v7629_v16  ;;  %9795 = vst [vmem:[#allocation51_spill] sm:$0xff] %v7631_v40  ;;  %v7635_v63 = vadd.f32 %v2593_v6, %v2481_v3 }
 0x19e   :  { %v2595_v53 = vpop.f32.mrf.mxu0  ;;  %v7637_v13 = vpop.f32.mrf.mxu1 }
 0x19f   :  { %9796 = vst [vmem:[#allocation52_spill] sm:$0xff] %v7635_v63  ;;  %9797 = vst [vmem:[#allocation53_spill] sm:$0xff] %v7637_v13  ;;  %v7641_v61 = vadd.f32 %v2595_v53, %v2483_v46 }
 0x1a0   :  { %v7643_v18 = vpop.f32.mrf.mxu0  ;;  %v7645_v11 = vpop.f32.mrf.mxu1 }
 0x1a1   :  { %9798 = vst [vmem:[#allocation54_spill] sm:$0xff] %v7641_v61  ;;  %9799 = vst [vmem:[#allocation55_spill] sm:$0xff] %v7643_v18 }
 0x1a2   :  { %9800 = vst [vmem:[#allocation56_spill] sm:$0xff] %v7645_v11  ;;  %v2601_v59 = vpop.f32.mrf.mxu0  ;;  %v7647_v12 = vpop.f32.mrf.mxu1  ;;  %v2499_v11 = vadd.f32 %v7482_v58, %v7531_v38  ;;  %v2503_v58 = vadd.f32 %v7494_v10, %v7531_v38  ;;  %v2511_v10 = vadd.f32 %v7512_v49, %v7550_v14 }
 0x1a3   :  { %9801 = vst [vmem:[#allocation57_spill] sm:$0xff] %v7647_v12  ;;  %v7651_v3 = vadd.f32 %v2601_v59, %v2489_v4 }
 0x1a4   :  { %v2603_v6 = vpop.f32.mrf.mxu0  ;;  %v7653_v63 = vpop.f32.mrf.mxu1 }
 0x1a5   :  { %9802 = vst [vmem:[#allocation58_spill] sm:$0xff] %v7651_v3  ;;  %9803 = vst [vmem:[#allocation59_spill] sm:$0xff] %v7653_v63  ;;  %v7657_v46 = vadd.f32 %v2603_v6, %v2491_v37 }
 0x1a6   :  { %v2605_v53 = vpop.f32.mrf.mxu0  ;;  %v7659_v61 = vpop.f32.mrf.mxu1 }
 0x1a7   :  { %9804 = vst [vmem:[#allocation60_spill] sm:$0xff] %v7657_v46  ;;  %9805 = vst [vmem:[#allocation61_spill] sm:$0xff] %v7659_v61  ;;  %v7663_v12 = vadd.f32 %v2605_v53, %v2493_v36 }
 0x1a8   :  { %v7665_v18 = vpop.f32.mrf.mxu0  ;;  %v7667_v54 = vpop.f32.mrf.mxu1 }
 0x1a9   :  { %9806 = vst [vmem:[#allocation62_spill] sm:$0xff] %v7663_v12  ;;  %9807 = vst [vmem:[#allocation63_spill] sm:$0xff] %v7665_v18 }
 0x1aa   :  { %9808 = vst [vmem:[#allocation64_spill] sm:$0xff] %v7667_v54  ;;  %v2611_v4 = vpop.f32.mrf.mxu0  ;;  %v7669_v59 = vpop.f32.mrf.mxu1  ;;  %v2509_v54 = vadd.f32 %v7507_v52, %v7531_v38  ;;  %v2513_v52 = vadd.f32 %v7522_v60, %v7531_v38  ;;  %v2521_v60 = vadd.f32 %v7544_v31, %v7550_v14 }
 0x1ab   :  { %9809 = vst [vmem:[#allocation65_spill] sm:$0xff] %v7669_v59  ;;  %v7673_v37 = vadd.f32 %v2611_v4, %v2499_v11 }
 0x1ac   :  { %v2613_v6 = vpop.f32.mrf.mxu0  ;;  %v7675_v46 = vpop.f32.mrf.mxu1 }
 0x1ad   :  { %9810 = vst [vmem:[#allocation66_spill] sm:$0xff] %v7673_v37  ;;  %9811 = vst [vmem:[#allocation67_spill] sm:$0xff] %v7675_v46  ;;  %v7679_v36 = vadd.f32 %v2613_v6, %v2501_v45 }
 0x1ae   :  { %v2615_v53 = vpop.f32.mrf.mxu0  ;;  %v7681_v61 = vpop.f32.mrf.mxu1 }
 0x1af   :  { %9812 = vst [vmem:[#allocation68_spill] sm:$0xff] %v7679_v36  ;;  %9813 = vst [vmem:[#allocation69_spill] sm:$0xff] %v7681_v61  ;;  %v7685_v59 = vadd.f32 %v2615_v53, %v2503_v58 }
 0x1b0   :  { %v7687_v12 = vpop.f32.mrf.mxu0  ;;  %v7689_v57 = vpop.f32.mrf.mxu1 }
 0x1b1   :  { %9814 = vst [vmem:[#allocation70_spill] sm:$0xff] %v7685_v59  ;;  %9815 = vst [vmem:[#allocation71_spill] sm:$0xff] %v7687_v12 }
 0x1b2   :  { %9816 = vst [vmem:[#allocation72_spill] sm:$0xff] %v7689_v57  ;;  %v2621_v11 = vpop.f32.mrf.mxu0  ;;  %v7691_v4 = vpop.f32.mrf.mxu1  ;;  %v2519_v57 = vadd.f32 %v7539_v0, %v7531_v38  ;;  %v2523_v0 = vadd.f32 %v7557_v29, %v7531_v38 }
 0x1b3   :  { %9817 = vst [vmem:[#allocation73_spill] sm:$0xff] %v7691_v4  ;;  %v7695_v45 = vadd.f32 %v2621_v11, %v2509_v54 }
 0x1b4   :  { %v2623_v6 = vpop.f32.mrf.mxu0  ;;  %v7697_v36 = vpop.f32.mrf.mxu1 }
 0x1b5   :  { %9818 = vst [vmem:[#allocation74_spill] sm:$0xff] %v7695_v45  ;;  %9819 = vst [vmem:[#allocation75_spill] sm:$0xff] %v7697_v36  ;;  %v7701_v58 = vadd.f32 %v2623_v6, %v2511_v10 }
 0x1b6   :  { %v2625_v53 = vpop.f32.mrf.mxu0  ;;  %v7703_v59 = vpop.f32.mrf.mxu1 }
 0x1b7   :  { %9820 = vst [vmem:[#allocation76_spill] sm:$0xff] %v7701_v58  ;;  %9821 = vst [vmem:[#allocation77_spill] sm:$0xff] %v7703_v59  ;;  %v7707_v4 = vadd.f32 %v2625_v53, %v2513_v52 }
 0x1b8   :  { %v7709_v12 = vpop.f32.mrf.mxu0  ;;  %v7711_v49 = vpop.f32.mrf.mxu1 }
 0x1b9   :  { %9822 = vst [vmem:[#allocation78_spill] sm:$0xff] %v7707_v4  ;;  %9823 = vst [vmem:[#allocation79_spill] sm:$0xff] %v7709_v12 }
 0x1ba   :  { %9824 = vst [vmem:[#allocation80_spill] sm:$0xff] %v7711_v49  ;;  %v2631_v54 = vpop.f32.mrf.mxu0  ;;  %v7713_v11 = vpop.f32.mrf.mxu1 }
 0x1bb   :  { %9825 = vst [vmem:[#allocation81_spill] sm:$0xff] %v7713_v11  ;;  %v7717_v10 = vadd.f32 %v2631_v54, %v2519_v57 }
 0x1bc   :  { %v2633_v6 = vpop.f32.mrf.mxu0  ;;  %v7719_v58 = vpop.f32.mrf.mxu1 }
 0x1bd   :  { %9826 = vst [vmem:[#allocation82_spill] sm:$0xff] %v7717_v10  ;;  %9827 = vst [vmem:[#allocation83_spill] sm:$0xff] %v7719_v58  ;;  %v7723_v52 = vadd.f32 %v2633_v6, %v2521_v60 }
 0x1be   :  { %v2635_v53 = vpop.f32.mrf.mxu0  ;;  %v7725_v59 = vpop.f32.mrf.mxu1 }
 0x1bf   :  { %9828 = vst [vmem:[#allocation84_spill] sm:$0xff] %v7723_v52  ;;  %9829 = vst [vmem:[#allocation85_spill] sm:$0xff] %v7725_v59  ;;  %v7727_v49 = vadd.f32 %v2635_v53, %v2523_v0 }
 0x1c0   :  { %v7729_v4 = vpop.f32.mrf.mxu0  ;;  %v7731_v11 = vpop.f32.mrf.mxu1 }
 0x1c1   :  { %9830 = vst [vmem:[#allocation86_spill] sm:$0xff] %v7727_v49  ;;  %9831 = vst [vmem:[#allocation87_spill] sm:$0xff] %v7729_v4 }
 0x1c2   :  { %9832 = vst [vmem:[#allocation88_spill] sm:$0xff] %v7731_v11  ;;  %v7733_v31 = vpop.f32.mrf.mxu1  ;;  %v2787_v57 = vpop.f32.mrf.mxu0 }
 0x1c3   :  { %9833 = vst [vmem:[#allocation89_spill] sm:$0xff] %v7733_v31 }
 0x1c4   :  { %v2789_v54 = vpop.f32.mrf.mxu0  ;;  %v7735_v10 = vpop.f32.mrf.mxu1 }
 0x1c6   :  { %v7737_v58 = vpop.f32.mrf.mxu0  ;;  %v7739_v38 = vpop.f32.mrf.mxu1 }
 0x1c8   :  { %v7741_v29 = vpop.f32.mrf.mxu0  ;;  %v7743_v60 = vpop.f32.mrf.mxu1 }
 0x1ca   :  { %v7745_v6 = vpop.f32.mrf.mxu0  ;;  %v7747_v0 = vpop.f32.mrf.mxu1 }
 0x1cc   :  { %v7749_v53 = vpop.f32.mrf.mxu0  ;;  %v7753_v31 = vpop.f32.mrf.mxu1 }
 0x1ce   :  { %v7751_v11 = vpop.f32.mrf.mxu0  ;;  %v7759_v59 = vpop.f32.mrf.mxu1 }
 0x1d0   :  { %v7755_v49 = vpop.f32.mrf.mxu0  ;;  %v7765_v36 = vpop.f32.mrf.mxu1 }
 0x1d2   :  { %v7757_v4 = vpop.f32.mrf.mxu0  ;;  %v7771_v46 = vpop.f32.mrf.mxu1 }
 0x1d4   :  { %v7761_v52 = vpop.f32.mrf.mxu0  ;;  %v7777_v63 = vpop.f32.mrf.mxu1 }
 0x1d5   :  { %9834 = vst [vmem:[#allocation90_spill] sm:$0xff] %v7761_v52  ;;  %9840 = vst [vmem:[#allocation96_spill] sm:$0xff] %v7777_v63 }
 0x1d6   :  { %v7763_v12 = vpop.f32.mrf.mxu0  ;;  %v7783_v40 = vpop.f32.mrf.mxu1 }
 0x1d7   :  { %9835 = vst [vmem:[#allocation91_spill] sm:$0xff] %v7763_v12  ;;  %9843 = vst [vmem:[#allocation99_spill] sm:$0xff] %v7783_v40 }
 0x1d8   :  { %v7767_v45 = vpop.f32.mrf.mxu0 }
 0x1d9   :  { %9836 = vst [vmem:[#allocation92_spill] sm:$0xff] %v7767_v45  ;;  %v7789_v45 = vpop.f32.mrf.mxu1 }
 0x1da   :  { %v7769_v61 = vpop.f32.mrf.mxu0 }
 0x1db   :  { %9837 = vst [vmem:[#allocation93_spill] sm:$0xff] %v7769_v61 }
 0x1dc   :  { %v7773_v37 = vpop.f32.mrf.mxu0 }
 0x1dd   :  { %9838 = vst [vmem:[#allocation94_spill] sm:$0xff] %v7773_v37  ;;  %v7795_v37 = vpop.f32.mrf.mxu1 }
 0x1de   :  { %v7775_v18 = vpop.f32.mrf.mxu0  ;;  %9848 = vst [vmem:[#allocation104_spill] sm:$0xff] %v7795_v37  ;;  %v7817_v37 = vsub.s32 5, %v7039_v22 }
 0x1df   :  { %9839 = vst [vmem:[#allocation95_spill] sm:$0xff] %v7775_v18 }
 0x1e0   :  { %v7779_v3 = vpop.f32.mrf.mxu0  ;;  %9857 = vst [vmem:[#allocation113_spill] sm:$0xff] %v7817_v37 }
 0x1e1   :  { %9841 = vst [vmem:[#allocation97_spill] sm:$0xff] %v7779_v3  ;;  %v7801_v3 = vpop.f32.mrf.mxu1 }
 0x1e2   :  { %v7781_v13 = vpop.f32.mrf.mxu0 }
 0x1e3   :  { %9842 = vst [vmem:[#allocation98_spill] sm:$0xff] %v7781_v13 }
 0x1e4   :  { %v7785_v16 = vpop.f32.mrf.mxu0 }
 0x1e5   :  { %9844 = vst [vmem:[#allocation100_spill] sm:$0xff] %v7785_v16  ;;  %v7807_v16 = vpop.f32.mrf.mxu1 }
 0x1e6   :  { %v7787_v12 = vpop.f32.mrf.mxu0  ;;  %9853 = vst [vmem:[#allocation109_spill] sm:$0xff] %v7807_v16  ;;  %v7833_v16 = vadd.f32 %v7565_v28, %v7563_v47  ;;  %v3099_v47 = vadd.f32 %v7366_v27, %v7361_v21 }
 0x1e7   :  { %9845 = vst [vmem:[#allocation101_spill] sm:$0xff] %v7787_v12 }
 0x1e8   :  { %v7791_v61 = vpop.f32.mrf.mxu0 }
 0x1e9   :  { %9846 = vst [vmem:[#allocation102_spill] sm:$0xff] %v7791_v61  ;;  %v7812_v61 = vsub.s32 4, %v7039_v22  ;;  %v7837_v22 = vrot.slane %v7064_v33, %v7817_v37 }
 0x1ea   :  { %v7793_v52 = vpop.f32.mrf.mxu0 }
 0x1eb   :  { %9847 = vst [vmem:[#allocation103_spill] sm:$0xff] %v7793_v52  ;;  %9855 = vst [vmem:[#allocation111_spill] sm:$0xff] %v7812_v61 }
 0x1ec   :  { %v7797_v18 = vpop.f32.mrf.mxu0 }
 0x1ed   :  { %9849 = vst [vmem:[#allocation105_spill] sm:$0xff] %v7797_v18  ;;  %v7819_v18 = vpop.f32.mrf.mxu1 }
 0x1ee   :  { %v7799_v63 = vpop.f32.mrf.mxu0  ;;  %9858 = vst [vmem:[#allocation114_spill] sm:$0xff] %v7819_v18 }
 0x1ef   :  { %9850 = vst [vmem:[#allocation106_spill] sm:$0xff] %v7799_v63 }
 0x1f0   :  { %v7803_v13 = vpop.f32.mrf.mxu0 }
 0x1f1   :  { %9851 = vst [vmem:[#allocation107_spill] sm:$0xff] %v7803_v13  ;;  %v7825_v13 = vrot.slane %v7064_v33, %v7812_v61  ;;  %v7844_v61 = vpop.f32.mrf.mxu1 }
 0x1f2   :  { %v7805_v40 = vpop.f32.mrf.mxu0 }
 0x1f3   :  { %9852 = vst [vmem:[#allocation108_spill] sm:$0xff] %v7805_v40  ;;  %v2455_v40 = vadd.f32 %v7368_v7, %v7550_v14  ;;  %v3092_v7 = vadd.f32 %v7356_v8, %v7348_v48  ;;  %v2788_v28 = vadd.f32 %v2787_v57, %v7825_v13  ;;  %v7865_v8 = vpop.f32.mrf.mxu1 }
 0x1f4   :  { %v7809_v12 = vpop.f32.mrf.mxu0 }
 0x1f5   :  { %9854 = vst [vmem:[#allocation110_spill] sm:$0xff] %v7809_v12  ;;  %v2901_v27 = vadd.f32 %v7735_v10, %v2788_v28  ;;  %v3106_v10 = vadd.f32 %v7382_v5, %v7374_v34 }
 0x1f6   :  { %v7814_v52 = vpop.f32.mrf.mxu0 }
 0x1f7   :  { %9856 = vst [vmem:[#allocation112_spill] sm:$0xff] %v7814_v52  ;;  %v2568_v52 = vadd.f32 %v7577_v42, %v2455_v40  ;;  %v3093_v42 = vadd.f32 %v3092_v7, %v7833_v16  ;;  %v2792_v7 = vadd.f32 %v7737_v58, %v7825_v13  ;;  %v2465_v58 = vadd.f32 %v7394_v41, %v7550_v14 }
 0x1f8   :  { %v7821_v63 = vpop.f32.mrf.mxu0 }
 0x1f9   :  { %9859 = vst [vmem:[#allocation115_spill] sm:$0xff] %v7821_v63  ;;  %v7842_v63 = vadd.f32 %v7579_v39, %v7575_v19  ;;  %v7858_v19 = vadd.f32 %v7571_v15, %v7569_v51  ;;  %v2790_v39 = vadd.f32 %v2789_v54, %v7837_v22  ;;  %v7863_v37 = vadd.f32 %v7581_v44, %v2568_v52 }
 0x1fa   :  { %v7829_v12 = vpop.f32.mrf.mxu0  ;;  %v7874_v15 = vadd.f32 %v7587_v26, %v7585_v35  ;;  %v2794_v44 = vadd.f32 %v7741_v29, %v7837_v22  ;;  %v7887_v26 = vpop.f32.mrf.mxu1  ;;  %v2578_v41 = vadd.f32 %v7599_v24, %v2465_v58  ;;  %v2475_v24 = vadd.f32 %v7420_v17, %v7550_v14 }
 0x1fb   :  { %v3100_v40 = vadd.f32 %v3099_v47, %v7842_v63  ;;  %v3094_v54 = vadd.f32 %v3093_v42, %v7858_v19  ;;  %v2903_v47 = vadd.f32 %v7739_v38, %v2790_v39  ;;  %v2905_v42 = vadd.f32 %v7743_v60, %v2792_v7 }
 0x1fc   :  { %v7846_v18 = vpop.f32.mrf.mxu0  ;;  %v2798_v38 = vadd.f32 %v7745_v6, %v7825_v13  ;;  %v3107_v29 = vadd.f32 %v3106_v10, %v7874_v15  ;;  %v2907_v7 = vadd.f32 %v7747_v0, %v2794_v44  ;;  %v2800_v6 = vadd.f32 %v7749_v53, %v7837_v22 }
 0x1fd   :  { %v3101_v28 = vadd.f32 %v3100_v40, %v7863_v37  ;;  %v7903_v40 = vadd.f32 %v7601_v20, %v7597_v9  ;;  %v2802_v0 = vadd.f32 %v7751_v11, %v7825_v13  ;;  %v7930_v17 = vadd.f32 %v7609_v50, %v7607_v2 }
 0x1fe   :  { %v7853_v33 = vpop.f32.mrf.mxu0  ;;  %v2911_v20 = vadd.f32 %v7753_v31, %v2798_v38  ;;  %v2804_v11 = vadd.f32 %v7755_v49, %v7837_v22  ;;  %v2808_v49 = vadd.f32 %v7757_v4, %v7825_v13  ;;  %v9870_v4 = vld [vmem:[#allocation90_spill] sm:$0xff] }
 0x1ff   :  { %9860 = vst [vmem:[#allocation116_spill] sm:$0xff] %v7903_v40  ;;  %9862 = vst [vmem:[#allocation118_spill] sm:$0xff] %v7930_v17 }
 0x200   :  { %v7867_v57 = vpop.f32.mrf.mxu0 }
 0x202   :  { %v3013_v51 = vpop.f32.mrf.mxu0 }
 0x203   :  { %v7880_v52 = vadd.f32 %v3013_v51, %v2901_v27  ;;  %v7898_v51 = vadd.f32 %v7593_v32, %v7591_v30  ;;  %v3113_v32 = vadd.f32 %v7392_v25, %v7387_v23  ;;  %v7915_v30 = vpop.f32.mrf.mxu1 }
 0x204   :  { %v3015_v35 = vpop.f32.mrf.mxu0 }
 0x205   :  { %v7892_v39 = vadd.f32 %v3015_v35, %v2903_v47  ;;  %v3095_v27 = vadd.f32 %v3094_v54, %v7880_v52  ;;  %v3108_v10 = vadd.f32 %v3107_v29, %v7898_v51  ;;  %v3114_v58 = vadd.f32 %v3113_v32, %v7903_v40  ;;  %v9863_v29 = vld [vmem:[#allocation48_spill] sm:$0xff]  ;;  %v7945_v50 = vpop.f32.mrf.mxu1 }
 0x206   :  { %v3017_v60 = vpop.f32.mrf.mxu0  ;;  %v7926_v35 = vadd.f32 %v7603_v55, %v2578_v41  ;;  %v2588_v55 = vadd.f32 %v7621_v62, %v2475_v24  ;;  %v7943_v41 = vadd.f32 %v9863_v29, %v7619_v1  ;;  %v9867_v24 = vld [vmem:[#allocation46_spill] sm:$0xff] }
 0x207   :  { %v7908_v47 = vadd.f32 %v3017_v60, %v2905_v42  ;;  %v3096_v54 = vadd.f32 %v3095_v27, %v7892_v39  ;;  %v2913_v42 = vadd.f32 %v7759_v59, %v2800_v6  ;;  %v3120_v27 = vadd.f32 %v7408_v56, %v7400_v43  ;;  %v9865_v6 = vld [vmem:[#allocation17_spill] sm:$0xff]  ;;  %v9896_v43 = vld [vmem:[#allocation56_spill] sm:$0xff] }
 0x208   :  { %v3019_v9 = vpop.f32.mrf.mxu0  ;;  %9861 = vst [vmem:[#allocation117_spill] sm:$0xff] %v7926_v35  ;;  %9864 = vst [vmem:[#allocation48_spill] sm:$0xff] %v7943_v41  ;;  %v2915_v59 = vadd.f32 %v7765_v36, %v2802_v0  ;;  %v3115_v32 = vadd.f32 %v3114_v58, %v7926_v35  ;;  %v2917_v0 = vadd.f32 %v7771_v46, %v2804_v11  ;;  %v9877_v11 = vld [vmem:[#allocation91_spill] sm:$0xff] }
 0x209   :  { %v3102_v53 = vadd.f32 %v3101_v28, %v7908_v47  ;;  %v7921_v44 = vadd.f32 %v3019_v9, %v2907_v7  ;;  %3097 = vadd.xlane.f32.xlu0 %v3096_v54  ;;  %v9866_v54 = vld [vmem:[#allocation18_spill] sm:$0xff]  ;;  %v3121_v1 = vadd.f32 %v3120_v27, %v7930_v17  ;;  %v9868_v9 = vld [vmem:[#allocation47_spill] sm:$0xff]  ;;  %v9874_v27 = vld [vmem:[#allocation49_spill] sm:$0xff] }
 0x20a   :  { %v3023_v31 = vpop.f32.mrf.mxu0  ;;  %v3127_v62 = vadd.f32 %v9866_v54, %v9865_v6  ;;  %v9876_v54 = vld [vmem:[#allocation96_spill] sm:$0xff] }
 0x20b   :  { %v7935_v28 = vadd.f32 %v3023_v31, %v2911_v20  ;;  %v3103_v38 = vadd.f32 %v3102_v53, %v7921_v44  ;;  %v7959_v20 = vadd.f32 %v9868_v9, %v9867_v24  ;;  %v2810_v53 = vadd.f32 %v9870_v4, %v7837_v22  ;;  %v7973_v24 = vpop.f32.mrf.mxu1  ;;  %v9883_v17 = vld [vmem:[#allocation92_spill] sm:$0xff] }
 0x20c   :  { %v3025_v2 = vpop.f32.mrf.mxu0  ;;  %v3128_v58 = vadd.f32 %v3127_v62, %v7943_v41  ;;  %v2921_v46 = vadd.f32 %v9876_v54, %v2808_v49  ;;  %v2812_v4 = vadd.f32 %v9877_v11, %v7825_v13  ;;  %v9880_v62 = vld [vmem:[#allocation51_spill] sm:$0xff]  ;;  %v2814_v49 = vadd.f32 %v9883_v17, %v7837_v22  ;;  %v9889_v17 = vld [vmem:[#allocation93_spill] sm:$0xff] }
 0x20d   :  { %v7950_v60 = vadd.f32 %v3025_v2, %v2913_v42  ;;  %3104 = vadd.xlane.f32.xlu0 %v3103_v38  ;;  %v3109_v7 = vadd.f32 %v3108_v10, %v7935_v28  ;;  %9869 = vst [vmem:[#allocation46_spill] sm:$0xff] %v7959_v20  ;;  %v9872_v42 = vld [vmem:[#allocation4_spill] sm:$0xff]  ;;  %v9873_v38 = vld [vmem:[#allocation5_spill] sm:$0xff]  ;;  %v7971_v2 = vadd.f32 %v9874_v27, %v2588_v55  ;;  %v9882_v27 = vld [vmem:[#allocation99_spill] sm:$0xff] }
 0x20e   :  { %v3027_v36 = vpop.f32.mrf.mxu0  ;;  %v2156_v29 = vadd.f32 %v9873_v38, %v9872_v42  ;;  %v9879_v38 = vld [vmem:[#allocation50_spill] sm:$0xff]  ;;  %v2923_v6 = vadd.f32 %v9882_v27, %v2810_v53  ;;  %v2925_v27 = vadd.f32 %v7789_v45, %v2812_v4  ;;  %v9898_v4 = vld [vmem:[#allocation104_spill] sm:$0xff] }
 0x20f   :  { %v7964_v31 = vadd.f32 %v3027_v36, %v2915_v59  ;;  %v3110_v10 = vadd.f32 %v3109_v7, %v7950_v60  ;;  %9875 = vst [vmem:[#allocation90_spill] sm:$0xff] %v7971_v2  ;;  %v3122_v7 = vadd.f32 %v3121_v1, %v7959_v20  ;;  %v7984_v41 = vadd.f32 %v9880_v62, %v9879_v38  ;;  %v9888_v1 = vld [vmem:[#allocation23_spill] sm:$0xff]  ;;  %v7998_v62 = vpop.f32.mrf.mxu1 }
 0x210   :  { %v3029_v9 = vpop.f32.mrf.mxu0  ;;  %v2485_v20 = vadd.f32 %v9888_v1, %v7550_v14  ;;  %v3129_v38 = vadd.f32 %v3128_v58, %v7971_v2  ;;  %v9894_v58 = vld [vmem:[#allocation55_spill] sm:$0xff]  ;;  %v9895_v2 = vld [vmem:[#allocation54_spill] sm:$0xff] }
 0x211   :  { %9871 = vst [vmem:[#allocation47_spill] sm:$0xff] %v7964_v31  ;;  %v3116_v59 = vadd.f32 %v3115_v32, %v7964_v31  ;;  %v7979_v36 = vadd.f32 %v3029_v9, %v2917_v0  ;;  %3111 = vadd.xlane.f32.xlu1 %v3110_v10  ;;  %9881 = vst [vmem:[#allocation5_spill] sm:$0xff] %v7984_v41  ;;  %v9885_v32 = vld [vmem:[#allocation6_spill] sm:$0xff]  ;;  %v9886_v9 = vld [vmem:[#allocation19_spill] sm:$0xff] }
 0x212   :  { %v3033_v55 = vpop.f32.mrf.mxu0  ;;  %v2269_v0 = vadd.f32 %v9885_v32, %v2156_v29  ;;  %v9887_v10 = vld [vmem:[#allocation20_spill] sm:$0xff] }
 0x213   :  { %9878 = vst [vmem:[#allocation4_spill] sm:$0xff] %v7979_v36  ;;  %v7989_v54 = vadd.f32 %v3033_v55, %v2921_v46  ;;  %v3117_v11 = vadd.f32 %v3116_v59, %v7979_v36  ;;  %v3134_v56 = vadd.f32 %v9887_v10, %v9886_v9  ;;  %v2818_v46 = vadd.f32 %v9889_v17, %v7825_v13  ;;  %v9891_v32 = vld [vmem:[#allocation52_spill] sm:$0xff]  ;;  %v9892_v10 = vld [vmem:[#allocation53_spill] sm:$0xff] }
 0x214   :  { %v3035_v53 = vpop.f32.mrf.mxu0  ;;  %v8009_v1 = vadd.f32 %v9892_v10, %v9891_v32  ;;  %v2598_v9 = vadd.f32 %v9894_v58, %v2485_v20  ;;  %v8014_v36 = vadd.f32 %v9896_v43, %v9895_v2  ;;  %v2927_v17 = vadd.f32 %v9898_v4, %v2814_v49  ;;  %v9902_v32 = vld [vmem:[#allocation21_spill] sm:$0xff]  ;;  %v9904_v58 = vld [vmem:[#allocation27_spill] sm:$0xff]  ;;  %v9906_v43 = vld [vmem:[#allocation28_spill] sm:$0xff]  ;;  %v8031_v49 = vpop.f32.mrf.mxu1 }
 0x215   :  { %9884 = vst [vmem:[#allocation49_spill] sm:$0xff] %v7989_v54  ;;  %v3123_v59 = vadd.f32 %v3122_v7, %v7989_v54  ;;  %v8004_v55 = vadd.f32 %v3035_v53, %v2923_v6  ;;  %3118 = vadd.xlane.f32.xlu1 %v3117_v11  ;;  %v3135_v29 = vadd.f32 %v3134_v56, %v7984_v41  ;;  %v9899_v7 = vld [vmem:[#allocation94_spill] sm:$0xff]  ;;  %v9901_v11 = vld [vmem:[#allocation7_spill] sm:$0xff] }
 0x216   :  { %9893 = vst [vmem:[#allocation91_spill] sm:$0xff] %v8009_v1  ;;  %9897 = vst [vmem:[#allocation50_spill] sm:$0xff] %v8014_v36  ;;  %v3037_v45 = vpop.f32.mrf.mxu0  ;;  %v2820_v6 = vadd.f32 %v9899_v7, %v7837_v22  ;;  %v2166_v10 = vadd.f32 %v9901_v11, %v9872_v42  ;;  %v9903_v41 = vld [vmem:[#allocation22_spill] sm:$0xff]  ;;  %v8027_v54 = vadd.f32 %v9904_v58, %v2269_v0  ;;  %v9909_v58 = vld [vmem:[#allocation57_spill] sm:$0xff] }
 0x217   :  { %9890 = vst [vmem:[#allocation96_spill] sm:$0xff] %v8004_v55  ;;  %v8019_v53 = vadd.f32 %v3037_v45, %v2925_v27  ;;  %v3124_v56 = vadd.f32 %v3123_v59, %v8004_v55  ;;  %v3141_v20 = vadd.f32 %v9903_v41, %v9902_v32  ;;  %v2495_v2 = vadd.f32 %v9906_v43, %v7550_v14  ;;  %v9907_v45 = vld [vmem:[#allocation95_spill] sm:$0xff]  ;;  %v9911_v43 = vld [vmem:[#allocation58_spill] sm:$0xff] }
 0x218   :  { %9905 = vst [vmem:[#allocation99_spill] sm:$0xff] %v8027_v54  ;;  %v3039_v4 = vpop.f32.mrf.mxu0  ;;  %v2931_v27 = vadd.f32 %v7801_v3, %v2818_v46  ;;  %v2822_v59 = vadd.f32 %v9907_v45, %v7825_v13  ;;  %v3136_v41 = vadd.f32 %v3135_v29, %v8009_v1  ;;  %v8042_v32 = vadd.f32 %v9909_v58, %v2598_v9  ;;  %v9912_v55 = vld [vmem:[#allocation59_spill] sm:$0xff]  ;;  %v9914_v46 = vld [vmem:[#allocation109_spill] sm:$0xff] }
 0x219   :  { %9900 = vst [vmem:[#allocation51_spill] sm:$0xff] %v8019_v53  ;;  %v3130_v7 = vadd.f32 %v3129_v38, %v8019_v53  ;;  %v8037_v11 = vadd.f32 %v3039_v4, %v2927_v17  ;;  %3125 = vadd.xlane.f32.xlu0 %v3124_v56  ;;  %v3142_v0 = vadd.f32 %v3141_v20, %v8014_v36  ;;  %v9915_v45 = vld [vmem:[#allocation97_spill] sm:$0xff]  ;;  %v9917_v4 = vld [vmem:[#allocation24_spill] sm:$0xff]  ;;  %v9919_v36 = vld [vmem:[#allocation63_spill] sm:$0xff] }
 0x21a   :  { %9910 = vst [vmem:[#allocation6_spill] sm:$0xff] %v8042_v32  ;;  %v8046_v31 = vadd.f32 %v9912_v55, %v9911_v43  ;;  %v3043_v3 = vpop.f32.mrf.mxu0  ;;  %v2933_v35 = vadd.f32 %v9914_v46, %v2820_v6  ;;  %v2824_v38 = vadd.f32 %v9915_v45, %v7837_v22  ;;  %v9916_v29 = vld [vmem:[#allocation9_spill] sm:$0xff]  ;;  %v2608_v1 = vadd.f32 %v9919_v36, %v2495_v2  ;;  %v9920_v55 = vld [vmem:[#allocation62_spill] sm:$0xff]  ;;  %v9921_v43 = vld [vmem:[#allocation64_spill] sm:$0xff]  ;;  %v8063_v6 = vpop.f32.mrf.mxu1 }
 0x21b   :  { %9908 = vst [vmem:[#allocation92_spill] sm:$0xff] %v8037_v11  ;;  %v8051_v17 = vadd.f32 %v3043_v3, %v2931_v27  ;;  %v3131_v56 = vadd.f32 %v3130_v7, %v8037_v11  ;;  %v2176_v20 = vadd.f32 %v9916_v29, %v9872_v42  ;;  %v9918_v9 = vld [vmem:[#allocation25_spill] sm:$0xff]  ;;  %v8061_v53 = vadd.f32 %v9921_v43, %v9920_v55  ;;  %v9923_v45 = vld [vmem:[#allocation114_spill] sm:$0xff]  ;;  %v9926_v43 = vld [vmem:[#allocation60_spill] sm:$0xff] }
 0x21c   :  { %9913 = vst [vmem:[#allocation23_spill] sm:$0xff] %v8046_v31  ;;  %v3148_v58 = vadd.f32 %v9918_v9, %v9917_v4  ;;  %v3045_v46 = vpop.f32.mrf.mxu0  ;;  %v2935_v27 = vadd.f32 %v9923_v45, %v2822_v59  ;;  %v9924_v3 = vld [vmem:[#allocation98_spill] sm:$0xff]  ;;  %v3143_v2 = vadd.f32 %v3142_v0, %v8042_v32  ;;  %v9927_v4 = vld [vmem:[#allocation61_spill] sm:$0xff]  ;;  %v2937_v45 = vadd.f32 %v7844_v61, %v2824_v38 }
 0x21d   :  { %9922 = vst [vmem:[#allocation93_spill] sm:$0xff] %v8061_v53  ;;  %v2828_v7 = vadd.f32 %v9924_v3, %v7825_v13  ;;  %v3137_v11 = vadd.f32 %v3136_v41, %v8051_v17  ;;  %v8069_v29 = vadd.f32 %v3045_v46, %v2933_v35  ;;  %3132 = vadd.xlane.f32.xlu1 %v3131_v56  ;;  %v9925_v9 = vld [vmem:[#allocation26_spill] sm:$0xff]  ;;  %v9929_v3 = vld [vmem:[#allocation100_spill] sm:$0xff] }
 0x21e   :  { %v3155_v36 = vadd.f32 %v8027_v54, %v9925_v9  ;;  %v3149_v55 = vadd.f32 %v3148_v58, %v8046_v31  ;;  %v8077_v40 = vadd.f32 %v9927_v4, %v9926_v43  ;;  %v3047_v59 = vpop.f32.mrf.mxu0  ;;  %v2830_v41 = vadd.f32 %v9929_v3, %v7837_v22  ;;  %v9930_v54 = vld [vmem:[#allocation65_spill] sm:$0xff]  ;;  %v8089_v58 = vpop.f32.mrf.mxu1 }
 0x21f   :  { %v8082_v35 = vadd.f32 %v3047_v59, %v2935_v27  ;;  %v3138_v56 = vadd.f32 %v3137_v11, %v8069_v29  ;;  %v8087_v0 = vadd.f32 %v9930_v54, %v2608_v1  ;;  %v2941_v4 = vadd.f32 %v7865_v8, %v2828_v7  ;;  %v9932_v43 = vld [vmem:[#allocation101_spill] sm:$0xff]  ;;  %v9934_v27 = vld [vmem:[#allocation8_spill] sm:$0xff]  ;;  %v9935_v59 = vld [vmem:[#allocation10_spill] sm:$0xff] }
 0x220   :  { %9928 = vst [vmem:[#allocation52_spill] sm:$0xff] %v8077_v40  ;;  %v3156_v46 = vadd.f32 %v3155_v36, %v8061_v53  ;;  %v3049_v9 = vpop.f32.mrf.mxu0  ;;  %v2832_v61 = vadd.f32 %v9932_v43, %v7825_v13  ;;  %v2279_v11 = vadd.f32 %v9934_v27, %v2166_v10  ;;  %v2289_v36 = vadd.f32 %v9935_v59, %v2176_v20  ;;  %v9936_v1 = vld [vmem:[#allocation66_spill] sm:$0xff]  ;;  %v9937_v53 = vld [vmem:[#allocation67_spill] sm:$0xff]  ;;  %v9942_v20 = vld [vmem:[#allocation32_spill] sm:$0xff] }
 0x221   :  { %9931 = vst [vmem:[#allocation53_spill] sm:$0xff] %v8087_v0  ;;  %v3144_v38 = vadd.f32 %v3143_v2, %v8082_v35  ;;  %v8095_v3 = vadd.f32 %v3049_v9, %v2937_v45  ;;  %3139 = vadd.xlane.f32.xlu0 %v3138_v56  ;;  %v3150_v54 = vadd.f32 %v3149_v55, %v8077_v40  ;;  %v9939_v7 = vld [vmem:[#allocation102_spill] sm:$0xff]  ;;  %v9940_v45 = vld [vmem:[#allocation29_spill] sm:$0xff]  ;;  %v9951_v40 = vld [vmem:[#allocation72_spill] sm:$0xff] }
 0x222   :  { %v8102_v31 = vadd.f32 %v9937_v53, %v9936_v1  ;;  %v3053_v32 = vpop.f32.mrf.mxu0  ;;  %v2943_v8 = vadd.f32 %v7887_v26, %v2830_v41  ;;  %v2834_v43 = vadd.f32 %v9939_v7, %v7837_v22  ;;  %v9941_v10 = vld [vmem:[#allocation30_spill] sm:$0xff]  ;;  %v8113_v27 = vadd.f32 %v9942_v20, %v2279_v11  ;;  %v9944_v55 = vld [vmem:[#allocation33_spill] sm:$0xff]  ;;  %v8118_v1 = vpop.f32.mrf.mxu1  ;;  %v9946_v20 = vld [vmem:[#allocation68_spill] sm:$0xff] }
 0x223   :  { %9933 = vst [vmem:[#allocation55_spill] sm:$0xff] %v8095_v3  ;;  %v8107_v2 = vadd.f32 %v3053_v32, %v2941_v4  ;;  %v3145_v9 = vadd.f32 %v3144_v38, %v8095_v3  ;;  %v3162_v56 = vadd.f32 %v9941_v10, %v9940_v45  ;;  %v2505_v53 = vadd.f32 %v9944_v55, %v7550_v14  ;;  %v9945_v32 = vld [vmem:[#allocation103_spill] sm:$0xff]  ;;  %v9947_v10 = vld [vmem:[#allocation69_spill] sm:$0xff] }
 0x224   :  { %9938 = vst [vmem:[#allocation54_spill] sm:$0xff] %v8102_v31  ;;  %9943 = vst [vmem:[#allocation56_spill] sm:$0xff] %v8113_v27  ;;  %v3157_v59 = vadd.f32 %v3156_v46, %v8087_v0  ;;  %v3055_v26 = vpop.f32.mrf.mxu0  ;;  %v2945_v41 = vadd.f32 %v7915_v30, %v2832_v61  ;;  %v2838_v4 = vadd.f32 %v9945_v32, %v7825_v13  ;;  %v9949_v46 = vld [vmem:[#allocation71_spill] sm:$0xff]  ;;  %v9950_v0 = vld [vmem:[#allocation70_spill] sm:$0xff] }
 0x225   :  { %v3151_v38 = vadd.f32 %v3150_v54, %v8107_v2  ;;  %v8124_v7 = vadd.f32 %v3055_v26, %v2943_v8  ;;  %3146 = vadd.xlane.f32.xlu1 %v3145_v9  ;;  %v3163_v11 = vadd.f32 %v3162_v56, %v8102_v31  ;;  %v8129_v55 = vadd.f32 %v9947_v10, %v9946_v20  ;;  %v9953_v54 = vld [vmem:[#allocation105_spill] sm:$0xff]  ;;  %v9955_v56 = vld [vmem:[#allocation31_spill] sm:$0xff]  ;;  %v9956_v32 = vld [vmem:[#allocation38_spill] sm:$0xff] }
 0x226   :  { %v2618_v45 = vadd.f32 %v9949_v46, %v2505_v53  ;;  %v8134_v3 = vadd.f32 %v9951_v40, %v9950_v0  ;;  %v3057_v30 = vpop.f32.mrf.mxu0  ;;  %v2947_v61 = vadd.f32 %v7945_v50, %v2834_v43  ;;  %v2840_v8 = vadd.f32 %v9953_v54, %v7837_v22  ;;  %v9958_v53 = vld [vmem:[#allocation39_spill] sm:$0xff]  ;;  %v2964_v0 = vpop.f32.mrf.mxu1  ;;  %v9959_v43 = vld [vmem:[#allocation106_spill] sm:$0xff] }
 0x227   :  { %9948 = vst [vmem:[#allocation104_spill] sm:$0xff] %v8129_v55  ;;  %v8139_v26 = vadd.f32 %v3057_v30, %v2945_v41  ;;  %v3152_v9 = vadd.f32 %v3151_v38, %v8124_v7  ;;  %v3169_v10 = vadd.f32 %v8113_v27, %v9955_v56  ;;  %v8145_v20 = vadd.f32 %v9956_v32, %v2289_v36  ;;  %v9961_v32 = vld [vmem:[#allocation73_spill] sm:$0xff]  ;;  %v9963_v56 = vld [vmem:[#allocation75_spill] sm:$0xff] }
 0x228   :  { %9952 = vst [vmem:[#allocation94_spill] sm:$0xff] %v8134_v3  ;;  %v2515_v40 = vadd.f32 %v9958_v53, %v7550_v14  ;;  %v3059_v46 = vpop.f32.mrf.mxu0  ;;  %v2951_v50 = vadd.f32 %v7973_v24, %v2838_v4  ;;  %v2842_v54 = vadd.f32 %v9959_v43, %v7825_v13  ;;  %v3164_v38 = vadd.f32 %v3163_v11, %v8129_v55  ;;  %v9962_v53 = vld [vmem:[#allocation74_spill] sm:$0xff]  ;;  %v9965_v43 = vld [vmem:[#allocation107_spill] sm:$0xff] }
 0x229   :  { %9954 = vst [vmem:[#allocation7_spill] sm:$0xff] %v8139_v26  ;;  %9957 = vst [vmem:[#allocation27_spill] sm:$0xff] %v8145_v20  ;;  %v3158_v41 = vadd.f32 %v3157_v59, %v8139_v26  ;;  %v8153_v30 = vadd.f32 %v3059_v46, %v2947_v61  ;;  %3153 = vadd.xlane.f32.xlu0 %v3152_v9  ;;  %v3170_v36 = vadd.f32 %v3169_v10, %v8134_v3  ;;  %v9966_v11 = vld [vmem:[#allocation11_spill] sm:$0xff]  ;;  %v9967_v46 = vld [vmem:[#allocation34_spill] sm:$0xff] }
 0x22a   :  { %v8158_v27 = vadd.f32 %v9961_v32, %v2618_v45  ;;  %v8162_v31 = vadd.f32 %v9963_v56, %v9962_v53  ;;  %v3063_v24 = vpop.f32.mrf.mxu0  ;;  %v2953_v4 = vadd.f32 %v7998_v62, %v2840_v8  ;;  %v2844_v59 = vadd.f32 %v9965_v43, %v7837_v22  ;;  %v9968_v45 = vld [vmem:[#allocation35_spill] sm:$0xff]  ;;  %v9970_v56 = vld [vmem:[#allocation78_spill] sm:$0xff]  ;;  %v9971_v53 = vld [vmem:[#allocation80_spill] sm:$0xff]  ;;  %v2966_v62 = vpop.f32.mrf.mxu1 }
 0x22b   :  { %9960 = vst [vmem:[#allocation28_spill] sm:$0xff] %v8153_v30  ;;  %v8167_v61 = vadd.f32 %v3063_v24, %v2951_v50  ;;  %v3159_v9 = vadd.f32 %v3158_v41, %v8153_v30  ;;  %v2186_v10 = vadd.f32 %v9966_v11, %v9872_v42  ;;  %v3176_v32 = vadd.f32 %v9968_v45, %v9967_v46  ;;  %v9969_v3 = vld [vmem:[#allocation79_spill] sm:$0xff]  ;;  %v9973_v50 = vld [vmem:[#allocation108_spill] sm:$0xff]  ;;  %v9974_v42 = vld [vmem:[#allocation37_spill] sm:$0xff] }
 0x22c   :  { %9964 = vst [vmem:[#allocation95_spill] sm:$0xff] %v8162_v31  ;;  %v2628_v55 = vadd.f32 %v9969_v3, %v2515_v40  ;;  %v8177_v26 = vadd.f32 %v9971_v53, %v9970_v56  ;;  %v3065_v8 = vpop.f32.mrf.mxu0  ;;  %v2955_v43 = vadd.f32 %v8031_v49, %v2842_v54  ;;  %v2848_v24 = vadd.f32 %v9973_v50, %v7825_v13  ;;  %v9975_v56 = vld [vmem:[#allocation76_spill] sm:$0xff]  ;;  %v9976_v53 = vld [vmem:[#allocation77_spill] sm:$0xff]  ;;  %v9978_v50 = vld [vmem:[#allocation110_spill] sm:$0xff] }
 0x22d   :  { %v3165_v41 = vadd.f32 %v3164_v38, %v8167_v61  ;;  %v8183_v30 = vadd.f32 %v3065_v8, %v2953_v4  ;;  %3160 = vadd.xlane.f32.xlu1 %v3159_v9  ;;  %v3183_v11 = vadd.f32 %v8145_v20, %v9974_v42  ;;  %v3171_v3 = vadd.f32 %v3170_v36, %v8158_v27  ;;  %v9979_v20 = vld [vmem:[#allocation81_spill] sm:$0xff] }
 0x22e   :  { %9972 = vst [vmem:[#allocation57_spill] sm:$0xff] %v8177_v26  ;;  %v3177_v40 = vadd.f32 %v3176_v32, %v8162_v31  ;;  %v8191_v45 = vadd.f32 %v9976_v53, %v9975_v56  ;;  %v3067_v49 = vpop.f32.mrf.mxu0  ;;  %v2957_v54 = vadd.f32 %v8063_v6, %v2844_v59  ;;  %v2850_v38 = vadd.f32 %v9978_v50, %v7837_v22  ;;  %v2970_v32 = vpop.f32.mrf.mxu1  ;;  %v9981_v53 = vld [vmem:[#allocation112_spill] sm:$0xff]  ;;  %v9984_v50 = vld [vmem:[#allocation83_spill] sm:$0xff] }
 0x22f   :  { %v8196_v4 = vadd.f32 %v3067_v49, %v2955_v43  ;;  %v3166_v9 = vadd.f32 %v3165_v41, %v8183_v30  ;;  %v3184_v8 = vadd.f32 %v3183_v11, %v8177_v26  ;;  %v8201_v36 = vadd.f32 %v9979_v20, %v2628_v55  ;;  %v9982_v43 = vld [vmem:[#allocation12_spill] sm:$0xff]  ;;  %v9983_v11 = vld [vmem:[#allocation82_spill] sm:$0xff] }
 0x230   :  { %9977 = vst [vmem:[#allocation58_spill] sm:$0xff] %v8191_v45  ;;  %v3069_v42 = vpop.f32.mrf.mxu0  ;;  %v2961_v56 = vadd.f32 %v8089_v58, %v2848_v24  ;;  %v2852_v31 = vadd.f32 %v9981_v53, %v7825_v13  ;;  %v2299_v49 = vadd.f32 %v9982_v43, %v2186_v10  ;;  %v3178_v41 = vadd.f32 %v3177_v40, %v8191_v45  ;;  %v9985_v58 = vld [vmem:[#allocation115_spill] sm:$0xff]  ;;  %v9988_v10 = vld [vmem:[#allocation44_spill] sm:$0xff]  ;;  %v9989_v40 = vld [vmem:[#allocation45_spill] sm:$0xff]  ;;  %v2972_v45 = vpop.f32.mrf.mxu1 }
 0x231   :  { %9980 = vst [vmem:[#allocation59_spill] sm:$0xff] %v8201_v36  ;;  %v3172_v6 = vadd.f32 %v3171_v3, %v8196_v4  ;;  %v8207_v59 = vadd.f32 %v3069_v42, %v2957_v54  ;;  %3167 = vadd.xlane.f32.xlu0 %v3166_v9  ;;  %v8213_v55 = vadd.f32 %v9984_v50, %v9983_v11  ;;  %v9986_v3 = vld [vmem:[#allocation41_spill] sm:$0xff]  ;;  %v9987_v54 = vld [vmem:[#allocation42_spill] sm:$0xff] }
 0x232   :  { %v3073_v20 = vpop.f32.mrf.mxu0  ;;  %v2963_v26 = vadd.f32 %v8118_v1, %v2850_v38  ;;  %v2854_v24 = vadd.f32 %v9985_v58, %v7837_v22  ;;  %v3190_v9 = vadd.f32 %v9987_v54, %v9986_v3  ;;  %v8224_v43 = vadd.f32 %v9988_v10, %v2299_v49  ;;  %v9990_v49 = vld [vmem:[#allocation84_spill] sm:$0xff]  ;;  %v9991_v10 = vld [vmem:[#allocation85_spill] sm:$0xff] }
 0x233   :  { %v8218_v53 = vadd.f32 %v3073_v20, %v2961_v56  ;;  %v3173_v42 = vadd.f32 %v3172_v6, %v8207_v59  ;;  %v2525_v11 = vadd.f32 %v9989_v40, %v7550_v14  ;;  %v3185_v50 = vadd.f32 %v3184_v8, %v8201_v36  ;;  %v9992_v14 = vld [vmem:[#allocation87_spill] sm:$0xff]  ;;  %v9993_v8 = vld [vmem:[#allocation86_spill] sm:$0xff]  ;;  %v9994_v3 = vld [vmem:[#allocation88_spill] sm:$0xff] }
 0x234   :  { %v3075_v1 = vpop.f32.mrf.mxu0  ;;  %v2965_v38 = vadd.f32 %v2964_v0, %v2852_v31  ;;  %v2858_v56 = vadd.f32 %v7829_v12, %v7825_v13  ;;  %v3191_v58 = vadd.f32 %v3190_v9, %v8213_v55  ;;  %v8237_v54 = vadd.f32 %v9991_v10, %v9990_v49 }
 0x235   :  { %v3179_v20 = vadd.f32 %v3178_v41, %v8218_v53  ;;  %v8232_v6 = vadd.f32 %v3075_v1, %v2963_v26  ;;  %3174 = vadd.xlane.f32.xlu1 %v3173_v42  ;;  %v2638_v40 = vadd.f32 %v9992_v14, %v2525_v11  ;;  %v8242_v36 = vadd.f32 %v9994_v3, %v9993_v8  ;;  %v9995_v42 = vld [vmem:[#allocation43_spill] sm:$0xff]  ;;  %v2974_v1 = vpop.f32.mrf.mxu1 }
 0x236   :  { %v3077_v31 = vpop.f32.mrf.mxu0  ;;  %v2967_v0 = vadd.f32 %v2966_v62, %v2854_v24  ;;  %v2860_v12 = vadd.f32 %v7846_v18, %v7837_v22  ;;  %v3197_v9 = vadd.f32 %v8224_v43, %v9995_v42  ;;  %v2971_v10 = vadd.f32 %v2970_v32, %v2858_v56  ;;  %v9996_v24 = vld [vmem:[#allocation89_spill] sm:$0xff] }
 0x237   :  { %v8246_v26 = vadd.f32 %v3077_v31, %v2965_v38  ;;  %v3180_v41 = vadd.f32 %v3179_v20, %v8232_v6  ;;  %v2862_v11 = vadd.f32 %v7853_v33, %v7825_v13  ;;  %v3192_v18 = vadd.f32 %v3191_v58, %v8237_v54  ;;  %v2976_v33 = vpop.f32.mrf.mxu1 }
 0x238   :  { %v3079_v49 = vpop.f32.mrf.mxu0  ;;  %v3198_v62 = vadd.f32 %v3197_v9, %v8242_v36  ;;  %v8259_v38 = vadd.f32 %v9996_v24, %v2638_v40  ;;  %v2973_v8 = vadd.f32 %v2972_v45, %v2860_v12  ;;  %v2864_v32 = vadd.f32 %v7867_v57, %v7837_v22  ;;  %v5761_v24 = vld [vmem:[%s9608_s5 + $0x28] sm:$0xff]  }
 0x239   :  { %v3186_v3 = vadd.f32 %v3185_v50, %v8246_v26  ;;  %v8254_v14 = vadd.f32 %v3079_v49, %v2967_v0  ;;  %3181 = vadd.xlane.f32.xlu0 %v3180_v41  ;;  %v2975_v31 = vadd.f32 %v2974_v1, %v2862_v11  ;;  %v5757_v11 = vld [vmem:[%s9608_s5 + $0x38] sm:$0xff]  }
 0x23a   :  { %v3083_v20 = vpop.f32.mrf.mxu0  ;;  %v3199_v40 = vadd.f32 %v3198_v62, %v8259_v38  ;;  %v2977_v9 = vadd.f32 %v2976_v33, %v2864_v32  ;;  %v5760_v62 = vld [vmem:[%s9608_s5 + $0x68] sm:$0xff]   ;;  %v5765_v32 = vld [vmem:[%s9608_s5 + $0xf8] sm:$0xff]  }
 0x23b   :  { %v8263_v56 = vadd.f32 %v3083_v20, %v2971_v10  ;;  %v3187_v13 = vadd.f32 %v3186_v3, %v8254_v14  ;;  %v5756_v10 = vld [vmem:[%s9608_s5 + $0x78] sm:$0xff]   ;;  %v5758_v3 = vld [vmem:[%s9608_s5 + $0x70] sm:$0xff]   ;;  %v5762_v20 = vld [vmem:[%s9608_s5 + $0x60] sm:$0xff]   ;;  %5124 = vmatprep.subr.bf16.mxu0 %v5765_v32 }
 0x23c   :  { %v3085_v50 = vpop.f32.mrf.mxu0  ;;  %5060 = vmatprep.subr.bf16.mxu1 %v5756_v10 }
 0x23d   :  { %v3193_v0 = vadd.f32 %v3192_v18, %v8263_v56  ;;  %v8267_v58 = vadd.f32 %v3085_v50, %v2973_v8  ;;  %3188 = vadd.xlane.f32.xlu1 %v3187_v13  ;;  %5061 = vmatpush3.bf16.msra.mxu1 %v5757_v11  ;;  %v5759_v18 = vld [vmem:[%s9608_s5 + $0x30] sm:$0xff]   ;;  %v5763_v8 = vld [vmem:[%s9608_s5 + $0x20] sm:$0xff]   ;;  %v5764_v13 = vld [vmem:[%s9608_s5 + $0x58] sm:$0xff]  }
 0x23e   :  { %v3087_v41 = vpop.f32.mrf.mxu0  ;;  %5062 = vmatprep.subr.bf16.mxu1 %v5758_v3  ;;  %v9998_v3 = vld [vmem:[#allocation14_spill] sm:$0xff] }
 0x23f   :  { %v8270_v45 = vadd.f32 %v3087_v41, %v2975_v31  ;;  %v3194_v22 = vadd.f32 %v3193_v0, %v8267_v58  ;;  %v9997_v0 = vld [vmem:[#allocation13_spill] sm:$0xff] }
 0x240   :  { %v3089_v57 = vpop.f32.mrf.mxu0 }
 0x241   :  { %v3200_v12 = vadd.f32 %v3199_v40, %v8270_v45  ;;  %v8274_v49 = vadd.f32 %v3089_v57, %v2977_v9  ;;  %3195 = vadd.xlane.f32.xlu0 %v3194_v22  ;;  %5063 = vmatpush3.bf16.msra.mxu1 %v5759_v18 }
 0x242   :  { %5064 = vmatprep.subr.bf16.mxu1 %v5760_v62 }
 0x243   :  { %v3201_v1 = vadd.f32 %v3200_v12, %v8274_v49 }
 0x245   :  { %3202 = vadd.xlane.f32.xlu1 %v3201_v1  ;;  %5065 = vmatpush3.bf16.msra.mxu1 %v5761_v24 }
 0x246   :  { %5066 = vmatprep.subr.bf16.mxu1 %v5762_v20 }
 0x249   :  { %5067 = vmatpush3.bf16.msra.mxu1 %v5763_v8 }
 0x24a   :  { %5068 = vmatprep.subr.bf16.mxu1 %v5764_v13 }
 0x292   :  { %v3098_v33 = vpop.xlane.xlu0 %3097 }
 0x293   :  { %v3205_v50 = vmul.f32 0.0013020834, %v3098_v33 }
 0x295   :  { %v8308_v31 = vsub.f32 %v7348_v48, %v3205_v50  ;;  %v8311_v41 = vsub.f32 %v9997_v0, %v3205_v50  ;;  %v8314_v40 = vsub.f32 %v7833_v16, %v3205_v50  ;;  %v8317_v22 = vsub.f32 %v7858_v19, %v3205_v50 }
 0x296   :  { %v3105_v9 = vpop.xlane.xlu0 %3104  ;;  %v8320_v57 = vsub.f32 %v7880_v52, %v3205_v50  ;;  %v8327_v10 = vsub.f32 %v7892_v39, %v3205_v50 }
 0x297   :  { %v3206_v12 = vmul.f32 0.0013020834, %v3105_v9  ;;  %v3317_v1 = vmul.f32 %v8308_v31, %v8308_v31  ;;  %v3318_v48 = vmul.f32 %v8311_v41, %v8311_v41  ;;  %v3319_v16 = vmul.f32 %v8314_v40, %v8314_v40 }
 0x298   :  { %v3320_v24 = vmul.f32 %v8317_v22, %v8317_v22  ;;  %v3321_v39 = vmul.f32 %v8320_v57, %v8320_v57 }
 0x299   :  { %v3413_v11 = vadd.f32 %v3318_v48, %v3317_v1  ;;  %v8332_v19 = vsub.f32 %v7361_v21, %v3206_v12  ;;  %v8335_v52 = vsub.f32 %v9998_v3, %v3206_v12  ;;  %v8338_v18 = vsub.f32 %v7842_v63, %v3206_v12 }
 0x29a   :  { %v3112_v62 = vpop.xlane.xlu1 %3111  ;;  %v8345_v20 = vsub.f32 %v7863_v37, %v3206_v12  ;;  %v3322_v63 = vmul.f32 %v8327_v10, %v8327_v10  ;;  %v8354_v33 = vsub.f32 %v7908_v47, %v3206_v12  ;;  %v8357_v50 = vsub.f32 %v7921_v44, %v3206_v12 }
 0x29b   :  { %v3207_v8 = vmul.f32 0.0013020834, %v3112_v62  ;;  %v3414_v32 = vadd.f32 %v3413_v11, %v3319_v16  ;;  %v3323_v21 = vmul.f32 %v8332_v19, %v8332_v19  ;;  %v3324_v13 = vmul.f32 %v8335_v52, %v8335_v52 }
 0x29c   :  { %v3325_v37 = vmul.f32 %v8338_v18, %v8338_v18  ;;  %v3326_v11 = vmul.f32 %v8345_v20, %v8345_v20 }
 0x29d   :  { %v3415_v0 = vadd.f32 %v3414_v32, %v3320_v24  ;;  %v3420_v9 = vadd.f32 %v3324_v13, %v3323_v21  ;;  %v8362_v1 = vsub.f32 %v7374_v34, %v3207_v8  ;;  %v8365_v48 = vsub.f32 %v7382_v5, %v3207_v8 }
 0x29e   :  { %v3119_v16 = vpop.xlane.xlu1 %3118  ;;  %v8370_v47 = vsub.f32 %v7874_v15, %v3207_v8  ;;  %v8373_v44 = vsub.f32 %v7898_v51, %v3207_v8  ;;  %v8376_v12 = vsub.f32 %v7935_v28, %v3207_v8  ;;  %v3327_v24 = vmul.f32 %v8354_v33, %v8354_v33 }
 0x29f   :  { %9999 = vst [vmem:[#allocation109_spill] sm:$0xff] %v8362_v1  ;;  %10000 = vst [vmem:[#allocation97_spill] sm:$0xff] %v8365_v48  ;;  %v3208_v3 = vmul.f32 0.0013020834, %v3119_v16  ;;  %v3416_v62 = vadd.f32 %v3415_v0, %v3321_v39  ;;  %v3421_v34 = vadd.f32 %v3420_v9, %v3325_v37  ;;  %v3329_v5 = vmul.f32 %v8362_v1, %v8362_v1 }
 0x2a0   :  { %10001 = vst [vmem:[#allocation9_spill] sm:$0xff] %v8370_v47  ;;  %10002 = vst [vmem:[#allocation63_spill] sm:$0xff] %v8373_v44  ;;  %v3328_v32 = vmul.f32 %v8357_v50, %v8357_v50  ;;  %v8385_v15 = vsub.f32 %v7950_v60, %v3207_v8  ;;  %v3330_v51 = vmul.f32 %v8365_v48, %v8365_v48  ;;  %v10007_v60 = vld [vmem:[#allocation116_spill] sm:$0xff] }
 0x2a1   :  { %10003 = vst [vmem:[#allocation62_spill] sm:$0xff] %v8376_v12  ;;  %v3417_v28 = vadd.f32 %v3416_v62, %v3322_v63  ;;  %v3422_v21 = vadd.f32 %v3421_v34, %v3326_v11  ;;  %v3331_v39 = vmul.f32 %v8370_v47, %v8370_v47  ;;  %v8392_v13 = vsub.f32 %v7387_v23, %v3208_v3  ;;  %v10009_v62 = vld [vmem:[#allocation117_spill] sm:$0xff] }
 0x2a2   :  { %10004 = vst [vmem:[#allocation64_spill] sm:$0xff] %v8385_v15  ;;  %v3126_v37 = vpop.xlane.xlu0 %3125  ;;  %v3332_v0 = vmul.f32 %v8373_v44, %v8373_v44  ;;  %v3427_v9 = vadd.f32 %v3330_v51, %v3329_v5  ;;  %v8397_v16 = vsub.f32 %v7392_v25, %v3208_v3  ;;  %v8400_v8 = vsub.f32 %v10007_v60, %v3208_v3 }
 0x2a3   :  { %10005 = vst [vmem:[#allocation114_spill] sm:$0xff] %v8392_v13  ;;  %v3209_v1 = vmul.f32 0.0013020834, %v3126_v37  ;;  %3418 = vadd.xlane.f32.xlu0 %v3417_v28  ;;  %v3423_v63 = vadd.f32 %v3422_v21, %v3327_v24  ;;  %v3333_v11 = vmul.f32 %v8376_v12, %v8376_v12  ;;  %v8405_v23 = vsub.f32 %v10009_v62, %v3208_v3  ;;  %v10011_v37 = vld [vmem:[#allocation47_spill] sm:$0xff]  ;;  %v10013_v24 = vld [vmem:[#allocation4_spill] sm:$0xff] }
 0x2a4   :  { %10006 = vst [vmem:[#allocation98_spill] sm:$0xff] %v8397_v16  ;;  %10008 = vst [vmem:[#allocation60_spill] sm:$0xff] %v8400_v8  ;;  %v3334_v34 = vmul.f32 %v8385_v15, %v8385_v15  ;;  %v3428_v47 = vadd.f32 %v3427_v9, %v3331_v39  ;;  %v3335_v25 = vmul.f32 %v8392_v13, %v8392_v13  ;;  %v10015_v39 = vld [vmem:[#allocation15_spill] sm:$0xff]  ;;  %v10017_v13 = vld [vmem:[#allocation16_spill] sm:$0xff] }
 0x2a5   :  { %10010 = vst [vmem:[#allocation61_spill] sm:$0xff] %v8405_v23  ;;  %v3336_v5 = vmul.f32 %v8397_v16, %v8397_v16  ;;  %v3424_v51 = vadd.f32 %v3423_v63, %v3328_v32  ;;  %v8414_v28 = vsub.f32 %v10011_v37, %v3208_v3  ;;  %v8417_v21 = vsub.f32 %v10013_v24, %v3208_v3  ;;  %v10019_v63 = vld [vmem:[#allocation118_spill] sm:$0xff] }
 0x2a6   :  { %v3337_v60 = vmul.f32 %v8400_v8, %v8400_v8  ;;  %v3133_v62 = vpop.xlane.xlu1 %3132  ;;  %v3429_v12 = vadd.f32 %v3428_v47, %v3332_v0  ;;  %v8422_v9 = vsub.f32 %v10015_v39, %v3209_v1  ;;  %v8425_v44 = vsub.f32 %v10017_v13, %v3209_v1  ;;  %v10021_v37 = vld [vmem:[#allocation46_spill] sm:$0xff]  ;;  %v10023_v0 = vld [vmem:[#allocation49_spill] sm:$0xff] }
 0x2a7   :  { %10012 = vst [vmem:[#allocation100_spill] sm:$0xff] %v8414_v28  ;;  %10014 = vst [vmem:[#allocation65_spill] sm:$0xff] %v8417_v21  ;;  %v3434_v15 = vadd.f32 %v3336_v5, %v3335_v25  ;;  %v3210_v16 = vmul.f32 0.0013020834, %v3133_v62  ;;  %3425 = vadd.xlane.f32.xlu1 %v3424_v51  ;;  %v3338_v32 = vmul.f32 %v8405_v23, %v8405_v23  ;;  %v10025_v62 = vld [vmem:[#allocation96_spill] sm:$0xff]  ;;  %v10029_v23 = vld [vmem:[#allocation18_spill] sm:$0xff] }
 0x2a8   :  { %10016 = vst [vmem:[#allocation101_spill] sm:$0xff] %v8422_v9  ;;  %10018 = vst [vmem:[#allocation8_spill] sm:$0xff] %v8425_v44  ;;  %v8430_v3 = vsub.f32 %v10019_v63, %v3209_v1  ;;  %v8433_v24 = vsub.f32 %v10021_v37, %v3209_v1  ;;  %v3430_v8 = vadd.f32 %v3429_v12, %v3333_v11  ;;  %v10027_v37 = vld [vmem:[#allocation17_spill] sm:$0xff] }
 0x2a9   :  { %v3435_v47 = vadd.f32 %v3434_v15, %v3337_v60  ;;  %v8436_v25 = vsub.f32 %v10023_v0, %v3209_v1  ;;  %v3341_v13 = vmul.f32 %v8422_v9, %v8422_v9  ;;  %v3339_v5 = vmul.f32 %v8414_v28, %v8414_v28 }
 0x2aa   :  { %10020 = vst [vmem:[#allocation10_spill] sm:$0xff] %v8430_v3  ;;  %10022 = vst [vmem:[#allocation66_spill] sm:$0xff] %v8433_v24  ;;  %v3340_v51 = vmul.f32 %v8417_v21, %v8417_v21  ;;  %v8445_v39 = vsub.f32 %v10025_v62, %v3209_v1  ;;  %v3342_v63 = vmul.f32 %v8425_v44, %v8425_v44  ;;  %v3140_v12 = vpop.xlane.xlu0 %3139  ;;  %v10031_v21 = vld [vmem:[#allocation48_spill] sm:$0xff]  ;;  %v10049_v44 = vld [vmem:[#allocation22_spill] sm:$0xff] }
 0x2ab   :  { %10024 = vst [vmem:[#allocation67_spill] sm:$0xff] %v8436_v25  ;;  %v3431_v15 = vadd.f32 %v3430_v8, %v3334_v34  ;;  %v3436_v11 = vadd.f32 %v3435_v47, %v3338_v32  ;;  %v3343_v60 = vmul.f32 %v8430_v3, %v8430_v3  ;;  %v8452_v0 = vsub.f32 %v10027_v37, %v3210_v16  ;;  %v10033_v32 = vld [vmem:[#allocation90_spill] sm:$0xff]  ;;  %v10037_v37 = vld [vmem:[#allocation92_spill] sm:$0xff] }
 0x2ac   :  { %10026 = vst [vmem:[#allocation102_spill] sm:$0xff] %v8445_v39  ;;  %v3211_v9 = vmul.f32 0.0013020834, %v3140_v12  ;;  %v3441_v28 = vadd.f32 %v3342_v63, %v3341_v13  ;;  %v8455_v48 = vsub.f32 %v10029_v23, %v3210_v16  ;;  %v8458_v1 = vsub.f32 %v10031_v21, %v3210_v16 }
 0x2ad   :  { %10028 = vst [vmem:[#allocation32_spill] sm:$0xff] %v8452_v0  ;;  %3432 = vadd.xlane.f32.xlu0 %v3431_v15  ;;  %v3437_v62 = vadd.f32 %v3436_v11, %v3339_v5  ;;  %v3344_v8 = vmul.f32 %v8433_v24, %v8433_v24  ;;  %v3345_v34 = vmul.f32 %v8436_v25, %v8436_v25  ;;  %v10035_v15 = vld [vmem:[#allocation51_spill] sm:$0xff] }
 0x2ae   :  { %10030 = vst [vmem:[#allocation33_spill] sm:$0xff] %v8455_v48  ;;  %10032 = vst [vmem:[#allocation103_spill] sm:$0xff] %v8458_v1  ;;  %v8465_v47 = vsub.f32 %v10033_v32, %v3210_v16  ;;  %v3346_v13 = vmul.f32 %v8445_v39, %v8445_v39  ;;  %v3442_v63 = vadd.f32 %v3441_v28, %v3343_v60  ;;  %v3147_v5 = vpop.xlane.xlu1 %3146  ;;  %v10039_v39 = vld [vmem:[#allocation19_spill] sm:$0xff] }
 0x2af   :  { %v3347_v23 = vmul.f32 %v8452_v0, %v8452_v0  ;;  %v3348_v21 = vmul.f32 %v8455_v48, %v8455_v48  ;;  %v3438_v12 = vadd.f32 %v3437_v62, %v3340_v51  ;;  %v8474_v11 = vsub.f32 %v10035_v15, %v3210_v16  ;;  %v10041_v51 = vld [vmem:[#allocation20_spill] sm:$0xff]  ;;  %v10042_v15 = vld [vmem:[#allocation5_spill] sm:$0xff] }
 0x2b0   :  { %10034 = vst [vmem:[#allocation68_spill] sm:$0xff] %v8465_v47  ;;  %v8477_v25 = vsub.f32 %v10037_v37, %v3210_v16  ;;  %v3349_v32 = vmul.f32 %v8458_v1, %v8458_v1  ;;  %v3443_v3 = vadd.f32 %v3442_v63, %v3344_v8  ;;  %v3350_v28 = vmul.f32 %v8465_v47, %v8465_v47  ;;  %v10044_v16 = vld [vmem:[#allocation91_spill] sm:$0xff]  ;;  %v10047_v47 = vld [vmem:[#allocation21_spill] sm:$0xff] }
 0x2b1   :  { %10036 = vst [vmem:[#allocation69_spill] sm:$0xff] %v8474_v11  ;;  %v3448_v60 = vadd.f32 %v3348_v21, %v3347_v23  ;;  %v8484_v0 = vsub.f32 %v10039_v39, %v3211_v9  ;;  %v3212_v48 = vmul.f32 0.0013020834, %v3147_v5  ;;  %3439 = vadd.xlane.f32.xlu1 %v3438_v12  ;;  %v8487_v62 = vsub.f32 %v10041_v51, %v3211_v9  ;;  %v5766_v23 = vld [vmem:[%s9608_s5 + $0x18] sm:$0xff]   ;;  %v5768_v5 = vld [vmem:[%s9608_s5 + $0xf0] sm:$0xff]  }
 0x2b2   :  { %10038 = vst [vmem:[#allocation71_spill] sm:$0xff] %v8477_v25  ;;  %v8490_v24 = vsub.f32 %v10042_v15, %v3211_v9  ;;  %v8493_v37 = vsub.f32 %v10044_v16, %v3211_v9  ;;  %v3444_v1 = vadd.f32 %v3443_v3, %v3345_v34  ;;  %v8496_v63 = vsub.f32 %v8051_v17, %v3211_v9  ;;  %v5767_v21 = vld [vmem:[%s9608_s5 + $0xb8] sm:$0xff]   ;;  %v3154_v3 = vpop.xlane.xlu0 %3153 }
 0x2b3   :  { %10040 = vst [vmem:[#allocation70_spill] sm:$0xff] %v8484_v0  ;;  %v3449_v8 = vadd.f32 %v3448_v60, %v3349_v32  ;;  %v3353_v39 = vmul.f32 %v8484_v0, %v8484_v0  ;;  %v3351_v17 = vmul.f32 %v8474_v11, %v8474_v11  ;;  %v3352_v34 = vmul.f32 %v8477_v25, %v8477_v25 }
 0x2b4   :  { %10043 = vst [vmem:[#allocation72_spill] sm:$0xff] %v8490_v24  ;;  %10045 = vst [vmem:[#allocation105_spill] sm:$0xff] %v8496_v63  ;;  %v8514_v12 = vsub.f32 %v8069_v29, %v3211_v9  ;;  %v3354_v32 = vmul.f32 %v8487_v62, %v8487_v62  ;;  %v3213_v60 = vmul.f32 0.0013020834, %v3154_v3  ;;  %v3445_v51 = vadd.f32 %v3444_v1, %v3346_v13  ;;  %v10050_v29 = vld [vmem:[#allocation50_spill] sm:$0xff] }
 0x2b5   :  { %v3450_v15 = vadd.f32 %v3449_v8, %v3350_v28  ;;  %v3355_v16 = vmul.f32 %v8490_v24, %v8490_v24  ;;  %5069 = vmatpush3.bf16.msra.mxu1 %v5766_v23  ;;  %5125 = vmatpush3.bf16.msra.mxu0 %v5767_v21  ;;  %v8521_v11 = vsub.f32 %v10047_v47, %v3212_v48  ;;  %v10052_v28 = vld [vmem:[#allocation6_spill] sm:$0xff]  ;;  %v5770_v47 = vld [vmem:[%s9608_s5 + $0x50] sm:$0xff]  }
 0x2b6   :  { %10046 = vst [vmem:[#allocation38_spill] sm:$0xff] %v8514_v12  ;;  %v3455_v0 = vadd.f32 %v3354_v32, %v3353_v39  ;;  %v8524_v25 = vsub.f32 %v10049_v44, %v3212_v48  ;;  %v8527_v9 = vsub.f32 %v10050_v29, %v3212_v48  ;;  %5126 = vmatprep.subr.bf16.mxu0 %v5768_v5  ;;  %v5769_v44 = vld [vmem:[%s9608_s5 + $0xb0] sm:$0xff]   ;;  %v5771_v39 = vld [vmem:[%s9608_s5 + $0xe8] sm:$0xff]   ;;  %v3161_v23 = vpop.xlane.xlu1 %3160 }
 0x2b7   :  { %10048 = vst [vmem:[#allocation39_spill] sm:$0xff] %v8521_v11  ;;  %3446 = vadd.xlane.f32.xlu0 %v3445_v51  ;;  %v3451_v3 = vadd.f32 %v3450_v15, %v3351_v17  ;;  %v3356_v1 = vmul.f32 %v8493_v37, %v8493_v37  ;;  %v3357_v13 = vmul.f32 %v8496_v63, %v8496_v63  ;;  %v10054_v29 = vld [vmem:[#allocation55_spill] sm:$0xff] }
 0x2b8   :  { %10051 = vst [vmem:[#allocation106_spill] sm:$0xff] %v8527_v9  ;;  %v8534_v8 = vsub.f32 %v10052_v28, %v3212_v48  ;;  %v3358_v21 = vmul.f32 %v8514_v12, %v8514_v12  ;;  %v3456_v5 = vadd.f32 %v3455_v0, %v3355_v16  ;;  %v3359_v17 = vmul.f32 %v8521_v11, %v8521_v11  ;;  %v10056_v16 = vld [vmem:[#allocation24_spill] sm:$0xff] }
 0x2b9   :  { %v3360_v32 = vmul.f32 %v8524_v25, %v8524_v25  ;;  %v3452_v51 = vadd.f32 %v3451_v3, %v3352_v34  ;;  %v8552_v15 = vsub.f32 %v8082_v35, %v3212_v48  ;;  %v8555_v28 = vsub.f32 %v10054_v29, %v3212_v48  ;;  %5127 = vmatpush3.bf16.msra.mxu0 %v5769_v44  ;;  %v10058_v34 = vld [vmem:[#allocation25_spill] sm:$0xff]  ;;  %v10060_v48 = vld [vmem:[#allocation23_spill] sm:$0xff]  ;;  %v10062_v29 = vld [vmem:[#allocation52_spill] sm:$0xff] }
 0x2ba   :  { %5070 = vmatprep.subr.bf16.mxu1 %v5770_v47  ;;  %v3457_v63 = vadd.f32 %v3456_v5, %v3356_v1  ;;  %v3361_v12 = vmul.f32 %v8527_v9, %v8527_v9  ;;  %v8560_v24 = vsub.f32 %v10056_v16, %v3213_v60  ;;  %5128 = vmatprep.subr.bf16.mxu0 %v5771_v39  ;;  %v3214_v11 = vmul.f32 0.0013020834, %v3161_v23  ;;  %v3168_v1 = vpop.xlane.xlu0 %3167  ;;  %v5772_v23 = vld [vmem:[%s9608_s5 + $0x10] sm:$0xff]  }
 0x2bb   :  { %10053 = vst [vmem:[#allocation73_spill] sm:$0xff] %v8552_v15  ;;  %10055 = vst [vmem:[#allocation74_spill] sm:$0xff] %v8555_v28  ;;  %v3462_v0 = vadd.f32 %v3360_v32, %v3359_v17  ;;  %3453 = vadd.xlane.f32.xlu1 %v3452_v51  ;;  %v3362_v35 = vmul.f32 %v8534_v8, %v8534_v8  ;;  %v8565_v3 = vsub.f32 %v10058_v34, %v3213_v60  ;;  %v5773_v32 = vld [vmem:[%s9608_s5 + $0xa8] sm:$0xff]  }
 0x2bc   :  { %10057 = vst [vmem:[#allocation75_spill] sm:$0xff] %v8560_v24  ;;  %v8568_v44 = vsub.f32 %v10060_v48, %v3213_v60  ;;  %v3458_v47 = vadd.f32 %v3457_v63, %v3357_v13  ;;  %v8571_v17 = vsub.f32 %v10062_v29, %v3213_v60  ;;  %v3365_v39 = vmul.f32 %v8560_v24, %v8560_v24 }
 0x2bd   :  { %10059 = vst [vmem:[#allocation107_spill] sm:$0xff] %v8565_v3  ;;  %v3463_v5 = vadd.f32 %v3462_v0, %v3361_v12  ;;  %v3363_v51 = vmul.f32 %v8552_v15, %v8552_v15  ;;  %v8584_v63 = vsub.f32 %v8107_v2, %v3213_v60  ;;  %v8587_v12 = vsub.f32 %v8124_v7, %v3213_v60  ;;  %v5774_v0 = vld [vmem:[%s9608_s5 + $0xe0] sm:$0xff]   ;;  %v10068_v7 = vld [vmem:[#allocation99_spill] sm:$0xff] }
 0x2be   :  { %10061 = vst [vmem:[#allocation11_spill] sm:$0xff] %v8568_v44  ;;  %10063 = vst [vmem:[#allocation34_spill] sm:$0xff] %v8571_v17  ;;  %v3366_v13 = vmul.f32 %v8565_v3, %v8565_v3  ;;  %v8594_v16 = vmul.f32 0.0013020834, %v3168_v1  ;;  %v3459_v34 = vadd.f32 %v3458_v47, %v3358_v21  ;;  %v3367_v29 = vmul.f32 %v8568_v44, %v8568_v44  ;;  %v10066_v15 = vld [vmem:[#allocation26_spill] sm:$0xff]  ;;  %v10070_v3 = vld [vmem:[#allocation93_spill] sm:$0xff] }
 0x2bf   :  { %10064 = vst [vmem:[#allocation79_spill] sm:$0xff] %v8584_v63  ;;  %10065 = vst [vmem:[#allocation78_spill] sm:$0xff] %v8587_v12  ;;  %v3464_v48 = vadd.f32 %v3463_v5, %v3362_v35  ;;  %5071 = vmatpush3.bf16.msra.mxu1 %v5772_v23  ;;  %v8599_v24 = vsub.f32 %v10066_v15, %v3214_v11  ;;  %v8602_v60 = vsub.f32 %v10068_v7, %v3214_v11  ;;  %v10072_v47 = vld [vmem:[#allocation53_spill] sm:$0xff]  ;;  %v5775_v15 = vld [vmem:[%s9608_s5 + $0xa0] sm:$0xff]  }
 0x2c0   :  { %v3469_v2 = vadd.f32 %v3366_v13, %v3365_v39  ;;  %v8605_v9 = vsub.f32 %v10070_v3, %v3214_v11  ;;  %5129 = vmatpush3.bf16.msra.mxu0 %v5773_v32  ;;  %3460 = vadd.xlane.f32.xlu0 %v3459_v34  ;;  %v3364_v21 = vmul.f32 %v8555_v28, %v8555_v28  ;;  %v5776_v3 = vld [vmem:[%s9608_s5 + $0x48] sm:$0xff]   ;;  %v3175_v39 = vpop.xlane.xlu1 %3174 }
 0x2c1   :  { %10067 = vst [vmem:[#allocation80_spill] sm:$0xff] %v8599_v24  ;;  %10069 = vst [vmem:[#allocation108_spill] sm:$0xff] %v8602_v60  ;;  %v3465_v35 = vadd.f32 %v3464_v48, %v3363_v51  ;;  %v3368_v1 = vmul.f32 %v8571_v17, %v8571_v17  ;;  %v8612_v5 = vsub.f32 %v10072_v47, %v3214_v11  ;;  %v10074_v32 = vld [vmem:[#allocation7_spill] sm:$0xff]  ;;  %5130 = vmatprep.subr.bf16.mxu0 %v5774_v0  ;;  %v5777_v48 = vld [vmem:[%s9608_s5 + $0xd8] sm:$0xff]  }
 0x2c2   :  { %10071 = vst [vmem:[#allocation76_spill] sm:$0xff] %v8605_v9  ;;  %v3470_v23 = vadd.f32 %v3469_v2, %v3367_v29  ;;  %v8621_v13 = vsub.f32 %v10074_v32, %v3214_v11  ;;  %v3371_v51 = vmul.f32 %v8599_v24, %v8599_v24  ;;  %v3372_v34 = vmul.f32 %v8602_v60, %v8602_v60  ;;  %v10076_v2 = vld [vmem:[#allocation28_spill] sm:$0xff]  ;;  %v10078_v60 = vld [vmem:[#allocation29_spill] sm:$0xff]  ;;  %v10086_v17 = vld [vmem:[#allocation94_spill] sm:$0xff] }
 0x2c3   :  { %10073 = vst [vmem:[#allocation77_spill] sm:$0xff] %v8612_v5  ;;  %v3466_v7 = vadd.f32 %v3465_v35, %v3364_v21  ;;  %v3369_v47 = vmul.f32 %v8584_v63, %v8584_v63  ;;  %v3370_v29 = vmul.f32 %v8587_v12, %v8587_v12  ;;  %v8635_v32 = vsub.f32 %v10076_v2, %v3214_v11  ;;  %v3182_v35 = vpop.xlane.xlu0 %3181  ;;  %v10080_v11 = vld [vmem:[#allocation30_spill] sm:$0xff] }
 0x2c4   :  { %10075 = vst [vmem:[#allocation110_spill] sm:$0xff] %v8621_v13  ;;  %5072 = vmatprep.subr.bf16.mxu1 %v5776_v3  ;;  %v3471_v28 = vadd.f32 %v3470_v23, %v3368_v1  ;;  %v3373_v24 = vmul.f32 %v8605_v9, %v8605_v9  ;;  %v3476_v0 = vadd.f32 %v3372_v34, %v3371_v51  ;;  %v3216_v21 = vmul.f32 0.0013020834, %v3175_v39  ;;  %v10081_v1 = vld [vmem:[#allocation54_spill] sm:$0xff]  ;;  %v5778_v34 = vld [vmem:[%s9608_s5 + $0x8] sm:$0xff]  }
 0x2c5   :  { %10077 = vst [vmem:[#allocation81_spill] sm:$0xff] %v8635_v32  ;;  %v8641_v44 = vsub.f32 %v10078_v60, %v8594_v16  ;;  %5131 = vmatpush3.bf16.msra.mxu0 %v5775_v15  ;;  %3467 = vadd.xlane.f32.xlu1 %v3466_v7  ;;  %v3374_v63 = vmul.f32 %v8612_v5, %v8612_v5  ;;  %v10082_v15 = vld [vmem:[#allocation104_spill] sm:$0xff]  ;;  %v5779_v7 = vld [vmem:[%s9608_s5 + $0x98] sm:$0xff]  }
 0x2c6   :  { %v8647_v2 = vsub.f32 %v10080_v11, %v8594_v16  ;;  %v8651_v3 = vsub.f32 %v10081_v1, %v8594_v16  ;;  %v3472_v23 = vadd.f32 %v3471_v28, %v3369_v47  ;;  %v3375_v60 = vmul.f32 %v8621_v13, %v8621_v13  ;;  %5132 = vmatprep.subr.bf16.mxu0 %v5777_v48  ;;  %v5780_v28 = vld [vmem:[%s9608_s5 + $0xd0] sm:$0xff]  }
 0x2c7   :  { %10079 = vst [vmem:[#allocation112_spill] sm:$0xff] %v8641_v44  ;;  %v3477_v51 = vadd.f32 %v3476_v0, %v3373_v24  ;;  %v8657_v39 = vsub.f32 %v10082_v15, %v8594_v16  ;;  %v3376_v24 = vmul.f32 %v8635_v32, %v8635_v32  ;;  %v8672_v47 = vsub.f32 %v8167_v61, %v8594_v16  ;;  %v10084_v32 = vld [vmem:[#allocation31_spill] sm:$0xff]  ;;  %v10085_v61 = vld [vmem:[#allocation56_spill] sm:$0xff] }
 0x2c8   :  { %v3377_v48 = vmul.f32 %v8641_v44, %v8641_v44  ;;  %v3378_v0 = vmul.f32 %v8647_v2, %v8647_v2  ;;  %v8678_v11 = vmul.f32 0.0013020834, %v3182_v35  ;;  %v3473_v1 = vadd.f32 %v3472_v23, %v3370_v29  ;;  %5073 = vmatpush3.bf16.msra.mxu1 %v5778_v34  ;;  %v5783_v23 = vld [vmem:[%s9608_s5 + $0xc8] sm:$0xff]  }
 0x2c9   :  { %10083 = vst [vmem:[#allocation12_spill] sm:$0xff] %v8672_v47  ;;  %v3478_v15 = vadd.f32 %v3477_v51, %v3374_v63  ;;  %v3379_v13 = vmul.f32 %v8651_v3, %v8651_v3  ;;  %v8683_v9 = vsub.f32 %v10084_v32, %v3216_v21  ;;  %v8686_v5 = vsub.f32 %v10085_v61, %v3216_v21  ;;  %v5781_v32 = vld [vmem:[%s9608_s5 + $0x90] sm:$0xff]   ;;  %v10093_v61 = vld [vmem:[#allocation95_spill] sm:$0xff] }
 0x2ca   :  { %v3483_v12 = vadd.f32 %v3378_v0, %v3377_v48  ;;  %v8689_v44 = vsub.f32 %v10086_v17, %v3216_v21  ;;  %5133 = vmatpush3.bf16.msra.mxu0 %v5779_v7  ;;  %3474 = vadd.xlane.f32.xlu0 %v3473_v1  ;;  %v8693_v63 = vsub.f32 %v8183_v30, %v8594_v16  ;;  %v5782_v17 = vld [vmem:[%s9608_s5 + $0x40] sm:$0xff]  }
 0x2cb   :  { %v3479_v35 = vadd.f32 %v3478_v15, %v3375_v60  ;;  %v3380_v29 = vmul.f32 %v8657_v39, %v8657_v39  ;;  %5134 = vmatprep.subr.bf16.mxu0 %v5780_v28  ;;  %v3189_v60 = vpop.xlane.xlu1 %3188  ;;  %v8707_v30 = vsub.f32 %v8158_v27, %v3216_v21  ;;  %v3383_v16 = vmul.f32 %v8683_v9, %v8683_v9  ;;  %v3196_v15 = vpop.xlane.xlu0 %3195 }
 0x2cc   :  { %10087 = vst [vmem:[#allocation82_spill] sm:$0xff] %v8693_v63  ;;  %v3484_v51 = vadd.f32 %v3483_v12, %v3379_v13  ;;  %v3384_v34 = vmul.f32 %v8686_v5, %v8686_v5  ;;  %v3381_v28 = vmul.f32 %v8672_v47, %v8672_v47  ;;  %v8716_v48 = vsub.f32 %v8196_v4, %v3216_v21 }
 0x2cd   :  { %v3480_v7 = vadd.f32 %v3479_v35, %v3376_v24  ;;  %v8719_v0 = vsub.f32 %v8207_v59, %v3216_v21  ;;  %5074 = vmatprep.subr.bf16.mxu1 %v5782_v17  ;;  %v3385_v27 = vmul.f32 %v8689_v44, %v8689_v44  ;;  %v8725_v1 = vsub.f32 %v9967_v46, %v8678_v11  ;;  %v10091_v59 = vld [vmem:[#allocation35_spill] sm:$0xff] }
 0x2ce   :  { %10088 = vst [vmem:[#allocation83_spill] sm:$0xff] %v8716_v48  ;;  %v3485_v12 = vadd.f32 %v3484_v51, %v3380_v29  ;;  %v3490_v13 = vadd.f32 %v3384_v34, %v3383_v16  ;;  %5135 = vmatpush3.bf16.msra.mxu0 %v5781_v32  ;;  %v3218_v24 = vmul.f32 0.0013020834, %v3189_v60  ;;  %v3382_v4 = vmul.f32 %v8693_v63, %v8693_v63  ;;  %v5785_v46 = vld [vmem:[%s9608_s5 + $0x88] sm:$0xff]   ;;  %v10094_v60 = vld [vmem:[#allocation58_spill] sm:$0xff] }
 0x2cf   :  { %10089 = vst [vmem:[#allocation115_spill] sm:$0xff] %v8719_v0  ;;  %10090 = vst [vmem:[#allocation44_spill] sm:$0xff] %v8725_v1  ;;  %3481 = vadd.xlane.f32.xlu1 %v3480_v7  ;;  %v8731_v21 = vsub.f32 %v10091_v59, %v8678_v11  ;;  %v8735_v35 = vsub.f32 %v10093_v61, %v8678_v11  ;;  %5136 = vmatprep.subr.bf16.mxu0 %v5783_v23  ;;  %v5784_v16 = vld [vmem:[%s9608_s5] sm:$0xff]  }
 0x2d0   :  { %v3486_v29 = vadd.f32 %v3485_v12, %v3381_v28  ;;  %v3386_v32 = vmul.f32 %v8707_v30, %v8707_v30  ;;  %v3491_v17 = vadd.f32 %v3490_v13, %v3385_v27  ;;  %v8744_v51 = vsub.f32 %v10094_v60, %v8678_v11  ;;  %v5786_v12 = vld [vmem:[%s9608_s5 + $0xc0] sm:$0xff]   ;;  %5075 = vmatpush3.bf16.msra.mxu1 %v5784_v16  ;;  %v3203_v60 = vpop.xlane.xlu1 %3202 }
 0x2d1   :  { %10092 = vst [vmem:[#allocation45_spill] sm:$0xff] %v8731_v21  ;;  %v3387_v23 = vmul.f32 %v8716_v48, %v8716_v48  ;;  %v3388_v34 = vmul.f32 %v8719_v0, %v8719_v0  ;;  %v3389_v7 = vmul.f32 %v8725_v1, %v8725_v1  ;;  %v3390_v28 = vmul.f32 %v8731_v21, %v8731_v21  ;;  %v10096_v0 = vld [vmem:[#allocation37_spill] sm:$0xff]  ;;  %v10097_v1 = vld [vmem:[#allocation27_spill] sm:$0xff] }
 0x2d2   :  { %v3219_v27 = vmul.f32 0.0013020834, %v3196_v15  ;;  %v3487_v13 = vadd.f32 %v3486_v29, %v3382_v4  ;;  %v3492_v59 = vadd.f32 %v3491_v17, %v3386_v32  ;;  %v8762_v61 = vsub.f32 %v8218_v53, %v8678_v11  ;;  %5137 = vmatpush3.bf16.msra.mxu0 %v5785_v46  ;;  %v5787_v15 = vld [vmem:[%s9608_s5 + $0x80] sm:$0xff]   ;;  %v10099_v32 = vld [vmem:[#allocation57_spill] sm:$0xff]  ;;  %v10100_v17 = vld [vmem:[#allocation59_spill] sm:$0xff] }
 0x2d3   :  { %v3391_v48 = vmul.f32 %v8735_v35, %v8735_v35  ;;  %v3497_v47 = vadd.f32 %v3390_v28, %v3389_v7  ;;  %v8767_v63 = vsub.f32 %v10096_v0, %v3218_v24  ;;  %v8770_v21 = vsub.f32 %v10097_v1, %v3218_v24  ;;  %v5788_v1 = vld [vmem:[%s9608_s5 + $0x178] sm:$0xff]   ;;  %5138 = vmatprep.subr.bf16.mxu0 %v5786_v12 }
 0x2d4   :  { %10095 = vst [vmem:[#allocation84_spill] sm:$0xff] %v8762_v61  ;;  %3488 = vadd.xlane.f32.xlu0 %v3487_v13  ;;  %v3493_v53 = vadd.f32 %v3492_v59, %v3387_v23  ;;  %v8777_v4 = vsub.f32 %v8232_v6, %v8678_v11  ;;  %v3392_v29 = vmul.f32 %v8744_v51, %v8744_v51  ;;  %v3220_v11 = vmul.f32 0.0013020834, %v3203_v60  ;;  %v10104_v60 = vld [vmem:[#allocation42_spill] sm:$0xff] }
 0x2d5   :  { %v8782_v0 = vsub.f32 %v10099_v32, %v3218_v24  ;;  %v3498_v46 = vadd.f32 %v3497_v47, %v3391_v48  ;;  %v8788_v16 = vsub.f32 %v10100_v17, %v3218_v24  ;;  %v3395_v23 = vmul.f32 %v8767_v63, %v8767_v63  ;;  %5188 = vmatprep.subr.bf16.mxu1 %v5788_v1  ;;  %v10102_v32 = vld [vmem:[#allocation41_spill] sm:$0xff] }
 0x2d6   :  { %10098 = vst [vmem:[#allocation85_spill] sm:$0xff] %v8777_v4  ;;  %v3396_v6 = vmul.f32 %v8770_v21, %v8770_v21  ;;  %v3494_v7 = vadd.f32 %v3493_v53, %v3388_v34  ;;  %v3393_v28 = vmul.f32 %v8762_v61, %v8762_v61  ;;  %v8797_v13 = vsub.f32 %v8246_v26, %v3218_v24 }
 0x2d7   :  { %v3499_v47 = vadd.f32 %v3498_v46, %v3392_v29  ;;  %v3397_v48 = vmul.f32 %v8782_v0, %v8782_v0  ;;  %v8802_v17 = vsub.f32 %v10102_v32, %v3219_v27  ;;  %5139 = vmatpush3.bf16.msra.mxu0 %v5787_v15  ;;  %v3394_v34 = vmul.f32 %v8777_v4, %v8777_v4 }
 0x2d8   :  { %10101 = vst [vmem:[#allocation87_spill] sm:$0xff] %v8797_v13  ;;  %v3504_v59 = vadd.f32 %v3396_v6, %v3395_v23  ;;  %3495 = vadd.xlane.f32.xlu1 %v3494_v7  ;;  %v8807_v12 = vsub.f32 %v8254_v14, %v3218_v24  ;;  %v8810_v26 = vsub.f32 %v10104_v60, %v3219_v27 }
 0x2d9   :  { %v8813_v53 = vsub.f32 %v8213_v55, %v3219_v27  ;;  %v3500_v29 = vadd.f32 %v3499_v47, %v3393_v28  ;;  %v3398_v1 = vmul.f32 %v8788_v16, %v8788_v16  ;;  %v3401_v15 = vmul.f32 %v8802_v17, %v8802_v17 }
 0x2da   :  { %10103 = vst [vmem:[#allocation86_spill] sm:$0xff] %v8807_v12  ;;  %v3505_v46 = vadd.f32 %v3504_v59, %v3397_v48  ;;  %v3399_v23 = vmul.f32 %v8797_v13, %v8797_v13  ;;  %v8822_v14 = vsub.f32 %v8237_v54, %v3219_v27  ;;  %v3402_v24 = vmul.f32 %v8810_v26, %v8810_v26 }
 0x2db   :  { %v3501_v6 = vadd.f32 %v3500_v29, %v3394_v34  ;;  %v8827_v7 = vsub.f32 %v8263_v56, %v3219_v27  ;;  %v8830_v28 = vsub.f32 %v9995_v42, %v3220_v11  ;;  %v3403_v47 = vmul.f32 %v8813_v53, %v8813_v53 }
 0x2dc   :  { %v3506_v55 = vadd.f32 %v3505_v46, %v3398_v1  ;;  %v3511_v48 = vadd.f32 %v3402_v24, %v3401_v15  ;;  %v8835_v59 = vsub.f32 %v8224_v43, %v3220_v11  ;;  %v8838_v54 = vsub.f32 %v8242_v36, %v3220_v11 }
 0x2dd   :  { %10105 = vst [vmem:[#allocation88_spill] sm:$0xff] %v8827_v7  ;;  %10106 = vst [vmem:[#allocation43_spill] sm:$0xff] %v8830_v28  ;;  %3502 = vadd.xlane.f32.xlu0 %v3501_v6  ;;  %v3400_v32 = vmul.f32 %v8807_v12, %v8807_v12  ;;  %v8843_v56 = vsub.f32 %v8267_v58, %v3219_v27  ;;  %v3407_v42 = vmul.f32 %v8830_v28, %v8830_v28  ;;  %v10122_v28 = vld [vmem:[#allocation9_spill] sm:$0xff] }
 0x2de   :  { %10107 = vst [vmem:[#allocation89_spill] sm:$0xff] %v8838_v54  ;;  %v3507_v34 = vadd.f32 %v3506_v55, %v3399_v23  ;;  %v3404_v60 = vmul.f32 %v8822_v14, %v8822_v14  ;;  %v3512_v29 = vadd.f32 %v3511_v48, %v3403_v47  ;;  %v8850_v43 = vsub.f32 %v8259_v38, %v3220_v11 }
 0x2df   :  { %10108 = vst [vmem:[#allocation13_spill] sm:$0xff] %v8843_v56  ;;  %v3408_v36 = vmul.f32 %v8835_v59, %v8835_v59  ;;  %v3405_v46 = vmul.f32 %v8827_v7, %v8827_v7  ;;  %v8857_v58 = vsub.f32 %v8270_v45, %v3220_v11  ;;  %v3409_v27 = vmul.f32 %v8838_v54, %v8838_v54 }
 0x2e0   :  { %10109 = vst [vmem:[#allocation14_spill] sm:$0xff] %v8850_v43  ;;  %v3508_v1 = vadd.f32 %v3507_v34, %v3400_v32  ;;  %v3513_v15 = vadd.f32 %v3512_v29, %v3404_v60  ;;  %v3406_v38 = vmul.f32 %v8843_v56, %v8843_v56  ;;  %v8864_v6 = vsub.f32 %v8274_v49, %v3220_v11 }
 0x2e1   :  { %10110 = vst [vmem:[#allocation116_spill] sm:$0xff] %v8857_v58  ;;  %v3518_v23 = vadd.f32 %v3408_v36, %v3407_v42  ;;  %v3410_v55 = vmul.f32 %v8850_v43, %v8850_v43  ;;  %v3411_v45 = vmul.f32 %v8857_v58, %v8857_v58  ;;  %v10129_v43 = vld [vmem:[#allocation101_spill] sm:$0xff] }
 0x2e2   :  { %3509 = vadd.xlane.f32.xlu1 %v3508_v1  ;;  %v3514_v24 = vadd.f32 %v3513_v15, %v3405_v46  ;;  %10111 = vst [vmem:[#allocation117_spill] sm:$0xff] %v8864_v6  ;;  %v3412_v34 = vmul.f32 %v8864_v6, %v8864_v6 }
 0x2e3   :  { %v3519_v47 = vadd.f32 %v3518_v23, %v3409_v27 }
 0x2e4   :  { %v3515_v48 = vadd.f32 %v3514_v24, %v3406_v38  ;;  %v3669_v38 = vld [vmem:[%s9609_s3] sm:$0x3f] }
 0x2e5   :  { %v3520_v32 = vadd.f32 %v3519_v47, %v3410_v55  ;;  %v3797_v24 = vld [vmem:[%s9610_s4] sm:$0x3f] }
 0x2e6   :  { %3516 = vadd.xlane.f32.xlu0 %v3515_v48  ;;  %v10112_v48 = vld [vmem:[#allocation2_spill] sm:$0xff] }
 0x2e7   :  { %v3521_v42 = vadd.f32 %v3520_v32, %v3411_v45  ;;  %v8879_v45 = vrot.slane %v3669_v38, %v10112_v48  ;;  %v8882_v32 = vrot.slane %v3797_v24, %v10112_v48  ;;  %v10118_v48 = vld [vmem:[#allocation113_spill] sm:$0xff] }
 0x2e8   :  { %v8923_v4 = vrot.slane %v3797_v24, %v10118_v48 }
 0x2e9   :  { %v3522_v60 = vadd.f32 %v3521_v42, %v3412_v34  ;;  %v10113_v34 = vld [vmem:[#allocation36_spill] sm:$0xff] }
 0x2ea   :  { %v8885_v42 = vrot.slane %v3669_v38, %v10113_v34 }
 0x2eb   :  { %3523 = vadd.xlane.f32.xlu1 %v3522_v60 }
 0x32c   :  { %v3419_v29 = vpop.xlane.xlu0 %3418 }
 0x32d   :  { %v3525_v36 = vmul.f32 0.0013020834, %v3419_v29  ;;  %v8888_v29 = vrot.slane %v3797_v24, %v10113_v34  ;;  %v8906_v34 = vrot.slane %v3669_v38, %v10118_v48 }
 0x32f   :  { %v3541_v49 = vadd.f32 1e-12, %v3525_v36  ;;  %v10114_v36 = vld [vmem:[#allocation111_spill] sm:$0xff] }
 0x330   :  { %v3426_v11 = vpop.xlane.xlu1 %3425 }
 0x331   :  { %5804 = vrsqrt.f32 %v3541_v49  ;;  %v3526_v1 = vmul.f32 0.0013020834, %v3426_v11  ;;  %v8891_v49 = vrot.slane %v3669_v38, %v10114_v36  ;;  %v10116_v11 = vld [vmem:[#allocation3_spill] sm:$0xff] }
 0x333   :  { %v3542_v46 = vadd.f32 1e-12, %v3526_v1  ;;  %10115 = vst [vmem:[#allocation47_spill] sm:$0xff] %v8891_v49  ;;  %v8894_v1 = vrot.slane %v3669_v38, %v10116_v11 }
 0x335   :  { %5806 = vrsqrt.f32 %v3542_v46  ;;  %v10117_v46 = vld [vmem:[#allocation40_spill] sm:$0xff] }
 0x336   :  { %v3433_v15 = vpop.xlane.xlu0 %3432  ;;  %v8912_v13 = vrot.slane %v3797_v24, %v10117_v46 }
 0x337   :  { %v3527_v27 = vmul.f32 0.0013020834, %v3433_v15  ;;  %v8897_v15 = vrot.slane %v3669_v38, %v10117_v46 }
 0x339   :  { %v3543_v23 = vadd.f32 1e-12, %v3527_v27 }
 0x33a   :  { %v3440_v55 = vpop.xlane.xlu1 %3439 }
 0x33b   :  { %5808 = vrsqrt.f32 %v3543_v23  ;;  %v3528_v47 = vmul.f32 0.0013020834, %v3440_v55  ;;  %v8900_v23 = vrot.slane %v3797_v24, %v10114_v36 }
 0x33d   :  { %v3544_v60 = vadd.f32 1e-12, %v3528_v47  ;;  %v8903_v47 = vrot.slane %v3797_v24, %v10116_v11 }
 0x33e   :  { %v5805_v27 = vpop.eup %5804 }
 0x33f   :  { %5810 = vrsqrt.f32 %v3544_v60  ;;  %v3574_v7 = vmul.f32 %v5805_v27, %v8311_v41  ;;  %v3576_v6 = vmul.f32 %v5805_v27, %v8317_v22  ;;  %v3573_v56 = vmul.f32 %v5805_v27, %v8308_v31 }
 0x340   :  { %v3447_v55 = vpop.xlane.xlu0 %3446  ;;  %v3575_v36 = vmul.f32 %v5805_v27, %v8314_v40  ;;  %v3578_v60 = vmul.f32 %v5805_v27, %v8327_v10  ;;  %v3577_v11 = vmul.f32 %v5805_v27, %v8320_v57 }
 0x341   :  { %v3529_v58 = vmul.f32 0.0013020834, %v3447_v55  ;;  %v3702_v38 = vmul.f32 %v8894_v1, %v3574_v7  ;;  %v3704_v55 = vmul.f32 %v8897_v15, %v3576_v6  ;;  %v3701_v41 = vmul.f32 %v8879_v45, %v3573_v56 }
 0x342   :  { %v5807_v12 = vpop.eup %5806  ;;  %v3703_v31 = vmul.f32 %v8885_v42, %v3575_v36  ;;  %v3706_v46 = vmul.f32 %v8906_v34, %v3578_v60  ;;  %v8926_v40 = vmul.f32 %v8891_v49, %v3577_v11 }
 0x343   :  { %v3545_v61 = vadd.f32 1e-12, %v3529_v58  ;;  %v3580_v10 = vmul.f32 %v5807_v12, %v8335_v52  ;;  %v3830_v7 = vadd.f32 %v8903_v47, %v3702_v38  ;;  %v3582_v56 = vmul.f32 %v5807_v12, %v8345_v20 }
 0x344   :  { %v3454_v22 = vpop.xlane.xlu1 %3453  ;;  %v3832_v58 = vadd.f32 %v8912_v13, %v3704_v55  ;;  %v3579_v6 = vmul.f32 %v5807_v12, %v8332_v19  ;;  %v3829_v27 = vadd.f32 %v8882_v32, %v3701_v41  ;;  %v3581_v48 = vmul.f32 %v5807_v12, %v8338_v18 }
 0x345   :  { %5812 = vrsqrt.f32 %v3545_v61  ;;  %v3530_v57 = vmul.f32 0.0013020834, %v3454_v22  ;;  %v3708_v24 = vmul.f32 %v8894_v1, %v3580_v10  ;;  %v3831_v61 = vadd.f32 %v8888_v29, %v3703_v31  ;;  %v10119_v10 = vld [vmem:[#allocation97_spill] sm:$0xff] }
 0x346   :  { %v3710_v60 = vmul.f32 %v8897_v15, %v3582_v56  ;;  %v3707_v52 = vmul.f32 %v8879_v45, %v3579_v6  ;;  %v3584_v11 = vmul.f32 %v5807_v12, %v8357_v50  ;;  %v8941_v20 = vadd.f32 %v8923_v4, %v3706_v46  ;;  %v5789_v6 = vld [vmem:[%s9608_s5 + $0x138] sm:$0xff]  }
 0x347   :  { %v3546_v36 = vadd.f32 1e-12, %v3530_v57  ;;  %v3836_v55 = vadd.f32 %v8903_v47, %v3708_v24  ;;  %v3709_v41 = vmul.f32 %v8885_v42, %v3581_v48  ;;  %v3583_v18 = vmul.f32 %v5807_v12, %v8354_v33  ;;  %v10121_v48 = vld [vmem:[#allocation109_spill] sm:$0xff] }
 0x348   :  { %v8943_v38 = vpop.eup %5808  ;;  %v3838_v31 = vadd.f32 %v8912_v13, %v3710_v60  ;;  %v3835_v57 = vadd.f32 %v8882_v32, %v3707_v52 }
 0x349   :  { %5814 = vrsqrt.f32 %v3546_v36  ;;  %v3461_v19 = vpop.xlane.xlu0 %3460  ;;  %v3586_v50 = vmul.f32 %v8943_v38, %v10119_v10  ;;  %v3926_v46 = vpack.c.bf16 %v3836_v55, %v3830_v7  ;;  %v3837_v56 = vadd.f32 %v8888_v29, %v3709_v41  ;;  %v10120_v36 = vld [vmem:[#allocation63_spill] sm:$0xff]  ;;  %v5790_v7 = vld [vmem:[%s9608_s5 + $0x170] sm:$0xff]  }
 0x34a   :  { %v3531_v22 = vmul.f32 0.0013020834, %v3461_v19  ;;  %v3588_v24 = vmul.f32 %v8943_v38, %v10120_v36  ;;  %v3585_v33 = vmul.f32 %v8943_v38, %v10121_v48  ;;  %v3928_v60 = vpack.c.bf16 %v3838_v31, %v3832_v58 }
 0x34b   :  { %v3925_v19 = vpack.c.bf16 %v3835_v57, %v3829_v27  ;;  %v3714_v52 = vmul.f32 %v8894_v1, %v3586_v50  ;;  %4396 = vmatprep.mubr.bf16.mxu1 %v3926_v46  ;;  %v3927_v10 = vpack.c.bf16 %v3837_v56, %v3831_v61  ;;  %v10123_v27 = vld [vmem:[#allocation98_spill] sm:$0xff]  ;;  %v10124_v50 = vld [vmem:[#allocation61_spill] sm:$0xff] }
 0x34c   :  { %v3547_v12 = vadd.f32 1e-12, %v3531_v22  ;;  %v8964_v55 = vpop.eup %5810  ;;  %v3716_v54 = vmul.f32 %v8897_v15, %v3588_v24  ;;  %v3713_v36 = vmul.f32 %v8879_v45, %v3585_v33  ;;  %v3587_v22 = vmul.f32 %v8943_v38, %v10122_v28  ;;  %4493 = vmatprep.mubr.bf16.mxu0 %v3928_v60  ;;  %v10125_v56 = vld [vmem:[#allocation114_spill] sm:$0xff]  ;;  %v5791_v28 = vld [vmem:[%s9608_s5 + $0x130] sm:$0xff]  }
 0x34d   :  { %4397 = vmatmul.mubr.bf16.vlgmr.msra.gmra.mxu1 %v3925_v19  ;;  %v3592_v31 = vmul.f32 %v8964_v55, %v10123_v27  ;;  %v3842_v57 = vadd.f32 %v8903_v47, %v3714_v52  ;;  %4494 = vmatmul.mubr.bf16.vlgmr.msra.gmra.mxu0 %v3927_v10  ;;  %v3594_v61 = vmul.f32 %v8964_v55, %v10124_v50  ;;  %v10126_v60 = vld [vmem:[#allocation60_spill] sm:$0xff] }
 0x34e   :  { %v3468_v41 = vpop.xlane.xlu1 %3467  ;;  %5816 = vrsqrt.f32 %v3547_v12  ;;  %5189 = vmatpush3.bf16.msra.mxu1 %v5789_v6  ;;  %v3844_v46 = vadd.f32 %v8912_v13, %v3716_v54  ;;  %v3591_v24 = vmul.f32 %v8964_v55, %v10125_v56  ;;  %v3841_v12 = vadd.f32 %v8882_v32, %v3713_v36  ;;  %v5792_v54 = vld [vmem:[%s9608_s5 + $0x168] sm:$0xff]  }
 0x34f   :  { %v3532_v58 = vmul.f32 0.0013020834, %v3468_v41  ;;  %v3720_v33 = vmul.f32 %v8894_v1, %v3592_v31  ;;  %v3593_v6 = vmul.f32 %v8964_v55, %v10126_v60  ;;  %5190 = vmatprep.subr.bf16.mxu1 %v5790_v7  ;;  %v3722_v19 = vmul.f32 %v8897_v15, %v3594_v61 }
 0x350   :  { %v3719_v52 = vmul.f32 %v8879_v45, %v3591_v24  ;;  %v3715_v41 = vmul.f32 %v8885_v42, %v3587_v22  ;;  %v3712_v10 = vmul.f32 %v8906_v34, %v3584_v11  ;;  %v8997_v31 = vmul.f32 %v8891_v49, %v3583_v18 }
 0x351   :  { %v3548_v48 = vadd.f32 1e-12, %v3532_v58  ;;  %v3848_v27 = vadd.f32 %v8903_v47, %v3720_v33  ;;  %v3721_v7 = vmul.f32 %v8885_v42, %v3593_v6  ;;  %v3850_v61 = vadd.f32 %v8912_v13, %v3722_v19  ;;  %v10128_v33 = vld [vmem:[#allocation66_spill] sm:$0xff] }
 0x352   :  { %v8992_v58 = vpop.eup %5812  ;;  %v3847_v56 = vadd.f32 %v8882_v32, %v3719_v52  ;;  %v3843_v22 = vadd.f32 %v8888_v29, %v3715_v41  ;;  %5191 = vmatpush3.bf16.msra.mxu1 %v5791_v28  ;;  %v5793_v28 = vld [vmem:[%s9608_s5 + $0x128] sm:$0xff]  }
 0x353   :  { %5818 = vrsqrt.f32 %v3548_v48  ;;  %v3475_v36 = vpop.xlane.xlu0 %3474  ;;  %v3932_v11 = vpack.c.bf16 %v3848_v27, %v3842_v57  ;;  %v3849_v24 = vadd.f32 %v8888_v29, %v3721_v7  ;;  %v10127_v48 = vld [vmem:[#allocation8_spill] sm:$0xff]  ;;  %v3600_v6 = vmul.f32 %v8992_v58, %v10128_v33  ;;  %5192 = vmatprep.subr.bf16.mxu1 %v5792_v54  ;;  %v10130_v54 = vld [vmem:[#allocation10_spill] sm:$0xff] }
 0x354   :  { %v3533_v50 = vmul.f32 0.0013020834, %v3475_v36  ;;  %v3598_v60 = vmul.f32 %v8992_v58, %v10127_v48  ;;  %v3934_v49 = vpack.c.bf16 %v3850_v61, %v3844_v46  ;;  %v3931_v36 = vpack.c.bf16 %v3847_v56, %v3841_v12  ;;  %v10132_v56 = vld [vmem:[#allocation68_spill] sm:$0xff] }
 0x355   :  { %v3597_v19 = vmul.f32 %v8992_v58, %v10129_v43  ;;  %4404 = vmatprep.mubr.bf16.mxu1 %v3932_v11  ;;  %v3933_v41 = vpack.c.bf16 %v3849_v24, %v3843_v22  ;;  %v3728_v7 = vmul.f32 %v8897_v15, %v3600_v6  ;;  %v3599_v46 = vmul.f32 %v8992_v58, %v10130_v54  ;;  %v5794_v43 = vld [vmem:[%s9608_s5 + $0x160] sm:$0xff]   ;;  %v10133_v48 = vld [vmem:[#allocation32_spill] sm:$0xff] }
 0x356   :  { %v3549_v18 = vadd.f32 1e-12, %v3533_v50  ;;  %v9012_v57 = vpop.eup %5814  ;;  %v3726_v27 = vmul.f32 %v8894_v1, %v3598_v60  ;;  %4501 = vmatprep.mubr.bf16.mxu0 %v3934_v49  ;;  %4405 = vmatmul.mubr.bf16.gmra.mxu1 %v3931_v36  ;;  %v10131_v50 = vld [vmem:[#allocation33_spill] sm:$0xff]  ;;  %v10134_v36 = vld [vmem:[#allocation103_spill] sm:$0xff] }
 0x357   :  { %v3604_v61 = vmul.f32 %v9012_v57, %v10131_v50  ;;  %v3606_v22 = vmul.f32 %v9012_v57, %v10132_v56  ;;  %4502 = vmatmul.mubr.bf16.gmra.mxu0 %v3933_v41  ;;  %v3856_v24 = vadd.f32 %v8912_v13, %v3728_v7  ;;  %v3603_v60 = vmul.f32 %v9012_v57, %v10133_v48  ;;  %v5795_v41 = vld [vmem:[%s9608_s5 + $0x120] sm:$0xff]  }
 0x358   :  { %v3482_v52 = vpop.xlane.xlu1 %3481  ;;  %5820 = vrsqrt.f32 %v3549_v18  ;;  %v3854_v11 = vadd.f32 %v8903_v47, %v3726_v27  ;;  %v3725_v33 = vmul.f32 %v8879_v45, %v3597_v19  ;;  %5193 = vmatpush3.bf16.msra.mxu1 %v5793_v28  ;;  %v3727_v54 = vmul.f32 %v8885_v42, %v3599_v46  ;;  %v5796_v19 = vld [vmem:[%s9608_s5 + $0x158] sm:$0xff]  }
 0x359   :  { %v3534_v12 = vmul.f32 0.0013020834, %v3482_v52  ;;  %v3732_v49 = vmul.f32 %v8894_v1, %v3604_v61  ;;  %v3734_v18 = vmul.f32 %v8897_v15, %v3606_v22  ;;  %v3605_v52 = vmul.f32 %v9012_v57, %v10134_v36  ;;  %5194 = vmatprep.subr.bf16.mxu1 %v5794_v43 }
 0x35a   :  { %v3731_v27 = vmul.f32 %v8879_v45, %v3603_v60  ;;  %v3853_v7 = vadd.f32 %v8882_v32, %v3725_v33  ;;  %v3855_v43 = vadd.f32 %v8888_v29, %v3727_v54 }
 0x35b   :  { %v3550_v6 = vadd.f32 1e-12, %v3534_v12  ;;  %v9044_v12 = vadd.f32 %v8923_v4, %v3712_v10  ;;  %v9046_v50 = vpop.eup %5816  ;;  %v3860_v61 = vadd.f32 %v8903_v47, %v3732_v49  ;;  %v3862_v56 = vadd.f32 %v8912_v13, %v3734_v18 }
 0x35c   :  { %v3733_v22 = vmul.f32 %v8885_v42, %v3605_v52  ;;  %v3859_v46 = vadd.f32 %v8882_v32, %v3731_v27  ;;  %v3610_v60 = vmul.f32 %v9046_v50, %v8487_v62  ;;  %5195 = vmatpush3.bf16.msra.mxu1 %v5795_v41  ;;  %v5797_v62 = vld [vmem:[%s9608_s5 + $0x118] sm:$0xff]   ;;  %v10136_v41 = vld [vmem:[#allocation72_spill] sm:$0xff] }
 0x35d   :  { %5822 = vrsqrt.f32 %v3550_v6  ;;  %v3489_v28 = vpop.xlane.xlu0 %3488  ;;  %v3938_v10 = vpack.c.bf16 %v3860_v61, %v3854_v11  ;;  %v3940_v33 = vpack.c.bf16 %v3862_v56, %v3856_v24  ;;  %v3612_v6 = vmul.f32 %v9046_v50, %v8493_v37  ;;  %5196 = vmatprep.subr.bf16.mxu1 %v5796_v19  ;;  %v5798_v61 = vld [vmem:[%s9608_s5 + $0x150] sm:$0xff]  }
 0x35e   :  { %v3535_v48 = vmul.f32 0.0013020834, %v3489_v28  ;;  %v3861_v36 = vadd.f32 %v8888_v29, %v3733_v22  ;;  %v3937_v18 = vpack.c.bf16 %v3859_v46, %v3853_v7  ;;  %v3738_v52 = vmul.f32 %v8894_v1, %v3610_v60  ;;  %v10135_v28 = vld [vmem:[#allocation70_spill] sm:$0xff] }
 0x35f   :  { %v3609_v27 = vmul.f32 %v9046_v50, %v10135_v28  ;;  %4412 = vmatprep.mubr.bf16.mxu1 %v3938_v10  ;;  %4509 = vmatprep.mubr.bf16.mxu0 %v3940_v33  ;;  %v3740_v37 = vmul.f32 %v8897_v15, %v3612_v6  ;;  %v3611_v7 = vmul.f32 %v9046_v50, %v10136_v41  ;;  %v10138_v6 = vld [vmem:[#allocation106_spill] sm:$0xff] }
 0x360   :  { %v3551_v49 = vadd.f32 1e-12, %v3535_v48  ;;  %v9064_v11 = vpop.eup %5818  ;;  %v3939_v54 = vpack.c.bf16 %v3861_v36, %v3855_v43  ;;  %4413 = vmatmul.mubr.bf16.gmra.mxu1 %v3937_v18  ;;  %v3866_v22 = vadd.f32 %v8903_v47, %v3738_v52  ;;  %v10137_v43 = vld [vmem:[#allocation39_spill] sm:$0xff] }
 0x361   :  { %v3496_v24 = vpop.xlane.xlu1 %3495  ;;  %v3616_v56 = vmul.f32 %v9064_v11, %v8524_v25  ;;  %v3618_v48 = vmul.f32 %v9064_v11, %v8534_v8  ;;  %v3868_v46 = vadd.f32 %v8912_v13, %v3740_v37  ;;  %v3615_v60 = vmul.f32 %v9064_v11, %v10137_v43  ;;  %5197 = vmatpush3.bf16.msra.mxu1 %v5797_v62  ;;  %v5799_v8 = vld [vmem:[%s9608_s5 + $0x110] sm:$0xff]  }
 0x362   :  { %5824 = vrsqrt.f32 %v3551_v49  ;;  %v3536_v19 = vmul.f32 0.0013020834, %v3496_v24  ;;  %4510 = vmatmul.mubr.bf16.gmra.mxu0 %v3939_v54  ;;  %v3737_v10 = vmul.f32 %v8879_v45, %v3609_v27  ;;  %v3617_v49 = vmul.f32 %v9064_v11, %v10138_v6  ;;  %5198 = vmatprep.subr.bf16.mxu1 %v5798_v61  ;;  %v5800_v27 = vld [vmem:[%s9608_s5 + $0x148] sm:$0xff]   ;;  %v10140_v6 = vld [vmem:[#allocation34_spill] sm:$0xff] }
 0x363   :  { %v3744_v36 = vmul.f32 %v8894_v1, %v3616_v56  ;;  %v3739_v25 = vmul.f32 %v8885_v42, %v3611_v7  ;;  %v3746_v18 = vmul.f32 %v8897_v15, %v3618_v48  ;;  %v3743_v52 = vmul.f32 %v8879_v45, %v3615_v60  ;;  %v10139_v48 = vld [vmem:[#allocation107_spill] sm:$0xff] }
 0x364   :  { %v3552_v33 = vadd.f32 1e-12, %v3536_v19  ;;  %v3865_v28 = vadd.f32 %v8882_v32, %v3737_v10  ;;  %v3745_v41 = vmul.f32 %v8885_v42, %v3617_v49  ;;  %v10141_v24 = vld [vmem:[#allocation75_spill] sm:$0xff] }
 0x365   :  { %v9096_v54 = vpop.eup %5820  ;;  %v3872_v37 = vadd.f32 %v8903_v47, %v3744_v36  ;;  %v3867_v7 = vadd.f32 %v8888_v29, %v3739_v25  ;;  %v3874_v61 = vadd.f32 %v8912_v13, %v3746_v18  ;;  %v3871_v56 = vadd.f32 %v8882_v32, %v3743_v52  ;;  %5199 = vmatpush3.bf16.msra.mxu1 %v5799_v8  ;;  %v5801_v52 = vld [vmem:[%s9608_s5 + $0x108] sm:$0xff]  }
 0x366   :  { %5826 = vrsqrt.f32 %v3552_v33  ;;  %v3503_v62 = vpop.xlane.xlu0 %3502  ;;  %v3622_v43 = vmul.f32 %v9096_v54, %v10139_v48  ;;  %v3873_v10 = vadd.f32 %v8888_v29, %v3745_v41  ;;  %v3624_v33 = vmul.f32 %v9096_v54, %v10140_v6  ;;  %5200 = vmatprep.subr.bf16.mxu1 %v5800_v27  ;;  %v10142_v8 = vld [vmem:[#allocation11_spill] sm:$0xff] }
 0x367   :  { %v3537_v19 = vmul.f32 0.0013020834, %v3503_v62  ;;  %v3944_v60 = vpack.c.bf16 %v3872_v37, %v3866_v22  ;;  %v3621_v36 = vmul.f32 %v9096_v54, %v10141_v24  ;;  %v3946_v25 = vpack.c.bf16 %v3874_v61, %v3868_v46 }
 0x368   :  { %v3943_v62 = vpack.c.bf16 %v3871_v56, %v3865_v28  ;;  %v3750_v18 = vmul.f32 %v8894_v1, %v3622_v43  ;;  %v3945_v41 = vpack.c.bf16 %v3873_v10, %v3867_v7  ;;  %v3752_v48 = vmul.f32 %v8897_v15, %v3624_v33  ;;  %v5802_v28 = vld [vmem:[%s9608_s5 + $0x140] sm:$0xff]   ;;  %v10144_v56 = vld [vmem:[#allocation77_spill] sm:$0xff]  ;;  %v10145_v10 = vld [vmem:[#allocation80_spill] sm:$0xff] }
 0x369   :  { %v3553_v49 = vadd.f32 1e-12, %v3537_v19  ;;  %4420 = vmatprep.mubr.bf16.mxu1 %v3944_v60  ;;  %v3749_v24 = vmul.f32 %v8879_v45, %v3621_v36  ;;  %v3623_v46 = vmul.f32 %v9096_v54, %v10142_v8  ;;  %4517 = vmatprep.mubr.bf16.mxu0 %v3946_v25  ;;  %v10143_v19 = vld [vmem:[#allocation108_spill] sm:$0xff]  ;;  %v9147_v8 = vadd.f32 %v8900_v23, %v8997_v31 }
 0x36a   :  { %v9114_v22 = vpop.eup %5822  ;;  %4421 = vmatmul.mubr.bf16.gmra.mxu1 %v3943_v62  ;;  %v3878_v7 = vadd.f32 %v8903_v47, %v3750_v18  ;;  %4518 = vmatmul.mubr.bf16.gmra.mxu0 %v3945_v41  ;;  %v3880_v60 = vadd.f32 %v8912_v13, %v3752_v48  ;;  %v10146_v25 = vld [vmem:[#allocation76_spill] sm:$0xff]  ;;  %v5803_v18 = vld [vmem:[%s9608_s5 + $0x100] sm:$0xff]  }
 0x36b   :  { %v3510_v37 = vpop.xlane.xlu1 %3509  ;;  %5828 = vrsqrt.f32 %v3553_v49  ;;  %v3628_v61 = vmul.f32 %v9114_v22, %v10143_v19  ;;  %v3630_v43 = vmul.f32 %v9114_v22, %v10144_v56  ;;  %v3627_v6 = vmul.f32 %v9114_v22, %v10145_v10  ;;  %5201 = vmatpush3.bf16.msra.mxu1 %v5801_v52 }
 0x36c   :  { %v3538_v27 = vmul.f32 0.0013020834, %v3510_v37  ;;  %v3877_v33 = vadd.f32 %v8882_v32, %v3749_v24  ;;  %v3629_v62 = vmul.f32 %v9114_v22, %v10146_v25  ;;  %v3751_v37 = vmul.f32 %v8885_v42, %v3623_v46  ;;  %5202 = vmatprep.subr.bf16.mxu1 %v5802_v28 }
 0x36d   :  { %v3756_v49 = vmul.f32 %v8894_v1, %v3628_v61  ;;  %v3758_v41 = vmul.f32 %v8897_v15, %v3630_v43  ;;  %v3755_v48 = vmul.f32 %v8879_v45, %v3627_v6  ;;  %v9143_v24 = vadd.f32 %v8900_v23, %v8926_v40 }
 0x36e   :  { %v3554_v36 = vadd.f32 1e-12, %v3538_v27  ;;  %v3757_v19 = vmul.f32 %v8885_v42, %v3629_v62  ;;  %v3879_v61 = vadd.f32 %v8888_v29, %v3751_v37 }
 0x36f   :  { %v9149_v27 = vpop.eup %5824  ;;  %v3517_v52 = vpop.xlane.xlu0 %3516  ;;  %v3884_v46 = vadd.f32 %v8903_v47, %v3756_v49  ;;  %v3886_v28 = vadd.f32 %v8912_v13, %v3758_v41  ;;  %v3883_v40 = vadd.f32 %v8882_v32, %v3755_v48  ;;  %5203 = vmatpush3.bf16.msra.mxu1 %v5803_v18 }
 0x370   :  { %5830 = vrsqrt.f32 %v3554_v36  ;;  %v3539_v56 = vmul.f32 0.0013020834, %v3517_v52  ;;  %v3634_v43 = vmul.f32 %v9149_v27, %v8647_v2  ;;  %v3885_v10 = vadd.f32 %v8888_v29, %v3757_v19  ;;  %v10147_v36 = vld [vmem:[#allocation112_spill] sm:$0xff] }
 0x371   :  { %v3950_v31 = vpack.c.bf16 %v3884_v46, %v3878_v7  ;;  %v3636_v6 = vmul.f32 %v9149_v27, %v8657_v39  ;;  %v3633_v49 = vmul.f32 %v9149_v27, %v10147_v36  ;;  %v3952_v62 = vpack.c.bf16 %v3886_v28, %v3880_v60 }
 0x372   :  { %v3555_v25 = vadd.f32 1e-12, %v3539_v56  ;;  %v3949_v37 = vpack.c.bf16 %v3883_v40, %v3877_v33  ;;  %v3762_v41 = vmul.f32 %v8894_v1, %v3634_v43  ;;  %v3951_v2 = vpack.c.bf16 %v3885_v10, %v3879_v61 }
 0x373   :  { %v9164_v52 = vpop.eup %5826  ;;  %4428 = vmatprep.mubr.bf16.mxu1 %v3950_v31  ;;  %v3764_v7 = vmul.f32 %v8897_v15, %v3636_v6  ;;  %v3761_v46 = vmul.f32 %v8879_v45, %v3633_v49  ;;  %v3635_v39 = vmul.f32 %v9149_v27, %v8651_v3  ;;  %4525 = vmatprep.mubr.bf16.mxu0 %v3952_v62  ;;  %v10148_v6 = vld [vmem:[#allocation64_spill] sm:$0xff] }
 0x374   :  { %v3524_v48 = vpop.xlane.xlu1 %3523  ;;  %5832 = vrsqrt.f32 %v3555_v25  ;;  %4429 = vmatmul.mubr.bf16.gmra.mxu1 %v3949_v37  ;;  %v3640_v60 = vmul.f32 %v9164_v52, %v8686_v5  ;;  %v3890_v33 = vadd.f32 %v8903_v47, %v3762_v41  ;;  %4526 = vmatmul.mubr.bf16.gmra.mxu0 %v3951_v2  ;;  %v3642_v18 = vmul.f32 %v9164_v52, %v8707_v30  ;;  %v10149_v41 = vld [vmem:[#allocation45_spill] sm:$0xff] }
 0x375   :  { %v3540_v19 = vmul.f32 0.0013020834, %v3524_v48  ;;  %v3892_v61 = vadd.f32 %v8912_v13, %v3764_v7  ;;  %v3639_v56 = vmul.f32 %v9164_v52, %v8683_v9  ;;  %v3889_v3 = vadd.f32 %v8882_v32, %v3761_v46 }
 0x376   :  { %v3768_v40 = vmul.f32 %v8894_v1, %v3640_v60  ;;  %v3641_v43 = vmul.f32 %v9164_v52, %v8689_v44  ;;  %v3763_v5 = vmul.f32 %v8885_v42, %v3635_v39  ;;  %v3770_v31 = vmul.f32 %v8897_v15, %v3642_v18  ;;  %v10150_v39 = vld [vmem:[#allocation44_spill] sm:$0xff] }
 0x377   :  { %v3556_v28 = vadd.f32 1e-12, %v3540_v19  ;;  %v3767_v10 = vmul.f32 %v8879_v45, %v3639_v56  ;;  %v3929_v30 = vpack.c.bf16 %v9147_v8, %v9143_v24  ;;  %v3590_v9 = vmul.f32 %v8943_v38, %v10148_v6  ;;  %v10175_v8 = vld [vmem:[#allocation85_spill] sm:$0xff] }
 0x378   :  { %v9189_v36 = vpop.eup %5828  ;;  %v3896_v49 = vadd.f32 %v8903_v47, %v3768_v40  ;;  %v3769_v25 = vmul.f32 %v8885_v42, %v3641_v43  ;;  %v3891_v44 = vadd.f32 %v8888_v29, %v3763_v5  ;;  %v3898_v62 = vadd.f32 %v8912_v13, %v3770_v31  ;;  %v10151_v31 = vld [vmem:[#allocation65_spill] sm:$0xff] }
 0x379   :  { %5834 = vrsqrt.f32 %v3556_v28  ;;  %v3895_v37 = vadd.f32 %v8882_v32, %v3767_v10  ;;  %v3646_v48 = vmul.f32 %v9189_v36, %v10149_v41  ;;  %v3648_v2 = vmul.f32 %v9189_v36, %v8744_v51 }
 0x37a   :  { %v3956_v7 = vpack.c.bf16 %v3896_v49, %v3890_v33  ;;  %v3897_v46 = vadd.f32 %v8888_v29, %v3769_v25  ;;  %v3645_v19 = vmul.f32 %v9189_v36, %v10150_v39  ;;  %v3647_v60 = vmul.f32 %v9189_v36, %v8735_v35 }
 0x37b   :  { %v3958_v18 = vpack.c.bf16 %v3898_v62, %v3892_v61  ;;  %v3955_v56 = vpack.c.bf16 %v3895_v37, %v3889_v3  ;;  %v3774_v28 = vmul.f32 %v8894_v1, %v3646_v48  ;;  %v3776_v40 = vmul.f32 %v8897_v15, %v3648_v2 }
 0x37c   :  { %4436 = vmatprep.mubr.bf16.mxu1 %v3956_v7  ;;  %v3957_v5 = vpack.c.bf16 %v3897_v46, %v3891_v44  ;;  %v3773_v51 = vmul.f32 %v8879_v45, %v3645_v19  ;;  %v3775_v33 = vmul.f32 %v8885_v42, %v3647_v60  ;;  %v3596_v10 = vmul.f32 %v8964_v55, %v10151_v31  ;;  %v10153_v60 = vld [vmem:[#allocation100_spill] sm:$0xff] }
 0x37d   :  { %v9207_v43 = vpop.eup %5830  ;;  %4533 = vmatprep.mubr.bf16.mxu0 %v3958_v18  ;;  %4437 = vmatmul.mubr.bf16.gmra.mxu1 %v3955_v56  ;;  %v3902_v61 = vadd.f32 %v8903_v47, %v3774_v28  ;;  %v3904_v6 = vadd.f32 %v8912_v13, %v3776_v40  ;;  %v3718_v41 = vmul.f32 %v8906_v34, %v3590_v9 }
 0x37e   :  { %v3652_v35 = vmul.f32 %v9207_v43, %v8770_v21  ;;  %v3654_v3 = vmul.f32 %v9207_v43, %v8788_v16  ;;  %4534 = vmatmul.mubr.bf16.gmra.mxu0 %v3957_v5  ;;  %v3651_v49 = vmul.f32 %v9207_v43, %v8767_v63  ;;  %v3901_v25 = vadd.f32 %v8882_v32, %v3773_v51  ;;  %v10152_v63 = vld [vmem:[#allocation62_spill] sm:$0xff] }
 0x37f   :  { %v3653_v44 = vmul.f32 %v9207_v43, %v8782_v0  ;;  %v3903_v37 = vadd.f32 %v8888_v29, %v3775_v33  ;;  %v3724_v2 = vmul.f32 %v8906_v34, %v3596_v10  ;;  %v3589_v7 = vmul.f32 %v8943_v38, %v10152_v63 }
 0x380   :  { %v3780_v62 = vmul.f32 %v8894_v1, %v3652_v35  ;;  %v3782_v21 = vmul.f32 %v8897_v15, %v3654_v3  ;;  %v3779_v16 = vmul.f32 %v8879_v45, %v3651_v49  ;;  %v9238_v19 = vadd.f32 %v8923_v4, %v3718_v41 }
 0x381   :  { %v3781_v48 = vmul.f32 %v8885_v42, %v3653_v44  ;;  %v9233_v46 = vpop.eup %5832  ;;  %v3595_v9 = vmul.f32 %v8964_v55, %v10153_v60  ;;  %v10155_v44 = vld [vmem:[#allocation43_spill] sm:$0xff] }
 0x382   :  { %v3908_v0 = vadd.f32 %v8903_v47, %v3780_v62  ;;  %v3910_v39 = vadd.f32 %v8912_v13, %v3782_v21  ;;  %v3907_v18 = vadd.f32 %v8882_v32, %v3779_v16  ;;  %v3658_v28 = vmul.f32 %v9233_v46, %v8810_v26 }
 0x383   :  { %v3909_v56 = vadd.f32 %v8888_v29, %v3781_v48  ;;  %v3660_v38 = vmul.f32 %v9233_v46, %v8822_v14  ;;  %v3657_v51 = vmul.f32 %v9233_v46, %v8802_v17  ;;  %v3659_v33 = vmul.f32 %v9233_v46, %v8813_v53 }
 0x384   :  { %v3962_v40 = vpack.c.bf16 %v3908_v0, %v3902_v61  ;;  %v3964_v5 = vpack.c.bf16 %v3910_v39, %v3904_v6  ;;  %v3961_v31 = vpack.c.bf16 %v3907_v18, %v3901_v25  ;;  %v3786_v10 = vmul.f32 %v8894_v1, %v3658_v28  ;;  %v10154_v6 = vld [vmem:[#allocation14_spill] sm:$0xff]  ;;  %v10157_v39 = vld [vmem:[#allocation47_spill] sm:$0xff] }
 0x385   :  { %v3963_v55 = vpack.c.bf16 %v3909_v56, %v3903_v37  ;;  %v3788_v35 = vmul.f32 %v8897_v15, %v3660_v38  ;;  %v3785_v26 = vmul.f32 %v8879_v45, %v3657_v51  ;;  %v3787_v14 = vmul.f32 %v8885_v42, %v3659_v33  ;;  %v10156_v37 = vld [vmem:[#allocation89_spill] sm:$0xff]  ;;  %v10159_v38 = vld [vmem:[#allocation71_spill] sm:$0xff] }
 0x386   :  { %v9254_v3 = vpop.eup %5834  ;;  %4444 = vmatprep.mubr.bf16.mxu1 %v3962_v40  ;;  %4541 = vmatprep.mubr.bf16.mxu0 %v3964_v5  ;;  %v9259_v61 = vadd.f32 %v8923_v4, %v3724_v2  ;;  %v3914_v53 = vadd.f32 %v8903_v47, %v3786_v10  ;;  %v3717_v60 = vmul.f32 %v10157_v39, %v3589_v7 }
 0x387   :  { %4445 = vmatmul.mubr.bf16.gmra.mxu1 %v3961_v31  ;;  %4542 = vmatmul.mubr.bf16.gmra.mxu0 %v3963_v55  ;;  %v3664_v17 = vmul.f32 %v9254_v3, %v8835_v59  ;;  %v3666_v49 = vmul.f32 %v9254_v3, %v10154_v6  ;;  %v3916_v25 = vadd.f32 %v8912_v13, %v3788_v35 }
 0x388   :  { %v3663_v62 = vmul.f32 %v9254_v3, %v10155_v44  ;;  %v3913_v21 = vadd.f32 %v8882_v32, %v3785_v26  ;;  %v3665_v41 = vmul.f32 %v9254_v3, %v10156_v37  ;;  %v3915_v59 = vadd.f32 %v8888_v29, %v3787_v14  ;;  %v10161_v26 = vld [vmem:[#allocation69_spill] sm:$0xff] }
 0x389   :  { %v3792_v16 = vmul.f32 %v8894_v1, %v3664_v17  ;;  %v3794_v48 = vmul.f32 %v8897_v15, %v3666_v49  ;;  %v3936_v2 = vpack.c.bf16 %v9259_v61, %v9238_v19  ;;  %v3723_v18 = vmul.f32 %v10157_v39, %v3595_v9  ;;  %v10158_v1 = vld [vmem:[#allocation102_spill] sm:$0xff]  ;;  %v10166_v37 = vld [vmem:[#allocation73_spill] sm:$0xff] }
 0x38a   :  { %v3791_v63 = vmul.f32 %v8879_v45, %v3663_v62  ;;  %v3793_v0 = vmul.f32 %v8885_v42, %v3665_v41  ;;  %v3602_v15 = vmul.f32 %v8992_v58, %v10158_v1  ;;  %v3608_v40 = vmul.f32 %v9012_v57, %v10159_v38  ;;  %v10163_v49 = vld [vmem:[#allocation74_spill] sm:$0xff]  ;;  %v10169_v1 = vld [vmem:[#allocation79_spill] sm:$0xff] }
 0x38b   :  { %v3920_v56 = vadd.f32 %v8903_v47, %v3792_v16  ;;  %v3922_v28 = vadd.f32 %v8912_v13, %v3794_v48  ;;  %v9290_v42 = vadd.f32 %v8900_v23, %v3717_v60  ;;  %v9293_v7 = vadd.f32 %v8900_v23, %v3723_v18  ;;  %v10168_v60 = vld [vmem:[#allocation81_spill] sm:$0xff] }
 0x38c   :  { %v3919_v5 = vadd.f32 %v8882_v32, %v3791_v63  ;;  %v3921_v45 = vadd.f32 %v8888_v29, %v3793_v0  ;;  %v3730_v13 = vmul.f32 %v8906_v34, %v3602_v15  ;;  %v3736_v51 = vmul.f32 %v8906_v34, %v3608_v40  ;;  %v10160_v32 = vld [vmem:[#allocation67_spill] sm:$0xff] }
 0x38d   :  { %v3968_v9 = vpack.c.bf16 %v3920_v56, %v3914_v53  ;;  %v3970_v47 = vpack.c.bf16 %v3922_v28, %v3916_v25  ;;  %v3935_v55 = vpack.c.bf16 %v9293_v7, %v9290_v42  ;;  %v3601_v29 = vmul.f32 %v8992_v58, %v10160_v32  ;;  %v10162_v53 = vld [vmem:[#allocation38_spill] sm:$0xff] }
 0x38e   :  { %v3967_v33 = vpack.c.bf16 %v3919_v5, %v3913_v21  ;;  %v3969_v31 = vpack.c.bf16 %v3921_v45, %v3915_v59  ;;  %v9302_v10 = vadd.f32 %v8923_v4, %v3730_v13  ;;  %v9305_v35 = vadd.f32 %v8923_v4, %v3736_v51  ;;  %v10170_v13 = vld [vmem:[#allocation110_spill] sm:$0xff] }
 0x38f   :  { %4452 = vmatprep.mubr.bf16.mxu1 %v3968_v9  ;;  %4549 = vmatprep.mubr.bf16.mxu0 %v3970_v47  ;;  %v3607_v14 = vmul.f32 %v9012_v57, %v10161_v26  ;;  %v3729_v17 = vmul.f32 %v10157_v39, %v3601_v29  ;;  %v3614_v6 = vmul.f32 %v9046_v50, %v10162_v53  ;;  %v10165_v57 = vld [vmem:[#allocation105_spill] sm:$0xff]  ;;  %v10171_v32 = vld [vmem:[#allocation82_spill] sm:$0xff]  ;;  %v10172_v26 = vld [vmem:[#allocation115_spill] sm:$0xff] }
 0x390   :  { %4453 = vmatmul.mubr.bf16.gmra.mxu1 %v3967_v33  ;;  %4550 = vmatmul.mubr.bf16.gmra.mxu0 %v3969_v31  ;;  %v3620_v58 = vmul.f32 %v9064_v11, %v10163_v49  ;;  %v10164_v25 = vpack.c.bf16 %v9044_v12, %v8941_v20  ;;  %v3942_v44 = vpack.c.bf16 %v9305_v35, %v9302_v10  ;;  %v10167_v20 = vld [vmem:[#allocation78_spill] sm:$0xff]  ;;  %v10174_v49 = vld [vmem:[#allocation83_spill] sm:$0xff] }
 0x391   :  { %v3735_v62 = vmul.f32 %v10157_v39, %v3607_v14  ;;  %v3613_v21 = vmul.f32 %v9046_v50, %v10165_v57  ;;  %v3619_v41 = vmul.f32 %v9064_v11, %v10166_v37  ;;  %v9325_v16 = vadd.f32 %v8900_v23, %v3729_v17  ;;  %v10176_v37 = vld [vmem:[#allocation86_spill] sm:$0xff] }
 0x392   :  { %4590 = vmatprep.mubr.bf16.mxu1 %v10164_v25  ;;  %v3742_v48 = vmul.f32 %v8906_v34, %v3614_v6  ;;  %v3748_v59 = vmul.f32 %v8906_v34, %v3620_v58  ;;  %v3626_v12 = vmul.f32 %v9096_v54, %v10167_v20  ;;  %v3632_v11 = vmul.f32 %v9114_v22, %v10168_v60 }
 0x393   :  { %v9332_v63 = vadd.f32 %v8900_v23, %v3735_v62  ;;  %v3741_v0 = vmul.f32 %v10157_v39, %v3613_v21  ;;  %v3747_v50 = vmul.f32 %v10157_v39, %v3619_v41  ;;  %v3625_v15 = vmul.f32 %v9096_v54, %v10169_v1  ;;  %v10177_v41 = vld [vmem:[#allocation84_spill] sm:$0xff]  ;;  %v10180_v1 = vld [vmem:[#allocation117_spill] sm:$0xff] }
 0x394   :  { %v9339_v18 = vadd.f32 %v8923_v4, %v3742_v48  ;;  %v9342_v56 = vadd.f32 %v8923_v4, %v3748_v59  ;;  %v3754_v28 = vmul.f32 %v8906_v34, %v3626_v12  ;;  %v3760_v45 = vmul.f32 %v8906_v34, %v3632_v11 }
 0x395   :  { %v3941_v38 = vpack.c.bf16 %v9332_v63, %v9325_v16  ;;  %v3869_v40 = vadd.f32 %v8900_v23, %v3741_v0  ;;  %v3875_v5 = vadd.f32 %v8900_v23, %v3747_v50  ;;  %v3631_v51 = vmul.f32 %v9114_v22, %v10170_v13  ;;  %v10173_v22 = vld [vmem:[#allocation12_spill] sm:$0xff]  ;;  %v10178_v50 = vld [vmem:[#allocation87_spill] sm:$0xff] }
 0x396   :  { %v3948_v9 = vpack.c.bf16 %v9342_v56, %v9339_v18  ;;  %v3882_v47 = vadd.f32 %v8923_v4, %v3754_v28  ;;  %v3753_v33 = vmul.f32 %v10157_v39, %v3625_v15  ;;  %v3888_v31 = vadd.f32 %v8923_v4, %v3760_v45  ;;  %v10179_v28 = vld [vmem:[#allocation13_spill] sm:$0xff] }
 0x397   :  { %v3947_v54 = vpack.c.bf16 %v3875_v5, %v3869_v40  ;;  %v3638_v29 = vmul.f32 %v9149_v27, %v10171_v32  ;;  %v3644_v14 = vmul.f32 %v9164_v52, %v10172_v26  ;;  %v3759_v17 = vmul.f32 %v10157_v39, %v3631_v51  ;;  %v10181_v5 = vld [vmem:[#allocation88_spill] sm:$0xff] }
 0x398   :  { %4591 = vmatmul.mubr.bf16.vlgmr.msra.gmra.mxu1 %v3929_v30  ;;  %v3881_v53 = vadd.f32 %v8900_v23, %v3753_v33  ;;  %v3637_v6 = vmul.f32 %v9149_v27, %v10173_v22  ;;  %v3643_v58 = vmul.f32 %v9164_v52, %v10174_v49  ;;  %v3954_v25 = vpack.c.bf16 %v3888_v31, %v3882_v47  ;;  %v10182_v47 = vld [vmem:[#allocation116_spill] sm:$0xff] }
 0x399   :  { %4598 = vmatprep.mubr.bf16.mxu1 %v3936_v2  ;;  %v3766_v62 = vmul.f32 %v8906_v34, %v3638_v29  ;;  %v3772_v24 = vmul.f32 %v8906_v34, %v3644_v14  ;;  %v3650_v30 = vmul.f32 %v9189_v36, %v10175_v8  ;;  %v3887_v57 = vadd.f32 %v8900_v23, %v3759_v17 }
 0x39a   :  { %v3765_v21 = vmul.f32 %v10157_v39, %v3637_v6  ;;  %v3771_v27 = vmul.f32 %v10157_v39, %v3643_v58  ;;  %v3656_v52 = vmul.f32 %v9207_v43, %v10176_v37  ;;  %v3649_v16 = vmul.f32 %v9189_v36, %v10177_v41 }
 0x39b   :  { %v3894_v19 = vadd.f32 %v8923_v4, %v3766_v62  ;;  %v3900_v61 = vadd.f32 %v8923_v4, %v3772_v24  ;;  %v3778_v2 = vmul.f32 %v8906_v34, %v3650_v30  ;;  %v3953_v48 = vpack.c.bf16 %v3887_v57, %v3881_v53 }
 0x39c   :  { %v3893_v59 = vadd.f32 %v8900_v23, %v3765_v21  ;;  %v3899_v20 = vadd.f32 %v8900_v23, %v3771_v27  ;;  %v3784_v12 = vmul.f32 %v8906_v34, %v3656_v52  ;;  %v3655_v60 = vmul.f32 %v9207_v43, %v10178_v50 }
 0x39d   :  { %v3960_v63 = vpack.c.bf16 %v3900_v61, %v3894_v19  ;;  %v3906_v0 = vadd.f32 %v8923_v4, %v3778_v2  ;;  %v3777_v11 = vmul.f32 %v10157_v39, %v3649_v16  ;;  %v3662_v36 = vmul.f32 %v9233_v46, %v10179_v28 }
 0x39e   :  { %v3959_v18 = vpack.c.bf16 %v3899_v20, %v3893_v59  ;;  %v3912_v56 = vadd.f32 %v8923_v4, %v3784_v12  ;;  %v3668_v15 = vmul.f32 %v9254_v3, %v10180_v1  ;;  %v3783_v40 = vmul.f32 %v10157_v39, %v3655_v60 }
 0x39f   :  { %v3661_v45 = vmul.f32 %v9233_v46, %v10181_v5  ;;  %v3667_v13 = vmul.f32 %v9254_v3, %v10182_v47  ;;  %v3790_v51 = vmul.f32 %v8906_v34, %v3662_v36  ;;  %v3905_v31 = vadd.f32 %v8900_v23, %v3777_v11 }
 0x3a0   :  { %4599 = vmatmul.mubr.bf16.gmra.mxu1 %v3935_v55  ;;  %v3966_v43 = vpack.c.bf16 %v3912_v56, %v3906_v0  ;;  %v3796_v33 = vmul.f32 %v8906_v34, %v3668_v15  ;;  %v3911_v46 = vadd.f32 %v8900_v23, %v3783_v40 }
 0x3a1   :  { %4606 = vmatprep.mubr.bf16.mxu1 %v3942_v44  ;;  %v3789_v32 = vmul.f32 %v10157_v39, %v3661_v45  ;;  %v3795_v3 = vmul.f32 %v10157_v39, %v3667_v13  ;;  %v3918_v42 = vadd.f32 %v8923_v4, %v3790_v51  ;;  %v9487_v45 = vld [vmem:[%s9611_s6] ss:$0 sm:$0xff] }
 0x3a2   :  { %v3924_v7 = vadd.f32 %v8923_v4, %v3796_v33  ;;  %v3965_v55 = vpack.c.bf16 %v3911_v46, %v3905_v31 }
 0x3a3   :  { %v3917_v29 = vadd.f32 %v8900_v23, %v3789_v32  ;;  %v3923_v34 = vadd.f32 %v8900_v23, %v3795_v3 }
 0x3a4   :  { %v3972_v26 = vpack.c.bf16 %v3924_v7, %v3918_v42 }
 0x3a5   :  { %v3971_v10 = vpack.c.bf16 %v3923_v34, %v3917_v29 }
 0x3a8   :  { %4607 = vmatmul.mubr.bf16.gmra.mxu1 %v3941_v38 }
 0x3a9   :  { %4614 = vmatprep.mubr.bf16.mxu1 %v3948_v9 }
 0x3b0   :  { %4615 = vmatmul.mubr.bf16.gmra.mxu1 %v3947_v54 }
 0x3b1   :  { %4622 = vmatprep.mubr.bf16.mxu1 %v3954_v25 }
 0x3b8   :  { %4623 = vmatmul.mubr.bf16.gmra.mxu1 %v3953_v48 }
 0x3b9   :  { %4630 = vmatprep.mubr.bf16.mxu1 %v3960_v63 }
 0x3c0   :  { %4631 = vmatmul.mubr.bf16.gmra.mxu1 %v3959_v18 }
 0x3c1   :  { %4638 = vmatprep.mubr.bf16.mxu1 %v3966_v43 }
 0x3c8   :  { %4639 = vmatmul.mubr.bf16.gmra.mxu1 %v3965_v55 }
 0x3c9   :  { %4646 = vmatprep.mubr.bf16.mxu1 %v3972_v26 }
 0x3d0   :  { %4647 = vmatmul.mubr.bf16.gmra.mxu1 %v3971_v10 }
 0x40d   :  { %v5076_v39 = vpop.f32.mrf.mxu1  ;;  %v5140_v44 = vpop.f32.mrf.mxu0 }
 0x40f   :  { %v5077_v4 = vpop.f32.mrf.mxu1  ;;  %v5141_v17 = vpop.f32.mrf.mxu0 }
 0x410   :  { %v5078_v5 = vadd.f32 %v5077_v4, %v5076_v39  ;;  %v5142_v46 = vadd.f32 %v5141_v17, %v5140_v44 }
 0x411   :  { %v5079_v35 = vpop.f32.mrf.mxu1  ;;  %v5143_v22 = vpop.f32.mrf.mxu0 }
 0x412   :  { %v4399_v51 = vadd.f32 %v5078_v5, %v9487_v45 }
 0x413   :  { %v5080_v14 = vpop.f32.mrf.mxu1  ;;  %v5144_v54 = vpop.f32.mrf.mxu0 }
 0x414   :  { %v5081_v33 = vadd.f32 %v5080_v14, %v5079_v35  ;;  %v4496_v42 = vadd.f32 %v5142_v46, %v4399_v51  ;;  %v5145_v26 = vadd.f32 %v5144_v54, %v5143_v22 }
 0x416   :  { %v5082_v23 = vpop.f32.mrf.mxu1  ;;  %v4402_v7 = vadd.f32 %v5081_v33, %v9487_v45 }
 0x417   :  { %v5146_v58 = vpop.f32.mrf.mxu0 }
 0x418   :  { %v5083_v53 = vpop.f32.mrf.mxu1 }
 0x419   :  { %v5147_v24 = vpop.f32.mrf.mxu0  ;;  %v5084_v55 = vadd.f32 %v5083_v53, %v5082_v23 }
 0x41a   :  { %v5085_v38 = vpop.f32.mrf.mxu1  ;;  %v5148_v17 = vadd.f32 %v5147_v24, %v5146_v58 }
 0x41b   :  { %v9432_v30 = vpop.f32.mrf.mxu0  ;;  %v4407_v5 = vadd.f32 %v5084_v55, %v9487_v45 }
 0x41c   :  { %v5086_v9 = vpop.f32.mrf.mxu1 }
 0x41d   :  { %v5150_v27 = vpop.f32.mrf.mxu0  ;;  %v5087_v35 = vadd.f32 %v5086_v9, %v5085_v38  ;;  %v4504_v22 = vadd.f32 %v5148_v17, %v4407_v5 }
 0x41f   :  { %v4410_v54 = vadd.f32 %v5087_v35, %v9487_v45 }
 0x420   :  { %v9422_v6 = vpop.f32.mrf.mxu1 }
 0x422   :  { %v9424_v49 = vpop.f32.mrf.mxu1  ;;  %v9442_v19 = vpop.f32.mrf.mxu0 }
 0x423   :  { %v5090_v33 = vadd.f32 %v9424_v49, %v9422_v6 }
 0x424   :  { %v9426_v25 = vpop.f32.mrf.mxu1  ;;  %v9448_v41 = vpop.f32.mrf.mxu0 }
 0x426   :  { %v9428_v62 = vpop.f32.mrf.mxu1  ;;  %v9452_v48 = vpop.f32.mrf.mxu0 }
 0x428   :  { %v9458_v12 = vpop.f32.mrf.mxu0 }
 0x42a   :  { %v9430_v8 = vpop.f32.mrf.mxu1  ;;  %v9464_v50 = vpop.f32.mrf.mxu0 }
 0x42c   :  { %v9434_v57 = vpop.f32.mrf.mxu1  ;;  %v9470_v18 = vpop.f32.mrf.mxu0 }
 0x42e   :  { %v9436_v21 = vpop.f32.mrf.mxu1  ;;  %v9476_v36 = vpop.f32.mrf.mxu0 }
 0x430   :  { %v9438_v37 = vpop.f32.mrf.mxu1  ;;  %v9480_v15 = vpop.f32.mrf.mxu0 }
 0x434   :  { %v9440_v52 = vpop.f32.mrf.mxu1  ;;  %v9491_v13 = vpop.f32.mrf.mxu0 }
 0x436   :  { %v9444_v61 = vpop.f32.mrf.mxu1  ;;  %v9496_v32 = vpop.f32.mrf.mxu0 }
 0x438   :  { %v9446_v2 = vpop.f32.mrf.mxu1  ;;  %v9499_v39 = vpop.f32.mrf.mxu0 }
 0x43a   :  { %v9450_v16 = vpop.f32.mrf.mxu1  ;;  %v9505_v23 = vpop.f32.mrf.mxu0 }
 0x43d   :  { %v9454_v59 = vpop.f32.mrf.mxu1 }
 0x43e   :  { %v9514_v58 = vpop.f32.mrf.mxu0 }
 0x43f   :  { %v9456_v20 = vpop.f32.mrf.mxu1 }
 0x441   :  { %v9460_v63 = vpop.f32.mrf.mxu1 }
 0x443   :  { %v9462_v0 = vpop.f32.mrf.mxu1 }
 0x447   :  { %v9466_v60 = vpop.f32.mrf.mxu1 }
 0x449   :  { %v9468_v11 = vpop.f32.mrf.mxu1 }
 0x44b   :  { %v9472_v56 = vpop.f32.mrf.mxu1 }
 0x44d   :  { %v9474_v28 = vpop.f32.mrf.mxu1 }
 0x450   :  { %v9478_v1 = vpop.f32.mrf.mxu1 }
 0x452   :  { %v9482_v40 = vpop.f32.mrf.mxu1 }
 0x454   :  { %v9489_v47 = vpop.f32.mrf.mxu1 }
 0x456   :  { %v9493_v43 = vpop.f32.mrf.mxu1 }
 0x457   :  { %10183 = vst [vmem:[#allocation4_spill] sm:$0xff] %v9493_v43  ;;  %v4499_v43 = vadd.f32 %v5145_v26, %v4402_v7  ;;  %v5154_v7 = vadd.f32 %v9448_v41, %v9442_v19  ;;  %v5096_v26 = vadd.f32 %v9434_v57, %v9430_v8 }
 0x458   :  { %v5204_v31 = vpop.f32.mrf.mxu1 }
 0x459   :  { %v4423_v35 = vadd.f32 %v5096_v26, %v9487_v45 }
 0x45a   :  { %v5205_v3 = vpop.f32.mrf.mxu1 }
 0x45b   :  { %v5206_v29 = vadd.f32 %v5205_v3, %v5204_v31  ;;  %v5151_v31 = vadd.f32 %v5150_v27, %v9432_v30  ;;  %v4415_v3 = vadd.f32 %v5090_v33, %v9487_v45  ;;  %v5171_v27 = vpop.f32.mrf.mxu0 }
 0x45c   :  { %v5207_v34 = vpop.f32.mrf.mxu1 }
 0x45d   :  { %v4593_v10 = vadd.f32 %v5206_v29, %v4496_v42  ;;  %v5093_v42 = vadd.f32 %v9428_v62, %v9426_v25  ;;  %v4512_v29 = vadd.f32 %v5154_v7, %v4415_v3  ;;  %v5173_v19 = vpop.f32.mrf.mxu0 }
 0x45e   :  { %v5208_v4 = vpop.f32.mrf.mxu1 }
 0x45f   :  { %4655 = vst [vmem:[%s9612_s7] sm:$0xff] %v4593_v10  ;;  %v5209_v44 = vadd.f32 %v5208_v4, %v5207_v34  ;;  %v4418_v34 = vadd.f32 %v5093_v42, %v9487_v45  ;;  %v5157_v10 = vadd.f32 %v9458_v12, %v9452_v48  ;;  %v5174_v48 = vpop.f32.mrf.mxu0  ;;  %v5108_v42 = vadd.f32 %v9456_v20, %v9454_v59 }
 0x460   :  { %v5210_v14 = vpop.f32.mrf.mxu1 }
 0x461   :  { %v4596_v51 = vadd.f32 %v5209_v44, %v4499_v43  ;;  %v4507_v43 = vadd.f32 %v5151_v31, %v4410_v54  ;;  %v4515_v5 = vadd.f32 %v5157_v10, %v4418_v34  ;;  %v5099_v44 = vadd.f32 %v9438_v37, %v9436_v21 }
 0x462   :  { %v5211_v53 = vpop.f32.mrf.mxu1  ;;  %v5163_v54 = vadd.f32 %v9480_v15, %v9476_v36  ;;  %v5105_v31 = vadd.f32 %v9450_v16, %v9446_v2  ;;  %v5175_v10 = vadd.f32 %v5174_v48, %v5173_v19  ;;  %v5120_v48 = vadd.f32 %v9482_v40, %v9478_v1 }
 0x463   :  { %4656 = vst [vmem:[%s9612_s7 + $0x8] sm:$0xff] %v4596_v51  ;;  %v5212_v38 = vadd.f32 %v5211_v53, %v5210_v14  ;;  %v5160_v14 = vadd.f32 %v9470_v18, %v9464_v50  ;;  %v4426_v53 = vadd.f32 %v5099_v44, %v9487_v45  ;;  %v5176_v50 = vpop.f32.mrf.mxu0 }
 0x464   :  { %v5213_v9 = vpop.f32.mrf.mxu1  ;;  %v4434_v3 = vadd.f32 %v5105_v31, %v9487_v45 }
 0x465   :  { %v4601_v46 = vadd.f32 %v5212_v38, %v4504_v22  ;;  %v4520_v51 = vadd.f32 %v5160_v14, %v4423_v35  ;;  %v5102_v22 = vadd.f32 %v9444_v61, %v9440_v52  ;;  %v4523_v38 = vadd.f32 %v5163_v54, %v4426_v53  ;;  %v5177_v36 = vpop.f32.mrf.mxu0  ;;  %v10184_v54 = vld [vmem:[#allocation4_spill] sm:$0xff] }
 0x466   :  { %v5214_v24 = vpop.f32.mrf.mxu1  ;;  %v5117_v35 = vadd.f32 %v9474_v28, %v9472_v56  ;;  %v5178_v44 = vadd.f32 %v5177_v36, %v5176_v50 }
 0x467   :  { %4657 = vst [vmem:[%s9612_s7 + $0x10] sm:$0xff] %v4601_v46  ;;  %v5215_v6 = vadd.f32 %v5214_v24, %v5213_v9  ;;  %v4431_v9 = vadd.f32 %v5102_v22, %v9487_v45  ;;  %v5166_v46 = vadd.f32 %v9496_v32, %v9491_v13  ;;  %v5179_v13 = vpop.f32.mrf.mxu0 }
 0x468   :  { %v5216_v49 = vpop.f32.mrf.mxu1 }
 0x469   :  { %v4604_v30 = vadd.f32 %v5215_v6, %v4507_v43  ;;  %v4528_v43 = vadd.f32 %v5166_v46, %v4431_v9  ;;  %v5169_v6 = vadd.f32 %v9505_v23, %v9499_v39  ;;  %v5180_v26 = vpop.f32.mrf.mxu0 }
 0x46a   :  { %v5217_v55 = vpop.f32.mrf.mxu1 }
 0x46b   :  { %4658 = vst [vmem:[%s9612_s7 + $0x18] sm:$0xff] %v4604_v30  ;;  %v5218_v25 = vadd.f32 %v5217_v55, %v5216_v49  ;;  %v4531_v7 = vadd.f32 %v5169_v6, %v4434_v3  ;;  %v4439_v30 = vadd.f32 %v5108_v42, %v9487_v45  ;;  %v5111_v55 = vadd.f32 %v9462_v0, %v9460_v63 }
 0x46c   :  { %v5219_v62 = vpop.f32.mrf.mxu1 }
 0x46d   :  { %v4609_v4 = vadd.f32 %v5218_v25, %v4512_v29  ;;  %v5172_v29 = vadd.f32 %v5171_v27, %v9514_v58  ;;  %v4442_v25 = vadd.f32 %v5111_v55, %v9487_v45 }
 0x46e   :  { %v5220_v41 = vpop.f32.mrf.mxu1 }
 0x46f   :  { %4659 = vst [vmem:[%s9612_s7 + $0x20] sm:$0xff] %v4609_v4  ;;  %v5221_v8 = vadd.f32 %v5220_v41, %v5219_v62  ;;  %v4536_v23 = vadd.f32 %v5172_v29, %v4439_v30  ;;  %v5114_v62 = vadd.f32 %v9468_v11, %v9466_v60  ;;  %v5182_v41 = vpop.f32.mrf.mxu0  ;;  %v4539_v58 = vadd.f32 %v5175_v10, %v4442_v25 }
 0x470   :  { %v5222_v57 = vpop.f32.mrf.mxu1 }
 0x471   :  { %v4612_v17 = vadd.f32 %v5221_v8, %v4515_v5  ;;  %v4447_v27 = vadd.f32 %v5114_v62, %v9487_v45 }
 0x472   :  { %v5223_v12 = vpop.f32.mrf.mxu1 }
 0x473   :  { %4660 = vst [vmem:[%s9612_s7 + $0x28] sm:$0xff] %v4612_v17  ;;  %v5224_v21 = vadd.f32 %v5223_v12, %v5222_v57  ;;  %v5183_v57 = vpop.f32.mrf.mxu0  ;;  %v4544_v19 = vadd.f32 %v5178_v44, %v4447_v27  ;;  %v4450_v17 = vadd.f32 %v5117_v35, %v9487_v45  ;;  %v5181_v12 = vadd.f32 %v5180_v26, %v5179_v13 }
 0x474   :  { %v5225_v37 = vpop.f32.mrf.mxu1  ;;  %v5184_v50 = vadd.f32 %v5183_v57, %v5182_v41 }
 0x475   :  { %v4617_v33 = vadd.f32 %v5224_v21, %v4520_v51  ;;  %v5185_v53 = vpop.f32.mrf.mxu0  ;;  %v4547_v21 = vadd.f32 %v5181_v12, %v4450_v17 }
 0x476   :  { %v5226_v18 = vpop.f32.mrf.mxu1 }
 0x477   :  { %4661 = vst [vmem:[%s9612_s7 + $0x30] sm:$0xff] %v4617_v33  ;;  %v5227_v52 = vadd.f32 %v5226_v18, %v5225_v37  ;;  %v4455_v37 = vadd.f32 %v5120_v48, %v9487_v45  ;;  %v5123_v33 = vadd.f32 %v10184_v54, %v9489_v47 }
 0x478   :  { %v5228_v61 = vpop.f32.mrf.mxu1 }
 0x479   :  { %v4620_v24 = vadd.f32 %v5227_v52, %v4523_v38  ;;  %v5186_v38 = vpop.f32.mrf.mxu0  ;;  %v4552_v31 = vadd.f32 %v5184_v50, %v4455_v37  ;;  %v4458_v52 = vadd.f32 %v5123_v33, %v9487_v45 }
 0x47a   :  { %v5229_v15 = vpop.f32.mrf.mxu1  ;;  %v5187_v47 = vadd.f32 %v5186_v38, %v5185_v53 }
 0x47b   :  { %4662 = vst [vmem:[%s9612_s7 + $0x38] sm:$0xff] %v4620_v24  ;;  %v5230_v2 = vadd.f32 %v5229_v15, %v5228_v61 }
 0x47c   :  { %v5231_v16 = vpop.f32.mrf.mxu1  ;;  %v4555_v15 = vadd.f32 %v5187_v47, %v4458_v52 }
 0x47d   :  { %v4625_v49 = vadd.f32 %v5230_v2, %v4528_v43 }
 0x47e   :  { %v5232_v32 = vpop.f32.mrf.mxu1 }
 0x47f   :  { %4663 = vst [vmem:[%s9612_s7 + $0x40] sm:$0xff] %v4625_v49  ;;  %v5233_v59 = vadd.f32 %v5232_v32, %v5231_v16 }
 0x480   :  { %v5234_v20 = vpop.f32.mrf.mxu1 }
 0x481   :  { %v4628_v34 = vadd.f32 %v5233_v59, %v4531_v7 }
 0x482   :  { %v5235_v39 = vpop.f32.mrf.mxu1 }
 0x483   :  { %4664 = vst [vmem:[%s9612_s7 + $0x48] sm:$0xff] %v4628_v34  ;;  %v5236_v63 = vadd.f32 %v5235_v39, %v5234_v20 }
 0x484   :  { %v5237_v0 = vpop.f32.mrf.mxu1 }
 0x485   :  { %v4633_v4 = vadd.f32 %v5236_v63, %v4536_v23 }
 0x486   :  { %v5238_v5 = vpop.f32.mrf.mxu1 }
 0x487   :  { %4665 = vst [vmem:[%s9612_s7 + $0x50] sm:$0xff] %v4633_v4  ;;  %v5239_v60 = vadd.f32 %v5238_v5, %v5237_v0 }
 0x488   :  { %v5240_v11 = vpop.f32.mrf.mxu1 }
 0x489   :  { %v4636_v8 = vadd.f32 %v5239_v60, %v4539_v58 }
 0x48a   :  { %v5241_v14 = vpop.f32.mrf.mxu1 }
 0x48b   :  { %4666 = vst [vmem:[%s9612_s7 + $0x58] sm:$0xff] %v4636_v8  ;;  %v5242_v56 = vadd.f32 %v5241_v14, %v5240_v11 }
 0x48c   :  { %v5243_v28 = vpop.f32.mrf.mxu1 }
 0x48d   :  { %v4641_v51 = vadd.f32 %v5242_v56, %v4544_v19 }
 0x48e   :  { %v5244_v22 = vpop.f32.mrf.mxu1 }
 0x48f   :  { %4667 = vst [vmem:[%s9612_s7 + $0x60] sm:$0xff] %v4641_v51  ;;  %v5245_v1 = vadd.f32 %v5244_v22, %v5243_v28 }
 0x490   :  { %v5246_v40 = vpop.f32.mrf.mxu1 }
 0x491   :  { %v4644_v18 = vadd.f32 %v5245_v1, %v4547_v21 }
 0x492   :  { %v5247_v9 = vpop.f32.mrf.mxu1 }
 0x493   :  { %4668 = vst [vmem:[%s9612_s7 + $0x68] sm:$0xff] %v4644_v18  ;;  %v5248_v61 = vadd.f32 %v5247_v9, %v5246_v40 }
 0x494   :  { %v5249_v46 = vpop.f32.mrf.mxu1 }
 0x495   :  { %v4649_v24 = vadd.f32 %v5248_v61, %v4552_v31 }
 0x496   :  { %v5250_v36 = vpop.f32.mrf.mxu1 }
 0x497   :  { %4669 = vst [vmem:[%s9612_s7 + $0x70] sm:$0xff] %v4649_v24  ;;  %v5251_v43 = vadd.f32 %v5250_v36, %v5249_v46 }
 0x499   :  { %v4652_v3 = vadd.f32 %v5251_v43, %v4555_v15 }
 0x49b   :  { %4670 = vst [vmem:[%s9612_s7 + $0x78] sm:$0xff] %v4652_v3 }

</bundles_post_ra>
